<compile_context>
chip_gen: v7x
topology: tpu7x:2x2x1
jax: 0.10.0
libtpu: 0.0.40
codegen_flags: <defaults>
</compile_context>

<pallas_src>
import functools

import numpy as np
import jax
import jax.numpy as jnp
from jax import lax
from jax.experimental import pallas as pl
from jax.experimental.pallas import tpu as pltpu

_EPS = 1e-5        # PyTorch nn.LayerNorm default
_MEM_ROWS = 8      # encoder runs on one sublane tile of identical rows


# --------------------------- in-kernel helpers --------------------------------

def _layernorm(x, g, b):
    # biased variance, like PyTorch LayerNorm
    mean = jnp.mean(x, axis=-1, keepdims=True)
    var = jnp.mean(jnp.square(x - mean), axis=-1, keepdims=True)
    return (x - mean) * lax.rsqrt(var + _EPS) * g + b


def _attend(q, k, v, masks, scale):
    """Head-batched attention, heads packed along the feature (lane) axis.

    q: (Tq, E); k, v: (Tk, E).  masks = (rep, kv_mask, blk):
      rep     (H*Tk, Tk)  : rep[r, j]   = [r % Tk == j]
      kv_mask (H*Tk, E)   : kv_mask[r,e]= [r // Tk == e // d_head]
      blk     (H*Tk, H*Tk): blk[r, r']  = [r // Tk == r' // Tk]
    k_bd = (rep @ k) * kv_mask is a block-diagonal key matrix, so a single
    q @ k_bd^T gives all heads' scores packed along lanes; the per-head softmax
    denominator is one p @ blk matmul; the final p @ v_bd lands heads already
    packed along E -- no per-head slicing and no concatenate.
    """
    rep, kv_mask, blk = masks
    k_bd = jnp.dot(rep, k, preferred_element_type=jnp.float32) * kv_mask
    v_bd = jnp.dot(rep, v, preferred_element_type=jnp.float32) * kv_mask
    s = lax.dot_general(q, k_bd, (((1,), (1,)), ((), ())),
                        preferred_element_type=jnp.float32) * scale      # (Tq, H*Tk)
    s = s - jnp.max(s, axis=-1, keepdims=True)    # global row max; cancels per head
    p = jnp.exp(s)
    denom = jnp.dot(p, blk, preferred_element_type=jnp.float32)          # per-head sums
    p = p / denom                                 # exact divide (softmax parity)
    return jnp.dot(p, v_bd, preferred_element_type=jnp.float32)          # (Tq, E)


def _self_attention(x, wqkv, bqkv, wo, bo, masks, scale):
    E = x.shape[-1]
    # fused Q/K/V projection: one (T, E) @ (E, 3E) matmul
    qkv = jnp.dot(x, wqkv, preferred_element_type=jnp.float32) + bqkv
    a = _attend(qkv[:, :E], qkv[:, E:2 * E], qkv[:, 2 * E:], masks, scale)
    return jnp.dot(a, wo, preferred_element_type=jnp.float32) + bo


def _cross_attention(y, mem, wq, bq, wkv, bkv, wo, bo, masks, scale):
    E = y.shape[-1]
    q = jnp.dot(y, wq, preferred_element_type=jnp.float32) + bq
    kv = jnp.dot(mem, wkv, preferred_element_type=jnp.float32) + bkv
    a = _attend(q, kv[:, :E], kv[:, E:], masks, scale)
    return jnp.dot(a, wo, preferred_element_type=jnp.float32) + bo


def _ffn(x, w1, b1, w2, b2):
    h = jnp.maximum(jnp.dot(x, w1, preferred_element_type=jnp.float32) + b1, 0.0)
    return jnp.dot(h, w2, preferred_element_type=jnp.float32) + b2


# --------------------------- fused model kernel -------------------------------

def _fused_kernel(feat_ref, tgt_ref,
                  mem_rep, mem_kvm, mem_blk, tgt_rep, tgt_kvm, tgt_blk,
                  e_wqkv, e_bqkv, e_wo, e_bo, e_n1w, e_n1b,
                  e_w1, e_b1, e_w2, e_b2, e_n2w, e_n2b, e_finw, e_finb,
                  d_sa_wqkv, d_sa_bqkv, d_sa_wo, d_sa_bo, d_n1w, d_n1b,
                  d_ca_wq, d_ca_bq, d_ca_wkv, d_ca_bkv, d_ca_wo, d_ca_bo,
                  d_n2w, d_n2b, d_w1, d_b1, d_w2, d_b2, d_n3w, d_n3b,
                  d_finw, d_finb, d_fcw, d_fcb,
                  out_ref, *, num_layers, num_heads):
    E = tgt_ref.shape[2]
    scale = 1.0 / float(E // num_heads) ** 0.5

    # static 0/1 masks, loaded once and reused by every layer
    mem_masks = (mem_rep[...], mem_kvm[...], mem_blk[...])   # Tk = _MEM_ROWS
    tgt_masks = (tgt_rep[...], tgt_kvm[...], tgt_blk[...])   # Tk = T

    # ---- encoder on one 8-row tile of identical rows (memory stays in VMEM) ----
    # src = features.unsqueeze(1).expand(-1, T, -1): every row is identical, so
    # attention over them is uniform and the whole stack is row-wise redundant.
    x = jnp.broadcast_to(feat_ref[0], (_MEM_ROWS, E))
    for l in range(num_layers):                       # post-norm encoder layer
        sa = _self_attention(x, e_wqkv[l], e_bqkv[l], e_wo[l], e_bo[l],
                             mem_masks, scale)
        x = _layernorm(x + sa, e_n1w[l], e_n1b[l])
        ff = _ffn(x, e_w1[l], e_b1[l], e_w2[l], e_b2[l])
        x = _layernorm(x + ff, e_n2w[l], e_n2b[l])
    mem = _layernorm(x, e_finw[...], e_finb[...])     # encoder final norm, (8, E)

    # ---- decoder stack + fc_out ------------------------------------------------
    y = tgt_ref[0]                                    # (T, E)
    for l in range(num_layers):                       # post-norm decoder layer
        # reference forward passes no tgt_mask -> unmasked self-attention
        sa = _self_attention(y, d_sa_wqkv[l], d_sa_bqkv[l], d_sa_wo[l], d_sa_bo[l],
                             tgt_masks, scale)
        y = _layernorm(y + sa, d_n1w[l], d_n1b[l])
        ca = _cross_attention(y, mem, d_ca_wq[l], d_ca_bq[l], d_ca_wkv[l],
                              d_ca_bkv[l], d_ca_wo[l], d_ca_bo[l],
                              mem_masks, scale)
        y = _layernorm(y + ca, d_n2w[l], d_n2b[l])
        ff = _ffn(y, d_w1[l], d_b1[l], d_w2[l], d_b2[l])
        y = _layernorm(y + ff, d_n3w[l], d_n3b[l])
    y = _layernorm(y, d_finw[...], d_finb[...])       # decoder final norm
    # fused fc_out; vocab padded to a lane-dense multiple of 128
    out_ref[0] = jnp.dot(y, d_fcw[...], preferred_element_type=jnp.float32) + d_fcb[...]


# --------------------------- wrappers / glue ----------------------------------

_ENC_KEYS = ("wqkv", "bqkv", "wo", "bo", "n1w", "n1b",
             "w1", "b1", "w2", "b2", "n2w", "n2b", "finw", "finb")
_DEC_KEYS = ("sa_wqkv", "sa_bqkv", "sa_wo", "sa_bo", "n1w", "n1b",
             "ca_wq", "ca_bq", "ca_wkv", "ca_bkv", "ca_wo", "ca_bo", "n2w", "n2b",
             "w1", "b1", "w2", "b2", "n3w", "n3b",
             "finw", "finb", "fcw", "fcb")


def _rep_spec(shape):
    """Full-array block, replicated across the batch grid axis."""
    n = len(shape)
    return pl.BlockSpec(shape, lambda b, n=n: (0,) * n)


def _attn_masks(tk, embed, num_heads):
    """Static 0/1 matrices for block-diagonal head-batched attention (host-built)."""
    d = embed // num_heads
    ht = num_heads * tk
    r = np.arange(ht)[:, None]
    rep = (r % tk == np.arange(tk)[None, :]).astype(np.float32)             # (H*tk, tk)
    kvm = (r // tk == np.arange(embed)[None, :] // d).astype(np.float32)    # (H*tk, E)
    blk = (r // tk == np.arange(ht)[None, :] // tk).astype(np.float32)      # (H*tk, H*tk)
    return jnp.asarray(rep), jnp.asarray(kvm), jnp.asarray(blk)


def _round_up(x, m):
    return ((x + m - 1) // m) * m


def init_params(key, embed_size, hidden_size, vocab_size, num_layers):
    """Weights stored in kernel-ready (in, out) layout, stacked over layers."""
    E, H, V, L = embed_size, hidden_size, vocab_size, num_layers
    Vp = _round_up(V, 128)
    keys = iter(jax.random.split(key, 64))

    def nrm(shape, scale=0.02):
        return scale * jax.random.normal(next(keys), shape, dtype=jnp.float32)

    def zeros(shape):
        return jnp.zeros(shape, jnp.float32)

    def ones(shape):
        return jnp.ones(shape, jnp.float32)

    encoder = {
        "wqkv": nrm((L, E, 3 * E)), "bqkv": zeros((L, 1, 3 * E)),
        "wo": nrm((L, E, E)), "bo": zeros((L, 1, E)),
        "n1w": ones((L, 1, E)), "n1b": zeros((L, 1, E)),
        "w1": nrm((L, E, H)), "b1": zeros((L, 1, H)),
        "w2": nrm((L, H, E)), "b2": zeros((L, 1, E)),
        "n2w": ones((L, 1, E)), "n2b": zeros((L, 1, E)),
        "finw": ones((1, E)), "finb": zeros((1, E)),
    }
    fcw = jnp.pad(nrm((E, V)), ((0, 0), (0, Vp - V)))   # lane-dense fc_out
    decoder = {
        "sa_wqkv": nrm((L, E, 3 * E)), "sa_bqkv": zeros((L, 1, 3 * E)),
        "sa_wo": nrm((L, E, E)), "sa_bo": zeros((L, 1, E)),
        "n1w": ones((L, 1, E)), "n1b": zeros((L, 1, E)),
        "ca_wq": nrm((L, E, E)), "ca_bq": zeros((L, 1, E)),
        "ca_wkv": nrm((L, E, 2 * E)), "ca_bkv": zeros((L, 1, 2 * E)),
        "ca_wo": nrm((L, E, E)), "ca_bo": zeros((L, 1, E)),
        "n2w": ones((L, 1, E)), "n2b": zeros((L, 1, E)),
        "w1": nrm((L, E, H)), "b1": zeros((L, 1, H)),
        "w2": nrm((L, H, E)), "b2": zeros((L, 1, E)),
        "n3w": ones((L, 1, E)), "n3b": zeros((L, 1, E)),
        "finw": ones((1, E)), "finb": zeros((1, E)),
        "fcw": fcw, "fcb": zeros((1, Vp)),
    }
    return {
        "embedding": nrm((V, E), scale=1.0),
        "pos_encoding": zeros((1, 1000, E)),            # PyTorch init: zeros
        "encoder": encoder,
        "decoder": decoder,
    }


def decoder_transformer_forward(params, features, captions, *, num_heads, num_layers):
    # TODO(synk): dropout layers are identity here (inference semantics).
    captions = captions[:, :-1]                         # (B, T)
    B, T = captions.shape
    V, E = params["embedding"].shape
    assert E % num_heads == 0, "embed_size must be divisible by num_heads"

    # glue: embedding gather + positional encoding add
    emb = jnp.take(params["embedding"], captions, axis=0)        # (B, T, E)
    tgt = (emb + params["pos_encoding"][:, :T, :]).astype(jnp.float32)
    feats = features.reshape(B, 1, E).astype(jnp.float32)

    # static attention masks (trace-time constants, tiny)
    mask_arrays = list(_attn_masks(_MEM_ROWS, E, num_heads)) \
                + list(_attn_masks(T, E, num_heads))

    enc_w = [params["encoder"][k] for k in _ENC_KEYS]
    dec_w = [params["decoder"][k] for k in _DEC_KEYS]
    Vp = params["decoder"]["fcw"].shape[1]

    # One fused pallas_call: encoder + decoder + fc_out.  grid=(B,) kept
    # "parallel" so dual-TC chips (v7x) split the batch; on single-TC v5e/v6e
    # the extra grid step costs ~0.35us, negligible for this workload.
    logits_padded = pl.pallas_call(
        functools.partial(_fused_kernel, num_layers=num_layers, num_heads=num_heads),
        out_shape=jax.ShapeDtypeStruct((B, T, Vp), jnp.float32),
        grid=(B,),
        in_specs=[pl.BlockSpec((1, 1, E), lambda b: (b, 0, 0)),     # features
                  pl.BlockSpec((1, T, E), lambda b: (b, 0, 0))]     # tgt embeddings
                 + [_rep_spec(m.shape) for m in mask_arrays]
                 + [_rep_spec(w.shape) for w in enc_w]
                 + [_rep_spec(w.shape) for w in dec_w],
        out_specs=pl.BlockSpec((1, T, Vp), lambda b: (b, 0, 0)),
        compiler_params=pltpu.CompilerParams(dimension_semantics=("parallel",)),
    )(feats, tgt, *mask_arrays, *enc_w, *dec_w)

    return logits_padded[:, :, :V]                      # un-pad vocab


# ------------------------------- main ------------------------------------------

if __name__ == "__main__":
    embed_size, hidden_size, vocab_size = 32, 64, 50
    num_layers, num_heads = 2, 4
    B, S = 2, 8   # captions length S -> transformer sequence length S-1 = 7

    key = jax.random.PRNGKey(0)
    k_param, k_feat, k_cap = jax.random.split(key, 3)

    params = init_params(k_param, embed_size, hidden_size, vocab_size, num_layers)
    features = jax.random.normal(k_feat, (B, embed_size), dtype=jnp.float32)
    captions = jax.random.randint(k_cap, (B, S), 0, vocab_size, dtype=jnp.int32)

    fwd = jax.jit(functools.partial(decoder_transformer_forward,
                                    num_heads=num_heads, num_layers=num_layers))
    out = jax.block_until_ready(fwd(params, features, captions))

    assert out.shape == (B, S - 1, vocab_size), out.shape
    assert bool(jnp.all(jnp.isfinite(out)))
    print("KERNEL_OK")
</pallas_src>

<mosaic_0001>
module attributes {stable_mosaic.version = 11 : i64} {
  func.func @_fused_kernel(%arg0: i32, %arg1: memref<1x1x32xf32, #tpu.memory_space<vmem>>, %arg2: memref<1x7x32xf32, #tpu.memory_space<vmem>>, %arg3: memref<32x8xf32, #tpu.memory_space<vmem>>, %arg4: memref<32x32xf32, #tpu.memory_space<vmem>>, %arg5: memref<32x32xf32, #tpu.memory_space<vmem>>, %arg6: memref<28x7xf32, #tpu.memory_space<vmem>>, %arg7: memref<28x32xf32, #tpu.memory_space<vmem>>, %arg8: memref<28x28xf32, #tpu.memory_space<vmem>>, %arg9: memref<2x32x96xf32, #tpu.memory_space<vmem>>, %arg10: memref<2x1x96xf32, #tpu.memory_space<vmem>>, %arg11: memref<2x32x32xf32, #tpu.memory_space<vmem>>, %arg12: memref<2x1x32xf32, #tpu.memory_space<vmem>>, %arg13: memref<2x1x32xf32, #tpu.memory_space<vmem>>, %arg14: memref<2x1x32xf32, #tpu.memory_space<vmem>>, %arg15: memref<2x32x64xf32, #tpu.memory_space<vmem>>, %arg16: memref<2x1x64xf32, #tpu.memory_space<vmem>>, %arg17: memref<2x64x32xf32, #tpu.memory_space<vmem>>, %arg18: memref<2x1x32xf32, #tpu.memory_space<vmem>>, %arg19: memref<2x1x32xf32, #tpu.memory_space<vmem>>, %arg20: memref<2x1x32xf32, #tpu.memory_space<vmem>>, %arg21: memref<1x32xf32, #tpu.memory_space<vmem>>, %arg22: memref<1x32xf32, #tpu.memory_space<vmem>>, %arg23: memref<2x32x96xf32, #tpu.memory_space<vmem>>, %arg24: memref<2x1x96xf32, #tpu.memory_space<vmem>>, %arg25: memref<2x32x32xf32, #tpu.memory_space<vmem>>, %arg26: memref<2x1x32xf32, #tpu.memory_space<vmem>>, %arg27: memref<2x1x32xf32, #tpu.memory_space<vmem>>, %arg28: memref<2x1x32xf32, #tpu.memory_space<vmem>>, %arg29: memref<2x32x32xf32, #tpu.memory_space<vmem>>, %arg30: memref<2x1x32xf32, #tpu.memory_space<vmem>>, %arg31: memref<2x32x64xf32, #tpu.memory_space<vmem>>, %arg32: memref<2x1x64xf32, #tpu.memory_space<vmem>>, %arg33: memref<2x32x32xf32, #tpu.memory_space<vmem>>, %arg34: memref<2x1x32xf32, #tpu.memory_space<vmem>>, %arg35: memref<2x1x32xf32, #tpu.memory_space<vmem>>, %arg36: memref<2x1x32xf32, #tpu.memory_space<vmem>>, %arg37: memref<2x32x64xf32, #tpu.memory_space<vmem>>, %arg38: memref<2x1x64xf32, #tpu.memory_space<vmem>>, %arg39: memref<2x64x32xf32, #tpu.memory_space<vmem>>, %arg40: memref<2x1x32xf32, #tpu.memory_space<vmem>>, %arg41: memref<2x1x32xf32, #tpu.memory_space<vmem>>, %arg42: memref<2x1x32xf32, #tpu.memory_space<vmem>>, %arg43: memref<1x32xf32, #tpu.memory_space<vmem>>, %arg44: memref<1x32xf32, #tpu.memory_space<vmem>>, %arg45: memref<32x128xf32, #tpu.memory_space<vmem>>, %arg46: memref<1x128xf32, #tpu.memory_space<vmem>>, %arg47: memref<1x7x128xf32, #tpu.memory_space<vmem>>) attributes {dimension_semantics = [#tpu.dimension_semantics<parallel>], iteration_bounds = array<i64: 2>, scalar_prefetch = 0 : i64, scratch_operands = 0 : i64, tpu.core_type = #tpu.core_type<tc>, window_params = [{transform_indices = @transform_0, window_bounds = array<i64: 1, 1, 32>}, {transform_indices = @transform_1, window_bounds = array<i64: 1, 7, 32>}, {pipeline_mode = #tpu.pipeline_mode<synchronous>, transform_indices = @transform_2, window_bounds = array<i64: 32, 8>}, {pipeline_mode = #tpu.pipeline_mode<synchronous>, transform_indices = @transform_3, window_bounds = array<i64: 32, 32>}, {pipeline_mode = #tpu.pipeline_mode<synchronous>, transform_indices = @transform_4, window_bounds = array<i64: 32, 32>}, {pipeline_mode = #tpu.pipeline_mode<synchronous>, transform_indices = @transform_5, window_bounds = array<i64: 28, 7>}, {pipeline_mode = #tpu.pipeline_mode<synchronous>, transform_indices = @transform_6, window_bounds = array<i64: 28, 32>}, {pipeline_mode = #tpu.pipeline_mode<synchronous>, transform_indices = @transform_7, window_bounds = array<i64: 28, 28>}, {pipeline_mode = #tpu.pipeline_mode<synchronous>, transform_indices = @transform_8, window_bounds = array<i64: 2, 32, 96>}, {pipeline_mode = #tpu.pipeline_mode<synchronous>, transform_indices = @transform_9, window_bounds = array<i64: 2, 1, 96>}, {pipeline_mode = #tpu.pipeline_mode<synchronous>, transform_indices = @transform_10, window_bounds = array<i64: 2, 32, 32>}, {pipeline_mode = #tpu.pipeline_mode<synchronous>, transform_indices = @transform_11, window_bounds = array<i64: 2, 1, 32>}, {pipeline_mode = #tpu.pipeline_mode<synchronous>, transform_indices = @transform_12, window_bounds = array<i64: 2, 1, 32>}, {pipeline_mode = #tpu.pipeline_mode<synchronous>, transform_indices = @transform_13, window_bounds = array<i64: 2, 1, 32>}, {pipeline_mode = #tpu.pipeline_mode<synchronous>, transform_indices = @transform_14, window_bounds = array<i64: 2, 32, 64>}, {pipeline_mode = #tpu.pipeline_mode<synchronous>, transform_indices = @transform_15, window_bounds = array<i64: 2, 1, 64>}, {pipeline_mode = #tpu.pipeline_mode<synchronous>, transform_indices = @transform_16, window_bounds = array<i64: 2, 64, 32>}, {pipeline_mode = #tpu.pipeline_mode<synchronous>, transform_indices = @transform_17, window_bounds = array<i64: 2, 1, 32>}, {pipeline_mode = #tpu.pipeline_mode<synchronous>, transform_indices = @transform_18, window_bounds = array<i64: 2, 1, 32>}, {pipeline_mode = #tpu.pipeline_mode<synchronous>, transform_indices = @transform_19, window_bounds = array<i64: 2, 1, 32>}, {pipeline_mode = #tpu.pipeline_mode<synchronous>, transform_indices = @transform_20, window_bounds = array<i64: 1, 32>}, {pipeline_mode = #tpu.pipeline_mode<synchronous>, transform_indices = @transform_21, window_bounds = array<i64: 1, 32>}, {pipeline_mode = #tpu.pipeline_mode<synchronous>, transform_indices = @transform_22, window_bounds = array<i64: 2, 32, 96>}, {pipeline_mode = #tpu.pipeline_mode<synchronous>, transform_indices = @transform_23, window_bounds = array<i64: 2, 1, 96>}, {pipeline_mode = #tpu.pipeline_mode<synchronous>, transform_indices = @transform_24, window_bounds = array<i64: 2, 32, 32>}, {pipeline_mode = #tpu.pipeline_mode<synchronous>, transform_indices = @transform_25, window_bounds = array<i64: 2, 1, 32>}, {pipeline_mode = #tpu.pipeline_mode<synchronous>, transform_indices = @transform_26, window_bounds = array<i64: 2, 1, 32>}, {pipeline_mode = #tpu.pipeline_mode<synchronous>, transform_indices = @transform_27, window_bounds = array<i64: 2, 1, 32>}, {pipeline_mode = #tpu.pipeline_mode<synchronous>, transform_indices = @transform_28, window_bounds = array<i64: 2, 32, 32>}, {pipeline_mode = #tpu.pipeline_mode<synchronous>, transform_indices = @transform_29, window_bounds = array<i64: 2, 1, 32>}, {pipeline_mode = #tpu.pipeline_mode<synchronous>, transform_indices = @transform_30, window_bounds = array<i64: 2, 32, 64>}, {pipeline_mode = #tpu.pipeline_mode<synchronous>, transform_indices = @transform_31, window_bounds = array<i64: 2, 1, 64>}, {pipeline_mode = #tpu.pipeline_mode<synchronous>, transform_indices = @transform_32, window_bounds = array<i64: 2, 32, 32>}, {pipeline_mode = #tpu.pipeline_mode<synchronous>, transform_indices = @transform_33, window_bounds = array<i64: 2, 1, 32>}, {pipeline_mode = #tpu.pipeline_mode<synchronous>, transform_indices = @transform_34, window_bounds = array<i64: 2, 1, 32>}, {pipeline_mode = #tpu.pipeline_mode<synchronous>, transform_indices = @transform_35, window_bounds = array<i64: 2, 1, 32>}, {pipeline_mode = #tpu.pipeline_mode<synchronous>, transform_indices = @transform_36, window_bounds = array<i64: 2, 32, 64>}, {pipeline_mode = #tpu.pipeline_mode<synchronous>, transform_indices = @transform_37, window_bounds = array<i64: 2, 1, 64>}, {pipeline_mode = #tpu.pipeline_mode<synchronous>, transform_indices = @transform_38, window_bounds = array<i64: 2, 64, 32>}, {pipeline_mode = #tpu.pipeline_mode<synchronous>, transform_indices = @transform_39, window_bounds = array<i64: 2, 1, 32>}, {pipeline_mode = #tpu.pipeline_mode<synchronous>, transform_indices = @transform_40, window_bounds = array<i64: 2, 1, 32>}, {pipeline_mode = #tpu.pipeline_mode<synchronous>, transform_indices = @transform_41, window_bounds = array<i64: 2, 1, 32>}, {pipeline_mode = #tpu.pipeline_mode<synchronous>, transform_indices = @transform_42, window_bounds = array<i64: 1, 32>}, {pipeline_mode = #tpu.pipeline_mode<synchronous>, transform_indices = @transform_43, window_bounds = array<i64: 1, 32>}, {pipeline_mode = #tpu.pipeline_mode<synchronous>, transform_indices = @transform_44, window_bounds = array<i64: 32, 128>}, {pipeline_mode = #tpu.pipeline_mode<synchronous>, transform_indices = @transform_45, window_bounds = array<i64: 1, 128>}, {transform_indices = @transform_46, window_bounds = array<i64: 1, 7, 128>}]} {
    %c0 = arith.constant 0 : index
    %c0_0 = arith.constant 0 : index
    %0 = vector.load %arg3[%c0, %c0_0] : memref<32x8xf32, #tpu.memory_space<vmem>>, vector<32x8xf32>
    %c0_1 = arith.constant 0 : index
    %c0_2 = arith.constant 0 : index
    %1 = vector.load %arg4[%c0_1, %c0_2] : memref<32x32xf32, #tpu.memory_space<vmem>>, vector<32x32xf32>
    %c0_3 = arith.constant 0 : index
    %c0_4 = arith.constant 0 : index
    %2 = vector.load %arg5[%c0_3, %c0_4] : memref<32x32xf32, #tpu.memory_space<vmem>>, vector<32x32xf32>
    %c0_5 = arith.constant 0 : index
    %c0_6 = arith.constant 0 : index
    %3 = vector.load %arg6[%c0_5, %c0_6] : memref<28x7xf32, #tpu.memory_space<vmem>>, vector<28x7xf32>
    %c0_7 = arith.constant 0 : index
    %c0_8 = arith.constant 0 : index
    %4 = vector.load %arg7[%c0_7, %c0_8] : memref<28x32xf32, #tpu.memory_space<vmem>>, vector<28x32xf32>
    %c0_9 = arith.constant 0 : index
    %c0_10 = arith.constant 0 : index
    %5 = vector.load %arg8[%c0_9, %c0_10] : memref<28x28xf32, #tpu.memory_space<vmem>>, vector<28x28xf32>
    %c0_11 = arith.constant 0 : index
    %c0_12 = arith.constant 0 : index
    %c0_13 = arith.constant 0 : index
    %6 = vector.load %arg1[%c0_11, %c0_12, %c0_13] : memref<1x1x32xf32, #tpu.memory_space<vmem>>, vector<1x1x32xf32>
    %7 = vector.shape_cast %6 : vector<1x1x32xf32> to vector<1x32xf32>
    %8 = vector.shape_cast %7 : vector<1x32xf32> to vector<1x32xf32>
    %9 = vector.broadcast %8 : vector<1x32xf32> to vector<8x32xf32>
    %c0_14 = arith.constant 0 : index
    %c0_15 = arith.constant 0 : index
    %c0_16 = arith.constant 0 : index
    %10 = vector.load %arg9[%c0_14, %c0_15, %c0_16] : memref<2x32x96xf32, #tpu.memory_space<vmem>>, vector<1x32x96xf32>
    %11 = vector.shape_cast %10 : vector<1x32x96xf32> to vector<32x96xf32>
    %c0_17 = arith.constant 0 : index
    %c0_18 = arith.constant 0 : index
    %c0_19 = arith.constant 0 : index
    %12 = vector.load %arg10[%c0_17, %c0_18, %c0_19] : memref<2x1x96xf32, #tpu.memory_space<vmem>>, vector<1x1x96xf32>
    %13 = vector.shape_cast %12 : vector<1x1x96xf32> to vector<1x96xf32>
    %c0_20 = arith.constant 0 : index
    %c0_21 = arith.constant 0 : index
    %c0_22 = arith.constant 0 : index
    %14 = vector.load %arg11[%c0_20, %c0_21, %c0_22] : memref<2x32x32xf32, #tpu.memory_space<vmem>>, vector<1x32x32xf32>
    %15 = vector.shape_cast %14 : vector<1x32x32xf32> to vector<32x32xf32>
    %c0_23 = arith.constant 0 : index
    %c0_24 = arith.constant 0 : index
    %c0_25 = arith.constant 0 : index
    %16 = vector.load %arg12[%c0_23, %c0_24, %c0_25] : memref<2x1x32xf32, #tpu.memory_space<vmem>>, vector<1x1x32xf32>
    %17 = vector.shape_cast %16 : vector<1x1x32xf32> to vector<1x32xf32>
    %cst = arith.constant dense<0.000000e+00> : vector<8x96xf32>
    %18 = tpu.matmul %9, %11, %cst {dimension_numbers = #tpu.dot_dimension_numbers<[1], [0], [0], [1], [0, 0, 1, 1], [], []>} : vector<8x32xf32>, vector<32x96xf32>, vector<8x96xf32> -> vector<8x96xf32>
    %19 = vector.broadcast %13 : vector<1x96xf32> to vector<8x96xf32>
    %20 = arith.addf %18, %19 : vector<8x96xf32>
    %21 = vector.extract_strided_slice %20 {offsets = [0, 0], sizes = [8, 32], strides = [1, 1]} : vector<8x96xf32> to vector<8x32xf32>
    %22 = vector.extract_strided_slice %20 {offsets = [0, 32], sizes = [8, 32], strides = [1, 1]} : vector<8x96xf32> to vector<8x32xf32>
    %23 = vector.extract_strided_slice %20 {offsets = [0, 64], sizes = [8, 32], strides = [1, 1]} : vector<8x96xf32> to vector<8x32xf32>
    %cst_26 = arith.constant dense<0.000000e+00> : vector<32x32xf32>
    %24 = tpu.matmul %0, %22, %cst_26 {dimension_numbers = #tpu.dot_dimension_numbers<[1], [0], [0], [1], [0, 0, 1, 1], [], []>} : vector<32x8xf32>, vector<8x32xf32>, vector<32x32xf32> -> vector<32x32xf32>
    %25 = arith.mulf %24, %1 : vector<32x32xf32>
    %cst_27 = arith.constant dense<0.000000e+00> : vector<32x32xf32>
    %26 = tpu.matmul %0, %23, %cst_27 {dimension_numbers = #tpu.dot_dimension_numbers<[1], [0], [0], [1], [0, 0, 1, 1], [], []>} : vector<32x8xf32>, vector<8x32xf32>, vector<32x32xf32> -> vector<32x32xf32>
    %27 = arith.mulf %26, %1 : vector<32x32xf32>
    %cst_28 = arith.constant dense<0.000000e+00> : vector<8x32xf32>
    %28 = tpu.matmul %21, %25, %cst_28 {dimension_numbers = #tpu.dot_dimension_numbers<[1], [1], [0], [0], [0, 0, 1, 0], [], []>} : vector<8x32xf32>, vector<32x32xf32>, vector<8x32xf32> -> vector<8x32xf32>
    %cst_29 = arith.constant 0.353553385 : f32
    %29 = vector.broadcast %cst_29 : f32 to vector<8x32xf32>
    %30 = arith.mulf %28, %29 : vector<8x32xf32>
    %cst_30 = arith.constant dense<0xFF800000> : vector<8xf32>
    %31 = vector.multi_reduction <maximumf>, %30, %cst_30 [1] : vector<8x32xf32> to vector<8xf32>
    %32 = vector.shape_cast %31 : vector<8xf32> to vector<8x1xf32>
    %33 = vector.broadcast %32 : vector<8x1xf32> to vector<8x32xf32>
    %34 = arith.subf %30, %33 : vector<8x32xf32>
    %35 = math.exp %34 : vector<8x32xf32>
    %cst_31 = arith.constant dense<0.000000e+00> : vector<8x32xf32>
    %36 = tpu.matmul %35, %2, %cst_31 {dimension_numbers = #tpu.dot_dimension_numbers<[1], [0], [0], [1], [0, 0, 1, 1], [], []>} : vector<8x32xf32>, vector<32x32xf32>, vector<8x32xf32> -> vector<8x32xf32>
    %37 = arith.divf %35, %36 : vector<8x32xf32>
    %cst_32 = arith.constant dense<0.000000e+00> : vector<8x32xf32>
    %38 = tpu.matmul %37, %27, %cst_32 {dimension_numbers = #tpu.dot_dimension_numbers<[1], [0], [0], [1], [0, 0, 1, 1], [], []>} : vector<8x32xf32>, vector<32x32xf32>, vector<8x32xf32> -> vector<8x32xf32>
    %cst_33 = arith.constant dense<0.000000e+00> : vector<8x32xf32>
    %39 = tpu.matmul %38, %15, %cst_33 {dimension_numbers = #tpu.dot_dimension_numbers<[1], [0], [0], [1], [0, 0, 1, 1], [], []>} : vector<8x32xf32>, vector<32x32xf32>, vector<8x32xf32> -> vector<8x32xf32>
    %40 = vector.broadcast %17 : vector<1x32xf32> to vector<8x32xf32>
    %41 = arith.addf %39, %40 : vector<8x32xf32>
    %42 = arith.addf %9, %41 : vector<8x32xf32>
    %c0_34 = arith.constant 0 : index
    %c0_35 = arith.constant 0 : index
    %c0_36 = arith.constant 0 : index
    %43 = vector.load %arg13[%c0_34, %c0_35, %c0_36] : memref<2x1x32xf32, #tpu.memory_space<vmem>>, vector<1x1x32xf32>
    %44 = vector.shape_cast %43 : vector<1x1x32xf32> to vector<1x32xf32>
    %c0_37 = arith.constant 0 : index
    %c0_38 = arith.constant 0 : index
    %c0_39 = arith.constant 0 : index
    %45 = vector.load %arg14[%c0_37, %c0_38, %c0_39] : memref<2x1x32xf32, #tpu.memory_space<vmem>>, vector<1x1x32xf32>
    %46 = vector.shape_cast %45 : vector<1x1x32xf32> to vector<1x32xf32>
    %cst_40 = arith.constant dense<0.000000e+00> : vector<8xf32>
    %47 = vector.multi_reduction <add>, %42, %cst_40 [1] : vector<8x32xf32> to vector<8xf32>
    %48 = vector.shape_cast %47 : vector<8xf32> to vector<8x1xf32>
    %cst_41 = arith.constant 3.200000e+01 : f32
    %49 = vector.broadcast %cst_41 : f32 to vector<8x1xf32>
    %50 = arith.divf %48, %49 : vector<8x1xf32>
    %51 = vector.broadcast %50 : vector<8x1xf32> to vector<8x32xf32>
    %52 = arith.subf %42, %51 : vector<8x32xf32>
    %53 = arith.mulf %52, %52 : vector<8x32xf32>
    %cst_42 = arith.constant dense<0.000000e+00> : vector<8xf32>
    %54 = vector.multi_reduction <add>, %53, %cst_42 [1] : vector<8x32xf32> to vector<8xf32>
    %55 = vector.shape_cast %54 : vector<8xf32> to vector<8x1xf32>
    %cst_43 = arith.constant 3.200000e+01 : f32
    %56 = vector.broadcast %cst_43 : f32 to vector<8x1xf32>
    %57 = arith.divf %55, %56 : vector<8x1xf32>
    %58 = vector.broadcast %50 : vector<8x1xf32> to vector<8x32xf32>
    %59 = arith.subf %42, %58 : vector<8x32xf32>
    %cst_44 = arith.constant 9.99999974E-6 : f32
    %60 = vector.broadcast %cst_44 : f32 to vector<8x1xf32>
    %61 = arith.addf %57, %60 : vector<8x1xf32>
    %62 = math.rsqrt %61 : vector<8x1xf32>
    %63 = vector.broadcast %62 : vector<8x1xf32> to vector<8x32xf32>
    %64 = arith.mulf %59, %63 : vector<8x32xf32>
    %65 = vector.broadcast %44 : vector<1x32xf32> to vector<8x32xf32>
    %66 = arith.mulf %64, %65 : vector<8x32xf32>
    %67 = vector.broadcast %46 : vector<1x32xf32> to vector<8x32xf32>
    %68 = arith.addf %66, %67 : vector<8x32xf32>
    %c0_45 = arith.constant 0 : index
    %c0_46 = arith.constant 0 : index
    %c0_47 = arith.constant 0 : index
    %69 = vector.load %arg15[%c0_45, %c0_46, %c0_47] : memref<2x32x64xf32, #tpu.memory_space<vmem>>, vector<1x32x64xf32>
    %70 = vector.shape_cast %69 : vector<1x32x64xf32> to vector<32x64xf32>
    %c0_48 = arith.constant 0 : index
    %c0_49 = arith.constant 0 : index
    %c0_50 = arith.constant 0 : index
    %71 = vector.load %arg16[%c0_48, %c0_49, %c0_50] : memref<2x1x64xf32, #tpu.memory_space<vmem>>, vector<1x1x64xf32>
    %72 = vector.shape_cast %71 : vector<1x1x64xf32> to vector<1x64xf32>
    %c0_51 = arith.constant 0 : index
    %c0_52 = arith.constant 0 : index
    %c0_53 = arith.constant 0 : index
    %73 = vector.load %arg17[%c0_51, %c0_52, %c0_53] : memref<2x64x32xf32, #tpu.memory_space<vmem>>, vector<1x64x32xf32>
    %74 = vector.shape_cast %73 : vector<1x64x32xf32> to vector<64x32xf32>
    %c0_54 = arith.constant 0 : index
    %c0_55 = arith.constant 0 : index
    %c0_56 = arith.constant 0 : index
    %75 = vector.load %arg18[%c0_54, %c0_55, %c0_56] : memref<2x1x32xf32, #tpu.memory_space<vmem>>, vector<1x1x32xf32>
    %76 = vector.shape_cast %75 : vector<1x1x32xf32> to vector<1x32xf32>
    %cst_57 = arith.constant dense<0.000000e+00> : vector<8x64xf32>
    %77 = tpu.matmul %68, %70, %cst_57 {dimension_numbers = #tpu.dot_dimension_numbers<[1], [0], [0], [1], [0, 0, 1, 1], [], []>} : vector<8x32xf32>, vector<32x64xf32>, vector<8x64xf32> -> vector<8x64xf32>
    %78 = vector.broadcast %72 : vector<1x64xf32> to vector<8x64xf32>
    %79 = arith.addf %77, %78 : vector<8x64xf32>
    %cst_58 = arith.constant 0.000000e+00 : f32
    %80 = vector.broadcast %cst_58 : f32 to vector<8x64xf32>
    %81 = arith.maximumf %79, %80 : vector<8x64xf32>
    %cst_59 = arith.constant dense<0.000000e+00> : vector<8x32xf32>
    %82 = tpu.matmul %81, %74, %cst_59 {dimension_numbers = #tpu.dot_dimension_numbers<[1], [0], [0], [1], [0, 0, 1, 1], [], []>} : vector<8x64xf32>, vector<64x32xf32>, vector<8x32xf32> -> vector<8x32xf32>
    %83 = vector.broadcast %76 : vector<1x32xf32> to vector<8x32xf32>
    %84 = arith.addf %82, %83 : vector<8x32xf32>
    %85 = arith.addf %68, %84 : vector<8x32xf32>
    %c0_60 = arith.constant 0 : index
    %c0_61 = arith.constant 0 : index
    %c0_62 = arith.constant 0 : index
    %86 = vector.load %arg19[%c0_60, %c0_61, %c0_62] : memref<2x1x32xf32, #tpu.memory_space<vmem>>, vector<1x1x32xf32>
    %87 = vector.shape_cast %86 : vector<1x1x32xf32> to vector<1x32xf32>
    %c0_63 = arith.constant 0 : index
    %c0_64 = arith.constant 0 : index
    %c0_65 = arith.constant 0 : index
    %88 = vector.load %arg20[%c0_63, %c0_64, %c0_65] : memref<2x1x32xf32, #tpu.memory_space<vmem>>, vector<1x1x32xf32>
    %89 = vector.shape_cast %88 : vector<1x1x32xf32> to vector<1x32xf32>
    %cst_66 = arith.constant dense<0.000000e+00> : vector<8xf32>
    %90 = vector.multi_reduction <add>, %85, %cst_66 [1] : vector<8x32xf32> to vector<8xf32>
    %91 = vector.shape_cast %90 : vector<8xf32> to vector<8x1xf32>
    %cst_67 = arith.constant 3.200000e+01 : f32
    %92 = vector.broadcast %cst_67 : f32 to vector<8x1xf32>
    %93 = arith.divf %91, %92 : vector<8x1xf32>
    %94 = vector.broadcast %93 : vector<8x1xf32> to vector<8x32xf32>
    %95 = arith.subf %85, %94 : vector<8x32xf32>
    %96 = arith.mulf %95, %95 : vector<8x32xf32>
    %cst_68 = arith.constant dense<0.000000e+00> : vector<8xf32>
    %97 = vector.multi_reduction <add>, %96, %cst_68 [1] : vector<8x32xf32> to vector<8xf32>
    %98 = vector.shape_cast %97 : vector<8xf32> to vector<8x1xf32>
    %cst_69 = arith.constant 3.200000e+01 : f32
    %99 = vector.broadcast %cst_69 : f32 to vector<8x1xf32>
    %100 = arith.divf %98, %99 : vector<8x1xf32>
    %101 = vector.broadcast %93 : vector<8x1xf32> to vector<8x32xf32>
    %102 = arith.subf %85, %101 : vector<8x32xf32>
    %cst_70 = arith.constant 9.99999974E-6 : f32
    %103 = vector.broadcast %cst_70 : f32 to vector<8x1xf32>
    %104 = arith.addf %100, %103 : vector<8x1xf32>
    %105 = math.rsqrt %104 : vector<8x1xf32>
    %106 = vector.broadcast %105 : vector<8x1xf32> to vector<8x32xf32>
    %107 = arith.mulf %102, %106 : vector<8x32xf32>
    %108 = vector.broadcast %87 : vector<1x32xf32> to vector<8x32xf32>
    %109 = arith.mulf %107, %108 : vector<8x32xf32>
    %110 = vector.broadcast %89 : vector<1x32xf32> to vector<8x32xf32>
    %111 = arith.addf %109, %110 : vector<8x32xf32>
    %c1 = arith.constant 1 : index
    %c0_71 = arith.constant 0 : index
    %c0_72 = arith.constant 0 : index
    %112 = vector.load %arg9[%c1, %c0_71, %c0_72] : memref<2x32x96xf32, #tpu.memory_space<vmem>>, vector<1x32x96xf32>
    %113 = vector.shape_cast %112 : vector<1x32x96xf32> to vector<32x96xf32>
    %c1_73 = arith.constant 1 : index
    %c0_74 = arith.constant 0 : index
    %c0_75 = arith.constant 0 : index
    %114 = vector.load %arg10[%c1_73, %c0_74, %c0_75] : memref<2x1x96xf32, #tpu.memory_space<vmem>>, vector<1x1x96xf32>
    %115 = vector.shape_cast %114 : vector<1x1x96xf32> to vector<1x96xf32>
    %c1_76 = arith.constant 1 : index
    %c0_77 = arith.constant 0 : index
    %c0_78 = arith.constant 0 : index
    %116 = vector.load %arg11[%c1_76, %c0_77, %c0_78] : memref<2x32x32xf32, #tpu.memory_space<vmem>>, vector<1x32x32xf32>
    %117 = vector.shape_cast %116 : vector<1x32x32xf32> to vector<32x32xf32>
    %c1_79 = arith.constant 1 : index
    %c0_80 = arith.constant 0 : index
    %c0_81 = arith.constant 0 : index
    %118 = vector.load %arg12[%c1_79, %c0_80, %c0_81] : memref<2x1x32xf32, #tpu.memory_space<vmem>>, vector<1x1x32xf32>
    %119 = vector.shape_cast %118 : vector<1x1x32xf32> to vector<1x32xf32>
    %cst_82 = arith.constant dense<0.000000e+00> : vector<8x96xf32>
    %120 = tpu.matmul %111, %113, %cst_82 {dimension_numbers = #tpu.dot_dimension_numbers<[1], [0], [0], [1], [0, 0, 1, 1], [], []>} : vector<8x32xf32>, vector<32x96xf32>, vector<8x96xf32> -> vector<8x96xf32>
    %121 = vector.broadcast %115 : vector<1x96xf32> to vector<8x96xf32>
    %122 = arith.addf %120, %121 : vector<8x96xf32>
    %123 = vector.extract_strided_slice %122 {offsets = [0, 0], sizes = [8, 32], strides = [1, 1]} : vector<8x96xf32> to vector<8x32xf32>
    %124 = vector.extract_strided_slice %122 {offsets = [0, 32], sizes = [8, 32], strides = [1, 1]} : vector<8x96xf32> to vector<8x32xf32>
    %125 = vector.extract_strided_slice %122 {offsets = [0, 64], sizes = [8, 32], strides = [1, 1]} : vector<8x96xf32> to vector<8x32xf32>
    %cst_83 = arith.constant dense<0.000000e+00> : vector<32x32xf32>
    %126 = tpu.matmul %0, %124, %cst_83 {dimension_numbers = #tpu.dot_dimension_numbers<[1], [0], [0], [1], [0, 0, 1, 1], [], []>} : vector<32x8xf32>, vector<8x32xf32>, vector<32x32xf32> -> vector<32x32xf32>
    %127 = arith.mulf %126, %1 : vector<32x32xf32>
    %cst_84 = arith.constant dense<0.000000e+00> : vector<32x32xf32>
    %128 = tpu.matmul %0, %125, %cst_84 {dimension_numbers = #tpu.dot_dimension_numbers<[1], [0], [0], [1], [0, 0, 1, 1], [], []>} : vector<32x8xf32>, vector<8x32xf32>, vector<32x32xf32> -> vector<32x32xf32>
    %129 = arith.mulf %128, %1 : vector<32x32xf32>
    %cst_85 = arith.constant dense<0.000000e+00> : vector<8x32xf32>
    %130 = tpu.matmul %123, %127, %cst_85 {dimension_numbers = #tpu.dot_dimension_numbers<[1], [1], [0], [0], [0, 0, 1, 0], [], []>} : vector<8x32xf32>, vector<32x32xf32>, vector<8x32xf32> -> vector<8x32xf32>
    %cst_86 = arith.constant 0.353553385 : f32
    %131 = vector.broadcast %cst_86 : f32 to vector<8x32xf32>
    %132 = arith.mulf %130, %131 : vector<8x32xf32>
    %cst_87 = arith.constant dense<0xFF800000> : vector<8xf32>
    %133 = vector.multi_reduction <maximumf>, %132, %cst_87 [1] : vector<8x32xf32> to vector<8xf32>
    %134 = vector.shape_cast %133 : vector<8xf32> to vector<8x1xf32>
    %135 = vector.broadcast %134 : vector<8x1xf32> to vector<8x32xf32>
    %136 = arith.subf %132, %135 : vector<8x32xf32>
    %137 = math.exp %136 : vector<8x32xf32>
    %cst_88 = arith.constant dense<0.000000e+00> : vector<8x32xf32>
    %138 = tpu.matmul %137, %2, %cst_88 {dimension_numbers = #tpu.dot_dimension_numbers<[1], [0], [0], [1], [0, 0, 1, 1], [], []>} : vector<8x32xf32>, vector<32x32xf32>, vector<8x32xf32> -> vector<8x32xf32>
    %139 = arith.divf %137, %138 : vector<8x32xf32>
    %cst_89 = arith.constant dense<0.000000e+00> : vector<8x32xf32>
    %140 = tpu.matmul %139, %129, %cst_89 {dimension_numbers = #tpu.dot_dimension_numbers<[1], [0], [0], [1], [0, 0, 1, 1], [], []>} : vector<8x32xf32>, vector<32x32xf32>, vector<8x32xf32> -> vector<8x32xf32>
    %cst_90 = arith.constant dense<0.000000e+00> : vector<8x32xf32>
    %141 = tpu.matmul %140, %117, %cst_90 {dimension_numbers = #tpu.dot_dimension_numbers<[1], [0], [0], [1], [0, 0, 1, 1], [], []>} : vector<8x32xf32>, vector<32x32xf32>, vector<8x32xf32> -> vector<8x32xf32>
    %142 = vector.broadcast %119 : vector<1x32xf32> to vector<8x32xf32>
    %143 = arith.addf %141, %142 : vector<8x32xf32>
    %144 = arith.addf %111, %143 : vector<8x32xf32>
    %c1_91 = arith.constant 1 : index
    %c0_92 = arith.constant 0 : index
    %c0_93 = arith.constant 0 : index
    %145 = vector.load %arg13[%c1_91, %c0_92, %c0_93] : memref<2x1x32xf32, #tpu.memory_space<vmem>>, vector<1x1x32xf32>
    %146 = vector.shape_cast %145 : vector<1x1x32xf32> to vector<1x32xf32>
    %c1_94 = arith.constant 1 : index
    %c0_95 = arith.constant 0 : index
    %c0_96 = arith.constant 0 : index
    %147 = vector.load %arg14[%c1_94, %c0_95, %c0_96] : memref<2x1x32xf32, #tpu.memory_space<vmem>>, vector<1x1x32xf32>
    %148 = vector.shape_cast %147 : vector<1x1x32xf32> to vector<1x32xf32>
    %cst_97 = arith.constant dense<0.000000e+00> : vector<8xf32>
    %149 = vector.multi_reduction <add>, %144, %cst_97 [1] : vector<8x32xf32> to vector<8xf32>
    %150 = vector.shape_cast %149 : vector<8xf32> to vector<8x1xf32>
    %cst_98 = arith.constant 3.200000e+01 : f32
    %151 = vector.broadcast %cst_98 : f32 to vector<8x1xf32>
    %152 = arith.divf %150, %151 : vector<8x1xf32>
    %153 = vector.broadcast %152 : vector<8x1xf32> to vector<8x32xf32>
    %154 = arith.subf %144, %153 : vector<8x32xf32>
    %155 = arith.mulf %154, %154 : vector<8x32xf32>
    %cst_99 = arith.constant dense<0.000000e+00> : vector<8xf32>
    %156 = vector.multi_reduction <add>, %155, %cst_99 [1] : vector<8x32xf32> to vector<8xf32>
    %157 = vector.shape_cast %156 : vector<8xf32> to vector<8x1xf32>
    %cst_100 = arith.constant 3.200000e+01 : f32
    %158 = vector.broadcast %cst_100 : f32 to vector<8x1xf32>
    %159 = arith.divf %157, %158 : vector<8x1xf32>
    %160 = vector.broadcast %152 : vector<8x1xf32> to vector<8x32xf32>
    %161 = arith.subf %144, %160 : vector<8x32xf32>
    %cst_101 = arith.constant 9.99999974E-6 : f32
    %162 = vector.broadcast %cst_101 : f32 to vector<8x1xf32>
    %163 = arith.addf %159, %162 : vector<8x1xf32>
    %164 = math.rsqrt %163 : vector<8x1xf32>
    %165 = vector.broadcast %164 : vector<8x1xf32> to vector<8x32xf32>
    %166 = arith.mulf %161, %165 : vector<8x32xf32>
    %167 = vector.broadcast %146 : vector<1x32xf32> to vector<8x32xf32>
    %168 = arith.mulf %166, %167 : vector<8x32xf32>
    %169 = vector.broadcast %148 : vector<1x32xf32> to vector<8x32xf32>
    %170 = arith.addf %168, %169 : vector<8x32xf32>
    %c1_102 = arith.constant 1 : index
    %c0_103 = arith.constant 0 : index
    %c0_104 = arith.constant 0 : index
    %171 = vector.load %arg15[%c1_102, %c0_103, %c0_104] : memref<2x32x64xf32, #tpu.memory_space<vmem>>, vector<1x32x64xf32>
    %172 = vector.shape_cast %171 : vector<1x32x64xf32> to vector<32x64xf32>
    %c1_105 = arith.constant 1 : index
    %c0_106 = arith.constant 0 : index
    %c0_107 = arith.constant 0 : index
    %173 = vector.load %arg16[%c1_105, %c0_106, %c0_107] : memref<2x1x64xf32, #tpu.memory_space<vmem>>, vector<1x1x64xf32>
    %174 = vector.shape_cast %173 : vector<1x1x64xf32> to vector<1x64xf32>
    %c1_108 = arith.constant 1 : index
    %c0_109 = arith.constant 0 : index
    %c0_110 = arith.constant 0 : index
    %175 = vector.load %arg17[%c1_108, %c0_109, %c0_110] : memref<2x64x32xf32, #tpu.memory_space<vmem>>, vector<1x64x32xf32>
    %176 = vector.shape_cast %175 : vector<1x64x32xf32> to vector<64x32xf32>
    %c1_111 = arith.constant 1 : index
    %c0_112 = arith.constant 0 : index
    %c0_113 = arith.constant 0 : index
    %177 = vector.load %arg18[%c1_111, %c0_112, %c0_113] : memref<2x1x32xf32, #tpu.memory_space<vmem>>, vector<1x1x32xf32>
    %178 = vector.shape_cast %177 : vector<1x1x32xf32> to vector<1x32xf32>
    %cst_114 = arith.constant dense<0.000000e+00> : vector<8x64xf32>
    %179 = tpu.matmul %170, %172, %cst_114 {dimension_numbers = #tpu.dot_dimension_numbers<[1], [0], [0], [1], [0, 0, 1, 1], [], []>} : vector<8x32xf32>, vector<32x64xf32>, vector<8x64xf32> -> vector<8x64xf32>
    %180 = vector.broadcast %174 : vector<1x64xf32> to vector<8x64xf32>
    %181 = arith.addf %179, %180 : vector<8x64xf32>
    %cst_115 = arith.constant 0.000000e+00 : f32
    %182 = vector.broadcast %cst_115 : f32 to vector<8x64xf32>
    %183 = arith.maximumf %181, %182 : vector<8x64xf32>
    %cst_116 = arith.constant dense<0.000000e+00> : vector<8x32xf32>
    %184 = tpu.matmul %183, %176, %cst_116 {dimension_numbers = #tpu.dot_dimension_numbers<[1], [0], [0], [1], [0, 0, 1, 1], [], []>} : vector<8x64xf32>, vector<64x32xf32>, vector<8x32xf32> -> vector<8x32xf32>
    %185 = vector.broadcast %178 : vector<1x32xf32> to vector<8x32xf32>
    %186 = arith.addf %184, %185 : vector<8x32xf32>
    %187 = arith.addf %170, %186 : vector<8x32xf32>
    %c1_117 = arith.constant 1 : index
    %c0_118 = arith.constant 0 : index
    %c0_119 = arith.constant 0 : index
    %188 = vector.load %arg19[%c1_117, %c0_118, %c0_119] : memref<2x1x32xf32, #tpu.memory_space<vmem>>, vector<1x1x32xf32>
    %189 = vector.shape_cast %188 : vector<1x1x32xf32> to vector<1x32xf32>
    %c1_120 = arith.constant 1 : index
    %c0_121 = arith.constant 0 : index
    %c0_122 = arith.constant 0 : index
    %190 = vector.load %arg20[%c1_120, %c0_121, %c0_122] : memref<2x1x32xf32, #tpu.memory_space<vmem>>, vector<1x1x32xf32>
    %191 = vector.shape_cast %190 : vector<1x1x32xf32> to vector<1x32xf32>
    %cst_123 = arith.constant dense<0.000000e+00> : vector<8xf32>
    %192 = vector.multi_reduction <add>, %187, %cst_123 [1] : vector<8x32xf32> to vector<8xf32>
    %193 = vector.shape_cast %192 : vector<8xf32> to vector<8x1xf32>
    %cst_124 = arith.constant 3.200000e+01 : f32
    %194 = vector.broadcast %cst_124 : f32 to vector<8x1xf32>
    %195 = arith.divf %193, %194 : vector<8x1xf32>
    %196 = vector.broadcast %195 : vector<8x1xf32> to vector<8x32xf32>
    %197 = arith.subf %187, %196 : vector<8x32xf32>
    %198 = arith.mulf %197, %197 : vector<8x32xf32>
    %cst_125 = arith.constant dense<0.000000e+00> : vector<8xf32>
    %199 = vector.multi_reduction <add>, %198, %cst_125 [1] : vector<8x32xf32> to vector<8xf32>
    %200 = vector.shape_cast %199 : vector<8xf32> to vector<8x1xf32>
    %cst_126 = arith.constant 3.200000e+01 : f32
    %201 = vector.broadcast %cst_126 : f32 to vector<8x1xf32>
    %202 = arith.divf %200, %201 : vector<8x1xf32>
    %203 = vector.broadcast %195 : vector<8x1xf32> to vector<8x32xf32>
    %204 = arith.subf %187, %203 : vector<8x32xf32>
    %cst_127 = arith.constant 9.99999974E-6 : f32
    %205 = vector.broadcast %cst_127 : f32 to vector<8x1xf32>
    %206 = arith.addf %202, %205 : vector<8x1xf32>
    %207 = math.rsqrt %206 : vector<8x1xf32>
    %208 = vector.broadcast %207 : vector<8x1xf32> to vector<8x32xf32>
    %209 = arith.mulf %204, %208 : vector<8x32xf32>
    %210 = vector.broadcast %189 : vector<1x32xf32> to vector<8x32xf32>
    %211 = arith.mulf %209, %210 : vector<8x32xf32>
    %212 = vector.broadcast %191 : vector<1x32xf32> to vector<8x32xf32>
    %213 = arith.addf %211, %212 : vector<8x32xf32>
    %c0_128 = arith.constant 0 : index
    %c0_129 = arith.constant 0 : index
    %214 = vector.load %arg21[%c0_128, %c0_129] : memref<1x32xf32, #tpu.memory_space<vmem>>, vector<1x32xf32>
    %c0_130 = arith.constant 0 : index
    %c0_131 = arith.constant 0 : index
    %215 = vector.load %arg22[%c0_130, %c0_131] : memref<1x32xf32, #tpu.memory_space<vmem>>, vector<1x32xf32>
    %cst_132 = arith.constant dense<0.000000e+00> : vector<8xf32>
    %216 = vector.multi_reduction <add>, %213, %cst_132 [1] : vector<8x32xf32> to vector<8xf32>
    %217 = vector.shape_cast %216 : vector<8xf32> to vector<8x1xf32>
    %cst_133 = arith.constant 3.200000e+01 : f32
    %218 = vector.broadcast %cst_133 : f32 to vector<8x1xf32>
    %219 = arith.divf %217, %218 : vector<8x1xf32>
    %220 = vector.broadcast %219 : vector<8x1xf32> to vector<8x32xf32>
    %221 = arith.subf %213, %220 : vector<8x32xf32>
    %222 = arith.mulf %221, %221 : vector<8x32xf32>
    %cst_134 = arith.constant dense<0.000000e+00> : vector<8xf32>
    %223 = vector.multi_reduction <add>, %222, %cst_134 [1] : vector<8x32xf32> to vector<8xf32>
    %224 = vector.shape_cast %223 : vector<8xf32> to vector<8x1xf32>
    %cst_135 = arith.constant 3.200000e+01 : f32
    %225 = vector.broadcast %cst_135 : f32 to vector<8x1xf32>
    %226 = arith.divf %224, %225 : vector<8x1xf32>
    %227 = vector.broadcast %219 : vector<8x1xf32> to vector<8x32xf32>
    %228 = arith.subf %213, %227 : vector<8x32xf32>
    %cst_136 = arith.constant 9.99999974E-6 : f32
    %229 = vector.broadcast %cst_136 : f32 to vector<8x1xf32>
    %230 = arith.addf %226, %229 : vector<8x1xf32>
    %231 = math.rsqrt %230 : vector<8x1xf32>
    %232 = vector.broadcast %231 : vector<8x1xf32> to vector<8x32xf32>
    %233 = arith.mulf %228, %232 : vector<8x32xf32>
    %234 = vector.broadcast %214 : vector<1x32xf32> to vector<8x32xf32>
    %235 = arith.mulf %233, %234 : vector<8x32xf32>
    %236 = vector.broadcast %215 : vector<1x32xf32> to vector<8x32xf32>
    %237 = arith.addf %235, %236 : vector<8x32xf32>
    %c0_137 = arith.constant 0 : index
    %c0_138 = arith.constant 0 : index
    %c0_139 = arith.constant 0 : index
    %238 = vector.load %arg2[%c0_137, %c0_138, %c0_139] : memref<1x7x32xf32, #tpu.memory_space<vmem>>, vector<1x7x32xf32>
    %239 = vector.shape_cast %238 : vector<1x7x32xf32> to vector<7x32xf32>
    %c0_140 = arith.constant 0 : index
    %c0_141 = arith.constant 0 : index
    %c0_142 = arith.constant 0 : index
    %240 = vector.load %arg23[%c0_140, %c0_141, %c0_142] : memref<2x32x96xf32, #tpu.memory_space<vmem>>, vector<1x32x96xf32>
    %241 = vector.shape_cast %240 : vector<1x32x96xf32> to vector<32x96xf32>
    %c0_143 = arith.constant 0 : index
    %c0_144 = arith.constant 0 : index
    %c0_145 = arith.constant 0 : index
    %242 = vector.load %arg24[%c0_143, %c0_144, %c0_145] : memref<2x1x96xf32, #tpu.memory_space<vmem>>, vector<1x1x96xf32>
    %243 = vector.shape_cast %242 : vector<1x1x96xf32> to vector<1x96xf32>
    %c0_146 = arith.constant 0 : index
    %c0_147 = arith.constant 0 : index
    %c0_148 = arith.constant 0 : index
    %244 = vector.load %arg25[%c0_146, %c0_147, %c0_148] : memref<2x32x32xf32, #tpu.memory_space<vmem>>, vector<1x32x32xf32>
    %245 = vector.shape_cast %244 : vector<1x32x32xf32> to vector<32x32xf32>
    %c0_149 = arith.constant 0 : index
    %c0_150 = arith.constant 0 : index
    %c0_151 = arith.constant 0 : index
    %246 = vector.load %arg26[%c0_149, %c0_150, %c0_151] : memref<2x1x32xf32, #tpu.memory_space<vmem>>, vector<1x1x32xf32>
    %247 = vector.shape_cast %246 : vector<1x1x32xf32> to vector<1x32xf32>
    %cst_152 = arith.constant dense<0.000000e+00> : vector<7x96xf32>
    %248 = tpu.matmul %239, %241, %cst_152 {dimension_numbers = #tpu.dot_dimension_numbers<[1], [0], [0], [1], [0, 0, 1, 1], [], []>} : vector<7x32xf32>, vector<32x96xf32>, vector<7x96xf32> -> vector<7x96xf32>
    %249 = vector.broadcast %243 : vector<1x96xf32> to vector<7x96xf32>
    %250 = arith.addf %248, %249 : vector<7x96xf32>
    %251 = vector.extract_strided_slice %250 {offsets = [0, 0], sizes = [7, 32], strides = [1, 1]} : vector<7x96xf32> to vector<7x32xf32>
    %252 = vector.extract_strided_slice %250 {offsets = [0, 32], sizes = [7, 32], strides = [1, 1]} : vector<7x96xf32> to vector<7x32xf32>
    %253 = vector.extract_strided_slice %250 {offsets = [0, 64], sizes = [7, 32], strides = [1, 1]} : vector<7x96xf32> to vector<7x32xf32>
    %cst_153 = arith.constant dense<0.000000e+00> : vector<28x32xf32>
    %254 = tpu.matmul %3, %252, %cst_153 {dimension_numbers = #tpu.dot_dimension_numbers<[1], [0], [0], [1], [0, 0, 1, 1], [], []>} : vector<28x7xf32>, vector<7x32xf32>, vector<28x32xf32> -> vector<28x32xf32>
    %255 = arith.mulf %254, %4 : vector<28x32xf32>
    %cst_154 = arith.constant dense<0.000000e+00> : vector<28x32xf32>
    %256 = tpu.matmul %3, %253, %cst_154 {dimension_numbers = #tpu.dot_dimension_numbers<[1], [0], [0], [1], [0, 0, 1, 1], [], []>} : vector<28x7xf32>, vector<7x32xf32>, vector<28x32xf32> -> vector<28x32xf32>
    %257 = arith.mulf %256, %4 : vector<28x32xf32>
    %cst_155 = arith.constant dense<0.000000e+00> : vector<7x28xf32>
    %258 = tpu.matmul %251, %255, %cst_155 {dimension_numbers = #tpu.dot_dimension_numbers<[1], [1], [0], [0], [0, 0, 1, 0], [], []>} : vector<7x32xf32>, vector<28x32xf32>, vector<7x28xf32> -> vector<7x28xf32>
    %cst_156 = arith.constant 0.353553385 : f32
    %259 = vector.broadcast %cst_156 : f32 to vector<7x28xf32>
    %260 = arith.mulf %258, %259 : vector<7x28xf32>
    %cst_157 = arith.constant dense<0xFF800000> : vector<7xf32>
    %261 = vector.multi_reduction <maximumf>, %260, %cst_157 [1] : vector<7x28xf32> to vector<7xf32>
    %262 = vector.shape_cast %261 : vector<7xf32> to vector<7x1xf32>
    %263 = vector.broadcast %262 : vector<7x1xf32> to vector<7x28xf32>
    %264 = arith.subf %260, %263 : vector<7x28xf32>
    %265 = math.exp %264 : vector<7x28xf32>
    %cst_158 = arith.constant dense<0.000000e+00> : vector<7x28xf32>
    %266 = tpu.matmul %265, %5, %cst_158 {dimension_numbers = #tpu.dot_dimension_numbers<[1], [0], [0], [1], [0, 0, 1, 1], [], []>} : vector<7x28xf32>, vector<28x28xf32>, vector<7x28xf32> -> vector<7x28xf32>
    %267 = arith.divf %265, %266 : vector<7x28xf32>
    %cst_159 = arith.constant dense<0.000000e+00> : vector<7x32xf32>
    %268 = tpu.matmul %267, %257, %cst_159 {dimension_numbers = #tpu.dot_dimension_numbers<[1], [0], [0], [1], [0, 0, 1, 1], [], []>} : vector<7x28xf32>, vector<28x32xf32>, vector<7x32xf32> -> vector<7x32xf32>
    %cst_160 = arith.constant dense<0.000000e+00> : vector<7x32xf32>
    %269 = tpu.matmul %268, %245, %cst_160 {dimension_numbers = #tpu.dot_dimension_numbers<[1], [0], [0], [1], [0, 0, 1, 1], [], []>} : vector<7x32xf32>, vector<32x32xf32>, vector<7x32xf32> -> vector<7x32xf32>
    %270 = vector.broadcast %247 : vector<1x32xf32> to vector<7x32xf32>
    %271 = arith.addf %269, %270 : vector<7x32xf32>
    %272 = arith.addf %239, %271 : vector<7x32xf32>
    %c0_161 = arith.constant 0 : index
    %c0_162 = arith.constant 0 : index
    %c0_163 = arith.constant 0 : index
    %273 = vector.load %arg27[%c0_161, %c0_162, %c0_163] : memref<2x1x32xf32, #tpu.memory_space<vmem>>, vector<1x1x32xf32>
    %274 = vector.shape_cast %273 : vector<1x1x32xf32> to vector<1x32xf32>
    %c0_164 = arith.constant 0 : index
    %c0_165 = arith.constant 0 : index
    %c0_166 = arith.constant 0 : index
    %275 = vector.load %arg28[%c0_164, %c0_165, %c0_166] : memref<2x1x32xf32, #tpu.memory_space<vmem>>, vector<1x1x32xf32>
    %276 = vector.shape_cast %275 : vector<1x1x32xf32> to vector<1x32xf32>
    %cst_167 = arith.constant dense<0.000000e+00> : vector<7xf32>
    %277 = vector.multi_reduction <add>, %272, %cst_167 [1] : vector<7x32xf32> to vector<7xf32>
    %278 = vector.shape_cast %277 : vector<7xf32> to vector<7x1xf32>
    %cst_168 = arith.constant 3.200000e+01 : f32
    %279 = vector.broadcast %cst_168 : f32 to vector<7x1xf32>
    %280 = arith.divf %278, %279 : vector<7x1xf32>
    %281 = vector.broadcast %280 : vector<7x1xf32> to vector<7x32xf32>
    %282 = arith.subf %272, %281 : vector<7x32xf32>
    %283 = arith.mulf %282, %282 : vector<7x32xf32>
    %cst_169 = arith.constant dense<0.000000e+00> : vector<7xf32>
    %284 = vector.multi_reduction <add>, %283, %cst_169 [1] : vector<7x32xf32> to vector<7xf32>
    %285 = vector.shape_cast %284 : vector<7xf32> to vector<7x1xf32>
    %cst_170 = arith.constant 3.200000e+01 : f32
    %286 = vector.broadcast %cst_170 : f32 to vector<7x1xf32>
    %287 = arith.divf %285, %286 : vector<7x1xf32>
    %288 = vector.broadcast %280 : vector<7x1xf32> to vector<7x32xf32>
    %289 = arith.subf %272, %288 : vector<7x32xf32>
    %cst_171 = arith.constant 9.99999974E-6 : f32
    %290 = vector.broadcast %cst_171 : f32 to vector<7x1xf32>
    %291 = arith.addf %287, %290 : vector<7x1xf32>
    %292 = math.rsqrt %291 : vector<7x1xf32>
    %293 = vector.broadcast %292 : vector<7x1xf32> to vector<7x32xf32>
    %294 = arith.mulf %289, %293 : vector<7x32xf32>
    %295 = vector.broadcast %274 : vector<1x32xf32> to vector<7x32xf32>
    %296 = arith.mulf %294, %295 : vector<7x32xf32>
    %297 = vector.broadcast %276 : vector<1x32xf32> to vector<7x32xf32>
    %298 = arith.addf %296, %297 : vector<7x32xf32>
    %c0_172 = arith.constant 0 : index
    %c0_173 = arith.constant 0 : index
    %c0_174 = arith.constant 0 : index
    %299 = vector.load %arg29[%c0_172, %c0_173, %c0_174] : memref<2x32x32xf32, #tpu.memory_space<vmem>>, vector<1x32x32xf32>
    %300 = vector.shape_cast %299 : vector<1x32x32xf32> to vector<32x32xf32>
    %c0_175 = arith.constant 0 : index
    %c0_176 = arith.constant 0 : index
    %c0_177 = arith.constant 0 : index
    %301 = vector.load %arg30[%c0_175, %c0_176, %c0_177] : memref<2x1x32xf32, #tpu.memory_space<vmem>>, vector<1x1x32xf32>
    %302 = vector.shape_cast %301 : vector<1x1x32xf32> to vector<1x32xf32>
    %c0_178 = arith.constant 0 : index
    %c0_179 = arith.constant 0 : index
    %c0_180 = arith.constant 0 : index
    %303 = vector.load %arg31[%c0_178, %c0_179, %c0_180] : memref<2x32x64xf32, #tpu.memory_space<vmem>>, vector<1x32x64xf32>
    %304 = vector.shape_cast %303 : vector<1x32x64xf32> to vector<32x64xf32>
    %c0_181 = arith.constant 0 : index
    %c0_182 = arith.constant 0 : index
    %c0_183 = arith.constant 0 : index
    %305 = vector.load %arg32[%c0_181, %c0_182, %c0_183] : memref<2x1x64xf32, #tpu.memory_space<vmem>>, vector<1x1x64xf32>
    %306 = vector.shape_cast %305 : vector<1x1x64xf32> to vector<1x64xf32>
    %c0_184 = arith.constant 0 : index
    %c0_185 = arith.constant 0 : index
    %c0_186 = arith.constant 0 : index
    %307 = vector.load %arg33[%c0_184, %c0_185, %c0_186] : memref<2x32x32xf32, #tpu.memory_space<vmem>>, vector<1x32x32xf32>
    %308 = vector.shape_cast %307 : vector<1x32x32xf32> to vector<32x32xf32>
    %c0_187 = arith.constant 0 : index
    %c0_188 = arith.constant 0 : index
    %c0_189 = arith.constant 0 : index
    %309 = vector.load %arg34[%c0_187, %c0_188, %c0_189] : memref<2x1x32xf32, #tpu.memory_space<vmem>>, vector<1x1x32xf32>
    %310 = vector.shape_cast %309 : vector<1x1x32xf32> to vector<1x32xf32>
    %cst_190 = arith.constant dense<0.000000e+00> : vector<7x32xf32>
    %311 = tpu.matmul %298, %300, %cst_190 {dimension_numbers = #tpu.dot_dimension_numbers<[1], [0], [0], [1], [0, 0, 1, 1], [], []>} : vector<7x32xf32>, vector<32x32xf32>, vector<7x32xf32> -> vector<7x32xf32>
    %312 = vector.broadcast %302 : vector<1x32xf32> to vector<7x32xf32>
    %313 = arith.addf %311, %312 : vector<7x32xf32>
    %cst_191 = arith.constant dense<0.000000e+00> : vector<8x64xf32>
    %314 = tpu.matmul %237, %304, %cst_191 {dimension_numbers = #tpu.dot_dimension_numbers<[1], [0], [0], [1], [0, 0, 1, 1], [], []>} : vector<8x32xf32>, vector<32x64xf32>, vector<8x64xf32> -> vector<8x64xf32>
    %315 = vector.broadcast %306 : vector<1x64xf32> to vector<8x64xf32>
    %316 = arith.addf %314, %315 : vector<8x64xf32>
    %317 = vector.extract_strided_slice %316 {offsets = [0, 0], sizes = [8, 32], strides = [1, 1]} : vector<8x64xf32> to vector<8x32xf32>
    %318 = vector.extract_strided_slice %316 {offsets = [0, 32], sizes = [8, 32], strides = [1, 1]} : vector<8x64xf32> to vector<8x32xf32>
    %cst_192 = arith.constant dense<0.000000e+00> : vector<32x32xf32>
    %319 = tpu.matmul %0, %317, %cst_192 {dimension_numbers = #tpu.dot_dimension_numbers<[1], [0], [0], [1], [0, 0, 1, 1], [], []>} : vector<32x8xf32>, vector<8x32xf32>, vector<32x32xf32> -> vector<32x32xf32>
    %320 = arith.mulf %319, %1 : vector<32x32xf32>
    %cst_193 = arith.constant dense<0.000000e+00> : vector<32x32xf32>
    %321 = tpu.matmul %0, %318, %cst_193 {dimension_numbers = #tpu.dot_dimension_numbers<[1], [0], [0], [1], [0, 0, 1, 1], [], []>} : vector<32x8xf32>, vector<8x32xf32>, vector<32x32xf32> -> vector<32x32xf32>
    %322 = arith.mulf %321, %1 : vector<32x32xf32>
    %cst_194 = arith.constant dense<0.000000e+00> : vector<7x32xf32>
    %323 = tpu.matmul %313, %320, %cst_194 {dimension_numbers = #tpu.dot_dimension_numbers<[1], [1], [0], [0], [0, 0, 1, 0], [], []>} : vector<7x32xf32>, vector<32x32xf32>, vector<7x32xf32> -> vector<7x32xf32>
    %cst_195 = arith.constant 0.353553385 : f32
    %324 = vector.broadcast %cst_195 : f32 to vector<7x32xf32>
    %325 = arith.mulf %323, %324 : vector<7x32xf32>
    %cst_196 = arith.constant dense<0xFF800000> : vector<7xf32>
    %326 = vector.multi_reduction <maximumf>, %325, %cst_196 [1] : vector<7x32xf32> to vector<7xf32>
    %327 = vector.shape_cast %326 : vector<7xf32> to vector<7x1xf32>
    %328 = vector.broadcast %327 : vector<7x1xf32> to vector<7x32xf32>
    %329 = arith.subf %325, %328 : vector<7x32xf32>
    %330 = math.exp %329 : vector<7x32xf32>
    %cst_197 = arith.constant dense<0.000000e+00> : vector<7x32xf32>
    %331 = tpu.matmul %330, %2, %cst_197 {dimension_numbers = #tpu.dot_dimension_numbers<[1], [0], [0], [1], [0, 0, 1, 1], [], []>} : vector<7x32xf32>, vector<32x32xf32>, vector<7x32xf32> -> vector<7x32xf32>
    %332 = arith.divf %330, %331 : vector<7x32xf32>
    %cst_198 = arith.constant dense<0.000000e+00> : vector<7x32xf32>
    %333 = tpu.matmul %332, %322, %cst_198 {dimension_numbers = #tpu.dot_dimension_numbers<[1], [0], [0], [1], [0, 0, 1, 1], [], []>} : vector<7x32xf32>, vector<32x32xf32>, vector<7x32xf32> -> vector<7x32xf32>
    %cst_199 = arith.constant dense<0.000000e+00> : vector<7x32xf32>
    %334 = tpu.matmul %333, %308, %cst_199 {dimension_numbers = #tpu.dot_dimension_numbers<[1], [0], [0], [1], [0, 0, 1, 1], [], []>} : vector<7x32xf32>, vector<32x32xf32>, vector<7x32xf32> -> vector<7x32xf32>
    %335 = vector.broadcast %310 : vector<1x32xf32> to vector<7x32xf32>
    %336 = arith.addf %334, %335 : vector<7x32xf32>
    %337 = arith.addf %298, %336 : vector<7x32xf32>
    %c0_200 = arith.constant 0 : index
    %c0_201 = arith.constant 0 : index
    %c0_202 = arith.constant 0 : index
    %338 = vector.load %arg35[%c0_200, %c0_201, %c0_202] : memref<2x1x32xf32, #tpu.memory_space<vmem>>, vector<1x1x32xf32>
    %339 = vector.shape_cast %338 : vector<1x1x32xf32> to vector<1x32xf32>
    %c0_203 = arith.constant 0 : index
    %c0_204 = arith.constant 0 : index
    %c0_205 = arith.constant 0 : index
    %340 = vector.load %arg36[%c0_203, %c0_204, %c0_205] : memref<2x1x32xf32, #tpu.memory_space<vmem>>, vector<1x1x32xf32>
    %341 = vector.shape_cast %340 : vector<1x1x32xf32> to vector<1x32xf32>
    %cst_206 = arith.constant dense<0.000000e+00> : vector<7xf32>
    %342 = vector.multi_reduction <add>, %337, %cst_206 [1] : vector<7x32xf32> to vector<7xf32>
    %343 = vector.shape_cast %342 : vector<7xf32> to vector<7x1xf32>
    %cst_207 = arith.constant 3.200000e+01 : f32
    %344 = vector.broadcast %cst_207 : f32 to vector<7x1xf32>
    %345 = arith.divf %343, %344 : vector<7x1xf32>
    %346 = vector.broadcast %345 : vector<7x1xf32> to vector<7x32xf32>
    %347 = arith.subf %337, %346 : vector<7x32xf32>
    %348 = arith.mulf %347, %347 : vector<7x32xf32>
    %cst_208 = arith.constant dense<0.000000e+00> : vector<7xf32>
    %349 = vector.multi_reduction <add>, %348, %cst_208 [1] : vector<7x32xf32> to vector<7xf32>
    %350 = vector.shape_cast %349 : vector<7xf32> to vector<7x1xf32>
    %cst_209 = arith.constant 3.200000e+01 : f32
    %351 = vector.broadcast %cst_209 : f32 to vector<7x1xf32>
    %352 = arith.divf %350, %351 : vector<7x1xf32>
    %353 = vector.broadcast %345 : vector<7x1xf32> to vector<7x32xf32>
    %354 = arith.subf %337, %353 : vector<7x32xf32>
    %cst_210 = arith.constant 9.99999974E-6 : f32
    %355 = vector.broadcast %cst_210 : f32 to vector<7x1xf32>
    %356 = arith.addf %352, %355 : vector<7x1xf32>
    %357 = math.rsqrt %356 : vector<7x1xf32>
    %358 = vector.broadcast %357 : vector<7x1xf32> to vector<7x32xf32>
    %359 = arith.mulf %354, %358 : vector<7x32xf32>
    %360 = vector.broadcast %339 : vector<1x32xf32> to vector<7x32xf32>
    %361 = arith.mulf %359, %360 : vector<7x32xf32>
    %362 = vector.broadcast %341 : vector<1x32xf32> to vector<7x32xf32>
    %363 = arith.addf %361, %362 : vector<7x32xf32>
    %c0_211 = arith.constant 0 : index
    %c0_212 = arith.constant 0 : index
    %c0_213 = arith.constant 0 : index
    %364 = vector.load %arg37[%c0_211, %c0_212, %c0_213] : memref<2x32x64xf32, #tpu.memory_space<vmem>>, vector<1x32x64xf32>
    %365 = vector.shape_cast %364 : vector<1x32x64xf32> to vector<32x64xf32>
    %c0_214 = arith.constant 0 : index
    %c0_215 = arith.constant 0 : index
    %c0_216 = arith.constant 0 : index
    %366 = vector.load %arg38[%c0_214, %c0_215, %c0_216] : memref<2x1x64xf32, #tpu.memory_space<vmem>>, vector<1x1x64xf32>
    %367 = vector.shape_cast %366 : vector<1x1x64xf32> to vector<1x64xf32>
    %c0_217 = arith.constant 0 : index
    %c0_218 = arith.constant 0 : index
    %c0_219 = arith.constant 0 : index
    %368 = vector.load %arg39[%c0_217, %c0_218, %c0_219] : memref<2x64x32xf32, #tpu.memory_space<vmem>>, vector<1x64x32xf32>
    %369 = vector.shape_cast %368 : vector<1x64x32xf32> to vector<64x32xf32>
    %c0_220 = arith.constant 0 : index
    %c0_221 = arith.constant 0 : index
    %c0_222 = arith.constant 0 : index
    %370 = vector.load %arg40[%c0_220, %c0_221, %c0_222] : memref<2x1x32xf32, #tpu.memory_space<vmem>>, vector<1x1x32xf32>
    %371 = vector.shape_cast %370 : vector<1x1x32xf32> to vector<1x32xf32>
    %cst_223 = arith.constant dense<0.000000e+00> : vector<7x64xf32>
    %372 = tpu.matmul %363, %365, %cst_223 {dimension_numbers = #tpu.dot_dimension_numbers<[1], [0], [0], [1], [0, 0, 1, 1], [], []>} : vector<7x32xf32>, vector<32x64xf32>, vector<7x64xf32> -> vector<7x64xf32>
    %373 = vector.broadcast %367 : vector<1x64xf32> to vector<7x64xf32>
    %374 = arith.addf %372, %373 : vector<7x64xf32>
    %cst_224 = arith.constant 0.000000e+00 : f32
    %375 = vector.broadcast %cst_224 : f32 to vector<7x64xf32>
    %376 = arith.maximumf %374, %375 : vector<7x64xf32>
    %cst_225 = arith.constant dense<0.000000e+00> : vector<7x32xf32>
    %377 = tpu.matmul %376, %369, %cst_225 {dimension_numbers = #tpu.dot_dimension_numbers<[1], [0], [0], [1], [0, 0, 1, 1], [], []>} : vector<7x64xf32>, vector<64x32xf32>, vector<7x32xf32> -> vector<7x32xf32>
    %378 = vector.broadcast %371 : vector<1x32xf32> to vector<7x32xf32>
    %379 = arith.addf %377, %378 : vector<7x32xf32>
    %380 = arith.addf %363, %379 : vector<7x32xf32>
    %c0_226 = arith.constant 0 : index
    %c0_227 = arith.constant 0 : index
    %c0_228 = arith.constant 0 : index
    %381 = vector.load %arg41[%c0_226, %c0_227, %c0_228] : memref<2x1x32xf32, #tpu.memory_space<vmem>>, vector<1x1x32xf32>
    %382 = vector.shape_cast %381 : vector<1x1x32xf32> to vector<1x32xf32>
    %c0_229 = arith.constant 0 : index
    %c0_230 = arith.constant 0 : index
    %c0_231 = arith.constant 0 : index
    %383 = vector.load %arg42[%c0_229, %c0_230, %c0_231] : memref<2x1x32xf32, #tpu.memory_space<vmem>>, vector<1x1x32xf32>
    %384 = vector.shape_cast %383 : vector<1x1x32xf32> to vector<1x32xf32>
    %cst_232 = arith.constant dense<0.000000e+00> : vector<7xf32>
    %385 = vector.multi_reduction <add>, %380, %cst_232 [1] : vector<7x32xf32> to vector<7xf32>
    %386 = vector.shape_cast %385 : vector<7xf32> to vector<7x1xf32>
    %cst_233 = arith.constant 3.200000e+01 : f32
    %387 = vector.broadcast %cst_233 : f32 to vector<7x1xf32>
    %388 = arith.divf %386, %387 : vector<7x1xf32>
    %389 = vector.broadcast %388 : vector<7x1xf32> to vector<7x32xf32>
    %390 = arith.subf %380, %389 : vector<7x32xf32>
    %391 = arith.mulf %390, %390 : vector<7x32xf32>
    %cst_234 = arith.constant dense<0.000000e+00> : vector<7xf32>
    %392 = vector.multi_reduction <add>, %391, %cst_234 [1] : vector<7x32xf32> to vector<7xf32>
    %393 = vector.shape_cast %392 : vector<7xf32> to vector<7x1xf32>
    %cst_235 = arith.constant 3.200000e+01 : f32
    %394 = vector.broadcast %cst_235 : f32 to vector<7x1xf32>
    %395 = arith.divf %393, %394 : vector<7x1xf32>
    %396 = vector.broadcast %388 : vector<7x1xf32> to vector<7x32xf32>
    %397 = arith.subf %380, %396 : vector<7x32xf32>
    %cst_236 = arith.constant 9.99999974E-6 : f32
    %398 = vector.broadcast %cst_236 : f32 to vector<7x1xf32>
    %399 = arith.addf %395, %398 : vector<7x1xf32>
    %400 = math.rsqrt %399 : vector<7x1xf32>
    %401 = vector.broadcast %400 : vector<7x1xf32> to vector<7x32xf32>
    %402 = arith.mulf %397, %401 : vector<7x32xf32>
    %403 = vector.broadcast %382 : vector<1x32xf32> to vector<7x32xf32>
    %404 = arith.mulf %402, %403 : vector<7x32xf32>
    %405 = vector.broadcast %384 : vector<1x32xf32> to vector<7x32xf32>
    %406 = arith.addf %404, %405 : vector<7x32xf32>
    %c1_237 = arith.constant 1 : index
    %c0_238 = arith.constant 0 : index
    %c0_239 = arith.constant 0 : index
    %407 = vector.load %arg23[%c1_237, %c0_238, %c0_239] : memref<2x32x96xf32, #tpu.memory_space<vmem>>, vector<1x32x96xf32>
    %408 = vector.shape_cast %407 : vector<1x32x96xf32> to vector<32x96xf32>
    %c1_240 = arith.constant 1 : index
    %c0_241 = arith.constant 0 : index
    %c0_242 = arith.constant 0 : index
    %409 = vector.load %arg24[%c1_240, %c0_241, %c0_242] : memref<2x1x96xf32, #tpu.memory_space<vmem>>, vector<1x1x96xf32>
    %410 = vector.shape_cast %409 : vector<1x1x96xf32> to vector<1x96xf32>
    %c1_243 = arith.constant 1 : index
    %c0_244 = arith.constant 0 : index
    %c0_245 = arith.constant 0 : index
    %411 = vector.load %arg25[%c1_243, %c0_244, %c0_245] : memref<2x32x32xf32, #tpu.memory_space<vmem>>, vector<1x32x32xf32>
    %412 = vector.shape_cast %411 : vector<1x32x32xf32> to vector<32x32xf32>
    %c1_246 = arith.constant 1 : index
    %c0_247 = arith.constant 0 : index
    %c0_248 = arith.constant 0 : index
    %413 = vector.load %arg26[%c1_246, %c0_247, %c0_248] : memref<2x1x32xf32, #tpu.memory_space<vmem>>, vector<1x1x32xf32>
    %414 = vector.shape_cast %413 : vector<1x1x32xf32> to vector<1x32xf32>
    %cst_249 = arith.constant dense<0.000000e+00> : vector<7x96xf32>
    %415 = tpu.matmul %406, %408, %cst_249 {dimension_numbers = #tpu.dot_dimension_numbers<[1], [0], [0], [1], [0, 0, 1, 1], [], []>} : vector<7x32xf32>, vector<32x96xf32>, vector<7x96xf32> -> vector<7x96xf32>
    %416 = vector.broadcast %410 : vector<1x96xf32> to vector<7x96xf32>
    %417 = arith.addf %415, %416 : vector<7x96xf32>
    %418 = vector.extract_strided_slice %417 {offsets = [0, 0], sizes = [7, 32], strides = [1, 1]} : vector<7x96xf32> to vector<7x32xf32>
    %419 = vector.extract_strided_slice %417 {offsets = [0, 32], sizes = [7, 32], strides = [1, 1]} : vector<7x96xf32> to vector<7x32xf32>
    %420 = vector.extract_strided_slice %417 {offsets = [0, 64], sizes = [7, 32], strides = [1, 1]} : vector<7x96xf32> to vector<7x32xf32>
    %cst_250 = arith.constant dense<0.000000e+00> : vector<28x32xf32>
    %421 = tpu.matmul %3, %419, %cst_250 {dimension_numbers = #tpu.dot_dimension_numbers<[1], [0], [0], [1], [0, 0, 1, 1], [], []>} : vector<28x7xf32>, vector<7x32xf32>, vector<28x32xf32> -> vector<28x32xf32>
    %422 = arith.mulf %421, %4 : vector<28x32xf32>
    %cst_251 = arith.constant dense<0.000000e+00> : vector<28x32xf32>
    %423 = tpu.matmul %3, %420, %cst_251 {dimension_numbers = #tpu.dot_dimension_numbers<[1], [0], [0], [1], [0, 0, 1, 1], [], []>} : vector<28x7xf32>, vector<7x32xf32>, vector<28x32xf32> -> vector<28x32xf32>
    %424 = arith.mulf %423, %4 : vector<28x32xf32>
    %cst_252 = arith.constant dense<0.000000e+00> : vector<7x28xf32>
    %425 = tpu.matmul %418, %422, %cst_252 {dimension_numbers = #tpu.dot_dimension_numbers<[1], [1], [0], [0], [0, 0, 1, 0], [], []>} : vector<7x32xf32>, vector<28x32xf32>, vector<7x28xf32> -> vector<7x28xf32>
    %cst_253 = arith.constant 0.353553385 : f32
    %426 = vector.broadcast %cst_253 : f32 to vector<7x28xf32>
    %427 = arith.mulf %425, %426 : vector<7x28xf32>
    %cst_254 = arith.constant dense<0xFF800000> : vector<7xf32>
    %428 = vector.multi_reduction <maximumf>, %427, %cst_254 [1] : vector<7x28xf32> to vector<7xf32>
    %429 = vector.shape_cast %428 : vector<7xf32> to vector<7x1xf32>
    %430 = vector.broadcast %429 : vector<7x1xf32> to vector<7x28xf32>
    %431 = arith.subf %427, %430 : vector<7x28xf32>
    %432 = math.exp %431 : vector<7x28xf32>
    %cst_255 = arith.constant dense<0.000000e+00> : vector<7x28xf32>
    %433 = tpu.matmul %432, %5, %cst_255 {dimension_numbers = #tpu.dot_dimension_numbers<[1], [0], [0], [1], [0, 0, 1, 1], [], []>} : vector<7x28xf32>, vector<28x28xf32>, vector<7x28xf32> -> vector<7x28xf32>
    %434 = arith.divf %432, %433 : vector<7x28xf32>
    %cst_256 = arith.constant dense<0.000000e+00> : vector<7x32xf32>
    %435 = tpu.matmul %434, %424, %cst_256 {dimension_numbers = #tpu.dot_dimension_numbers<[1], [0], [0], [1], [0, 0, 1, 1], [], []>} : vector<7x28xf32>, vector<28x32xf32>, vector<7x32xf32> -> vector<7x32xf32>
    %cst_257 = arith.constant dense<0.000000e+00> : vector<7x32xf32>
    %436 = tpu.matmul %435, %412, %cst_257 {dimension_numbers = #tpu.dot_dimension_numbers<[1], [0], [0], [1], [0, 0, 1, 1], [], []>} : vector<7x32xf32>, vector<32x32xf32>, vector<7x32xf32> -> vector<7x32xf32>
    %437 = vector.broadcast %414 : vector<1x32xf32> to vector<7x32xf32>
    %438 = arith.addf %436, %437 : vector<7x32xf32>
    %439 = arith.addf %406, %438 : vector<7x32xf32>
    %c1_258 = arith.constant 1 : index
    %c0_259 = arith.constant 0 : index
    %c0_260 = arith.constant 0 : index
    %440 = vector.load %arg27[%c1_258, %c0_259, %c0_260] : memref<2x1x32xf32, #tpu.memory_space<vmem>>, vector<1x1x32xf32>
    %441 = vector.shape_cast %440 : vector<1x1x32xf32> to vector<1x32xf32>
    %c1_261 = arith.constant 1 : index
    %c0_262 = arith.constant 0 : index
    %c0_263 = arith.constant 0 : index
    %442 = vector.load %arg28[%c1_261, %c0_262, %c0_263] : memref<2x1x32xf32, #tpu.memory_space<vmem>>, vector<1x1x32xf32>
    %443 = vector.shape_cast %442 : vector<1x1x32xf32> to vector<1x32xf32>
    %cst_264 = arith.constant dense<0.000000e+00> : vector<7xf32>
    %444 = vector.multi_reduction <add>, %439, %cst_264 [1] : vector<7x32xf32> to vector<7xf32>
    %445 = vector.shape_cast %444 : vector<7xf32> to vector<7x1xf32>
    %cst_265 = arith.constant 3.200000e+01 : f32
    %446 = vector.broadcast %cst_265 : f32 to vector<7x1xf32>
    %447 = arith.divf %445, %446 : vector<7x1xf32>
    %448 = vector.broadcast %447 : vector<7x1xf32> to vector<7x32xf32>
    %449 = arith.subf %439, %448 : vector<7x32xf32>
    %450 = arith.mulf %449, %449 : vector<7x32xf32>
    %cst_266 = arith.constant dense<0.000000e+00> : vector<7xf32>
    %451 = vector.multi_reduction <add>, %450, %cst_266 [1] : vector<7x32xf32> to vector<7xf32>
    %452 = vector.shape_cast %451 : vector<7xf32> to vector<7x1xf32>
    %cst_267 = arith.constant 3.200000e+01 : f32
    %453 = vector.broadcast %cst_267 : f32 to vector<7x1xf32>
    %454 = arith.divf %452, %453 : vector<7x1xf32>
    %455 = vector.broadcast %447 : vector<7x1xf32> to vector<7x32xf32>
    %456 = arith.subf %439, %455 : vector<7x32xf32>
    %cst_268 = arith.constant 9.99999974E-6 : f32
    %457 = vector.broadcast %cst_268 : f32 to vector<7x1xf32>
    %458 = arith.addf %454, %457 : vector<7x1xf32>
    %459 = math.rsqrt %458 : vector<7x1xf32>
    %460 = vector.broadcast %459 : vector<7x1xf32> to vector<7x32xf32>
    %461 = arith.mulf %456, %460 : vector<7x32xf32>
    %462 = vector.broadcast %441 : vector<1x32xf32> to vector<7x32xf32>
    %463 = arith.mulf %461, %462 : vector<7x32xf32>
    %464 = vector.broadcast %443 : vector<1x32xf32> to vector<7x32xf32>
    %465 = arith.addf %463, %464 : vector<7x32xf32>
    %c1_269 = arith.constant 1 : index
    %c0_270 = arith.constant 0 : index
    %c0_271 = arith.constant 0 : index
    %466 = vector.load %arg29[%c1_269, %c0_270, %c0_271] : memref<2x32x32xf32, #tpu.memory_space<vmem>>, vector<1x32x32xf32>
    %467 = vector.shape_cast %466 : vector<1x32x32xf32> to vector<32x32xf32>
    %c1_272 = arith.constant 1 : index
    %c0_273 = arith.constant 0 : index
    %c0_274 = arith.constant 0 : index
    %468 = vector.load %arg30[%c1_272, %c0_273, %c0_274] : memref<2x1x32xf32, #tpu.memory_space<vmem>>, vector<1x1x32xf32>
    %469 = vector.shape_cast %468 : vector<1x1x32xf32> to vector<1x32xf32>
    %c1_275 = arith.constant 1 : index
    %c0_276 = arith.constant 0 : index
    %c0_277 = arith.constant 0 : index
    %470 = vector.load %arg31[%c1_275, %c0_276, %c0_277] : memref<2x32x64xf32, #tpu.memory_space<vmem>>, vector<1x32x64xf32>
    %471 = vector.shape_cast %470 : vector<1x32x64xf32> to vector<32x64xf32>
    %c1_278 = arith.constant 1 : index
    %c0_279 = arith.constant 0 : index
    %c0_280 = arith.constant 0 : index
    %472 = vector.load %arg32[%c1_278, %c0_279, %c0_280] : memref<2x1x64xf32, #tpu.memory_space<vmem>>, vector<1x1x64xf32>
    %473 = vector.shape_cast %472 : vector<1x1x64xf32> to vector<1x64xf32>
    %c1_281 = arith.constant 1 : index
    %c0_282 = arith.constant 0 : index
    %c0_283 = arith.constant 0 : index
    %474 = vector.load %arg33[%c1_281, %c0_282, %c0_283] : memref<2x32x32xf32, #tpu.memory_space<vmem>>, vector<1x32x32xf32>
    %475 = vector.shape_cast %474 : vector<1x32x32xf32> to vector<32x32xf32>
    %c1_284 = arith.constant 1 : index
    %c0_285 = arith.constant 0 : index
    %c0_286 = arith.constant 0 : index
    %476 = vector.load %arg34[%c1_284, %c0_285, %c0_286] : memref<2x1x32xf32, #tpu.memory_space<vmem>>, vector<1x1x32xf32>
    %477 = vector.shape_cast %476 : vector<1x1x32xf32> to vector<1x32xf32>
    %cst_287 = arith.constant dense<0.000000e+00> : vector<7x32xf32>
    %478 = tpu.matmul %465, %467, %cst_287 {dimension_numbers = #tpu.dot_dimension_numbers<[1], [0], [0], [1], [0, 0, 1, 1], [], []>} : vector<7x32xf32>, vector<32x32xf32>, vector<7x32xf32> -> vector<7x32xf32>
    %479 = vector.broadcast %469 : vector<1x32xf32> to vector<7x32xf32>
    %480 = arith.addf %478, %479 : vector<7x32xf32>
    %cst_288 = arith.constant dense<0.000000e+00> : vector<8x64xf32>
    %481 = tpu.matmul %237, %471, %cst_288 {dimension_numbers = #tpu.dot_dimension_numbers<[1], [0], [0], [1], [0, 0, 1, 1], [], []>} : vector<8x32xf32>, vector<32x64xf32>, vector<8x64xf32> -> vector<8x64xf32>
    %482 = vector.broadcast %473 : vector<1x64xf32> to vector<8x64xf32>
    %483 = arith.addf %481, %482 : vector<8x64xf32>
    %484 = vector.extract_strided_slice %483 {offsets = [0, 0], sizes = [8, 32], strides = [1, 1]} : vector<8x64xf32> to vector<8x32xf32>
    %485 = vector.extract_strided_slice %483 {offsets = [0, 32], sizes = [8, 32], strides = [1, 1]} : vector<8x64xf32> to vector<8x32xf32>
    %cst_289 = arith.constant dense<0.000000e+00> : vector<32x32xf32>
    %486 = tpu.matmul %0, %484, %cst_289 {dimension_numbers = #tpu.dot_dimension_numbers<[1], [0], [0], [1], [0, 0, 1, 1], [], []>} : vector<32x8xf32>, vector<8x32xf32>, vector<32x32xf32> -> vector<32x32xf32>
    %487 = arith.mulf %486, %1 : vector<32x32xf32>
    %cst_290 = arith.constant dense<0.000000e+00> : vector<32x32xf32>
    %488 = tpu.matmul %0, %485, %cst_290 {dimension_numbers = #tpu.dot_dimension_numbers<[1], [0], [0], [1], [0, 0, 1, 1], [], []>} : vector<32x8xf32>, vector<8x32xf32>, vector<32x32xf32> -> vector<32x32xf32>
    %489 = arith.mulf %488, %1 : vector<32x32xf32>
    %cst_291 = arith.constant dense<0.000000e+00> : vector<7x32xf32>
    %490 = tpu.matmul %480, %487, %cst_291 {dimension_numbers = #tpu.dot_dimension_numbers<[1], [1], [0], [0], [0, 0, 1, 0], [], []>} : vector<7x32xf32>, vector<32x32xf32>, vector<7x32xf32> -> vector<7x32xf32>
    %cst_292 = arith.constant 0.353553385 : f32
    %491 = vector.broadcast %cst_292 : f32 to vector<7x32xf32>
    %492 = arith.mulf %490, %491 : vector<7x32xf32>
    %cst_293 = arith.constant dense<0xFF800000> : vector<7xf32>
    %493 = vector.multi_reduction <maximumf>, %492, %cst_293 [1] : vector<7x32xf32> to vector<7xf32>
    %494 = vector.shape_cast %493 : vector<7xf32> to vector<7x1xf32>
    %495 = vector.broadcast %494 : vector<7x1xf32> to vector<7x32xf32>
    %496 = arith.subf %492, %495 : vector<7x32xf32>
    %497 = math.exp %496 : vector<7x32xf32>
    %cst_294 = arith.constant dense<0.000000e+00> : vector<7x32xf32>
    %498 = tpu.matmul %497, %2, %cst_294 {dimension_numbers = #tpu.dot_dimension_numbers<[1], [0], [0], [1], [0, 0, 1, 1], [], []>} : vector<7x32xf32>, vector<32x32xf32>, vector<7x32xf32> -> vector<7x32xf32>
    %499 = arith.divf %497, %498 : vector<7x32xf32>
    %cst_295 = arith.constant dense<0.000000e+00> : vector<7x32xf32>
    %500 = tpu.matmul %499, %489, %cst_295 {dimension_numbers = #tpu.dot_dimension_numbers<[1], [0], [0], [1], [0, 0, 1, 1], [], []>} : vector<7x32xf32>, vector<32x32xf32>, vector<7x32xf32> -> vector<7x32xf32>
    %cst_296 = arith.constant dense<0.000000e+00> : vector<7x32xf32>
    %501 = tpu.matmul %500, %475, %cst_296 {dimension_numbers = #tpu.dot_dimension_numbers<[1], [0], [0], [1], [0, 0, 1, 1], [], []>} : vector<7x32xf32>, vector<32x32xf32>, vector<7x32xf32> -> vector<7x32xf32>
    %502 = vector.broadcast %477 : vector<1x32xf32> to vector<7x32xf32>
    %503 = arith.addf %501, %502 : vector<7x32xf32>
    %504 = arith.addf %465, %503 : vector<7x32xf32>
    %c1_297 = arith.constant 1 : index
    %c0_298 = arith.constant 0 : index
    %c0_299 = arith.constant 0 : index
    %505 = vector.load %arg35[%c1_297, %c0_298, %c0_299] : memref<2x1x32xf32, #tpu.memory_space<vmem>>, vector<1x1x32xf32>
    %506 = vector.shape_cast %505 : vector<1x1x32xf32> to vector<1x32xf32>
    %c1_300 = arith.constant 1 : index
    %c0_301 = arith.constant 0 : index
    %c0_302 = arith.constant 0 : index
    %507 = vector.load %arg36[%c1_300, %c0_301, %c0_302] : memref<2x1x32xf32, #tpu.memory_space<vmem>>, vector<1x1x32xf32>
    %508 = vector.shape_cast %507 : vector<1x1x32xf32> to vector<1x32xf32>
    %cst_303 = arith.constant dense<0.000000e+00> : vector<7xf32>
    %509 = vector.multi_reduction <add>, %504, %cst_303 [1] : vector<7x32xf32> to vector<7xf32>
    %510 = vector.shape_cast %509 : vector<7xf32> to vector<7x1xf32>
    %cst_304 = arith.constant 3.200000e+01 : f32
    %511 = vector.broadcast %cst_304 : f32 to vector<7x1xf32>
    %512 = arith.divf %510, %511 : vector<7x1xf32>
    %513 = vector.broadcast %512 : vector<7x1xf32> to vector<7x32xf32>
    %514 = arith.subf %504, %513 : vector<7x32xf32>
    %515 = arith.mulf %514, %514 : vector<7x32xf32>
    %cst_305 = arith.constant dense<0.000000e+00> : vector<7xf32>
    %516 = vector.multi_reduction <add>, %515, %cst_305 [1] : vector<7x32xf32> to vector<7xf32>
    %517 = vector.shape_cast %516 : vector<7xf32> to vector<7x1xf32>
    %cst_306 = arith.constant 3.200000e+01 : f32
    %518 = vector.broadcast %cst_306 : f32 to vector<7x1xf32>
    %519 = arith.divf %517, %518 : vector<7x1xf32>
    %520 = vector.broadcast %512 : vector<7x1xf32> to vector<7x32xf32>
    %521 = arith.subf %504, %520 : vector<7x32xf32>
    %cst_307 = arith.constant 9.99999974E-6 : f32
    %522 = vector.broadcast %cst_307 : f32 to vector<7x1xf32>
    %523 = arith.addf %519, %522 : vector<7x1xf32>
    %524 = math.rsqrt %523 : vector<7x1xf32>
    %525 = vector.broadcast %524 : vector<7x1xf32> to vector<7x32xf32>
    %526 = arith.mulf %521, %525 : vector<7x32xf32>
    %527 = vector.broadcast %506 : vector<1x32xf32> to vector<7x32xf32>
    %528 = arith.mulf %526, %527 : vector<7x32xf32>
    %529 = vector.broadcast %508 : vector<1x32xf32> to vector<7x32xf32>
    %530 = arith.addf %528, %529 : vector<7x32xf32>
    %c1_308 = arith.constant 1 : index
    %c0_309 = arith.constant 0 : index
    %c0_310 = arith.constant 0 : index
    %531 = vector.load %arg37[%c1_308, %c0_309, %c0_310] : memref<2x32x64xf32, #tpu.memory_space<vmem>>, vector<1x32x64xf32>
    %532 = vector.shape_cast %531 : vector<1x32x64xf32> to vector<32x64xf32>
    %c1_311 = arith.constant 1 : index
    %c0_312 = arith.constant 0 : index
    %c0_313 = arith.constant 0 : index
    %533 = vector.load %arg38[%c1_311, %c0_312, %c0_313] : memref<2x1x64xf32, #tpu.memory_space<vmem>>, vector<1x1x64xf32>
    %534 = vector.shape_cast %533 : vector<1x1x64xf32> to vector<1x64xf32>
    %c1_314 = arith.constant 1 : index
    %c0_315 = arith.constant 0 : index
    %c0_316 = arith.constant 0 : index
    %535 = vector.load %arg39[%c1_314, %c0_315, %c0_316] : memref<2x64x32xf32, #tpu.memory_space<vmem>>, vector<1x64x32xf32>
    %536 = vector.shape_cast %535 : vector<1x64x32xf32> to vector<64x32xf32>
    %c1_317 = arith.constant 1 : index
    %c0_318 = arith.constant 0 : index
    %c0_319 = arith.constant 0 : index
    %537 = vector.load %arg40[%c1_317, %c0_318, %c0_319] : memref<2x1x32xf32, #tpu.memory_space<vmem>>, vector<1x1x32xf32>
    %538 = vector.shape_cast %537 : vector<1x1x32xf32> to vector<1x32xf32>
    %cst_320 = arith.constant dense<0.000000e+00> : vector<7x64xf32>
    %539 = tpu.matmul %530, %532, %cst_320 {dimension_numbers = #tpu.dot_dimension_numbers<[1], [0], [0], [1], [0, 0, 1, 1], [], []>} : vector<7x32xf32>, vector<32x64xf32>, vector<7x64xf32> -> vector<7x64xf32>
    %540 = vector.broadcast %534 : vector<1x64xf32> to vector<7x64xf32>
    %541 = arith.addf %539, %540 : vector<7x64xf32>
    %cst_321 = arith.constant 0.000000e+00 : f32
    %542 = vector.broadcast %cst_321 : f32 to vector<7x64xf32>
    %543 = arith.maximumf %541, %542 : vector<7x64xf32>
    %cst_322 = arith.constant dense<0.000000e+00> : vector<7x32xf32>
    %544 = tpu.matmul %543, %536, %cst_322 {dimension_numbers = #tpu.dot_dimension_numbers<[1], [0], [0], [1], [0, 0, 1, 1], [], []>} : vector<7x64xf32>, vector<64x32xf32>, vector<7x32xf32> -> vector<7x32xf32>
    %545 = vector.broadcast %538 : vector<1x32xf32> to vector<7x32xf32>
    %546 = arith.addf %544, %545 : vector<7x32xf32>
    %547 = arith.addf %530, %546 : vector<7x32xf32>
    %c1_323 = arith.constant 1 : index
    %c0_324 = arith.constant 0 : index
    %c0_325 = arith.constant 0 : index
    %548 = vector.load %arg41[%c1_323, %c0_324, %c0_325] : memref<2x1x32xf32, #tpu.memory_space<vmem>>, vector<1x1x32xf32>
    %549 = vector.shape_cast %548 : vector<1x1x32xf32> to vector<1x32xf32>
    %c1_326 = arith.constant 1 : index
    %c0_327 = arith.constant 0 : index
    %c0_328 = arith.constant 0 : index
    %550 = vector.load %arg42[%c1_326, %c0_327, %c0_328] : memref<2x1x32xf32, #tpu.memory_space<vmem>>, vector<1x1x32xf32>
    %551 = vector.shape_cast %550 : vector<1x1x32xf32> to vector<1x32xf32>
    %cst_329 = arith.constant dense<0.000000e+00> : vector<7xf32>
    %552 = vector.multi_reduction <add>, %547, %cst_329 [1] : vector<7x32xf32> to vector<7xf32>
    %553 = vector.shape_cast %552 : vector<7xf32> to vector<7x1xf32>
    %cst_330 = arith.constant 3.200000e+01 : f32
    %554 = vector.broadcast %cst_330 : f32 to vector<7x1xf32>
    %555 = arith.divf %553, %554 : vector<7x1xf32>
    %556 = vector.broadcast %555 : vector<7x1xf32> to vector<7x32xf32>
    %557 = arith.subf %547, %556 : vector<7x32xf32>
    %558 = arith.mulf %557, %557 : vector<7x32xf32>
    %cst_331 = arith.constant dense<0.000000e+00> : vector<7xf32>
    %559 = vector.multi_reduction <add>, %558, %cst_331 [1] : vector<7x32xf32> to vector<7xf32>
    %560 = vector.shape_cast %559 : vector<7xf32> to vector<7x1xf32>
    %cst_332 = arith.constant 3.200000e+01 : f32
    %561 = vector.broadcast %cst_332 : f32 to vector<7x1xf32>
    %562 = arith.divf %560, %561 : vector<7x1xf32>
    %563 = vector.broadcast %555 : vector<7x1xf32> to vector<7x32xf32>
    %564 = arith.subf %547, %563 : vector<7x32xf32>
    %cst_333 = arith.constant 9.99999974E-6 : f32
    %565 = vector.broadcast %cst_333 : f32 to vector<7x1xf32>
    %566 = arith.addf %562, %565 : vector<7x1xf32>
    %567 = math.rsqrt %566 : vector<7x1xf32>
    %568 = vector.broadcast %567 : vector<7x1xf32> to vector<7x32xf32>
    %569 = arith.mulf %564, %568 : vector<7x32xf32>
    %570 = vector.broadcast %549 : vector<1x32xf32> to vector<7x32xf32>
    %571 = arith.mulf %569, %570 : vector<7x32xf32>
    %572 = vector.broadcast %551 : vector<1x32xf32> to vector<7x32xf32>
    %573 = arith.addf %571, %572 : vector<7x32xf32>
    %c0_334 = arith.constant 0 : index
    %c0_335 = arith.constant 0 : index
    %574 = vector.load %arg43[%c0_334, %c0_335] : memref<1x32xf32, #tpu.memory_space<vmem>>, vector<1x32xf32>
    %c0_336 = arith.constant 0 : index
    %c0_337 = arith.constant 0 : index
    %575 = vector.load %arg44[%c0_336, %c0_337] : memref<1x32xf32, #tpu.memory_space<vmem>>, vector<1x32xf32>
    %cst_338 = arith.constant dense<0.000000e+00> : vector<7xf32>
    %576 = vector.multi_reduction <add>, %573, %cst_338 [1] : vector<7x32xf32> to vector<7xf32>
    %577 = vector.shape_cast %576 : vector<7xf32> to vector<7x1xf32>
    %cst_339 = arith.constant 3.200000e+01 : f32
    %578 = vector.broadcast %cst_339 : f32 to vector<7x1xf32>
    %579 = arith.divf %577, %578 : vector<7x1xf32>
    %580 = vector.broadcast %579 : vector<7x1xf32> to vector<7x32xf32>
    %581 = arith.subf %573, %580 : vector<7x32xf32>
    %582 = arith.mulf %581, %581 : vector<7x32xf32>
    %cst_340 = arith.constant dense<0.000000e+00> : vector<7xf32>
    %583 = vector.multi_reduction <add>, %582, %cst_340 [1] : vector<7x32xf32> to vector<7xf32>
    %584 = vector.shape_cast %583 : vector<7xf32> to vector<7x1xf32>
    %cst_341 = arith.constant 3.200000e+01 : f32
    %585 = vector.broadcast %cst_341 : f32 to vector<7x1xf32>
    %586 = arith.divf %584, %585 : vector<7x1xf32>
    %587 = vector.broadcast %579 : vector<7x1xf32> to vector<7x32xf32>
    %588 = arith.subf %573, %587 : vector<7x32xf32>
    %cst_342 = arith.constant 9.99999974E-6 : f32
    %589 = vector.broadcast %cst_342 : f32 to vector<7x1xf32>
    %590 = arith.addf %586, %589 : vector<7x1xf32>
    %591 = math.rsqrt %590 : vector<7x1xf32>
    %592 = vector.broadcast %591 : vector<7x1xf32> to vector<7x32xf32>
    %593 = arith.mulf %588, %592 : vector<7x32xf32>
    %594 = vector.broadcast %574 : vector<1x32xf32> to vector<7x32xf32>
    %595 = arith.mulf %593, %594 : vector<7x32xf32>
    %596 = vector.broadcast %575 : vector<1x32xf32> to vector<7x32xf32>
    %597 = arith.addf %595, %596 : vector<7x32xf32>
    %c0_343 = arith.constant 0 : index
    %c0_344 = arith.constant 0 : index
    %598 = vector.load %arg45[%c0_343, %c0_344] : memref<32x128xf32, #tpu.memory_space<vmem>>, vector<32x128xf32>
    %cst_345 = arith.constant dense<0.000000e+00> : vector<7x128xf32>
    %599 = tpu.matmul %597, %598, %cst_345 {dimension_numbers = #tpu.dot_dimension_numbers<[1], [0], [0], [1], [0, 0, 1, 1], [], []>} : vector<7x32xf32>, vector<32x128xf32>, vector<7x128xf32> -> vector<7x128xf32>
    %c0_346 = arith.constant 0 : index
    %c0_347 = arith.constant 0 : index
    %600 = vector.load %arg46[%c0_346, %c0_347] : memref<1x128xf32, #tpu.memory_space<vmem>>, vector<1x128xf32>
    %601 = vector.broadcast %600 : vector<1x128xf32> to vector<7x128xf32>
    %602 = arith.addf %599, %601 : vector<7x128xf32>
    %c0_348 = arith.constant 0 : index
    %c0_349 = arith.constant 0 : index
    %c0_350 = arith.constant 0 : index
    %603 = vector.load %arg47[%c0_348, %c0_349, %c0_350] : memref<1x7x128xf32, #tpu.memory_space<vmem>>, vector<1x7x128xf32>
    %604 = vector.shape_cast %603 : vector<1x7x128xf32> to vector<7x128xf32>
    %605 = vector.shape_cast %602 : vector<7x128xf32> to vector<1x7x128xf32>
    tpu.vector_store %arg47[%c0_348, %c0_349, %c0_350], %605 {strides = array<i32>} : memref<1x7x128xf32, #tpu.memory_space<vmem>>, vector<1x7x128xf32>,
    return
  }
  func.func @transform_0(%arg0: i32) -> (i32, i32, i32) {
    %c0_i32 = arith.constant 0 : i32
    %c0_i32_0 = arith.constant 0 : i32
    %c0_i32_1 = arith.constant 0 : i32
    return %arg0, %c0_i32, %c0_i32_0 : i32, i32, i32
  }
  func.func @transform_1(%arg0: i32) -> (i32, i32, i32) {
    %c0_i32 = arith.constant 0 : i32
    %c0_i32_0 = arith.constant 0 : i32
    %c0_i32_1 = arith.constant 0 : i32
    return %arg0, %c0_i32, %c0_i32_0 : i32, i32, i32
  }
  func.func @transform_2(%arg0: i32) -> (i32, i32) {
    %c0_i32 = arith.constant 0 : i32
    %c0_i32_0 = arith.constant 0 : i32
    %c0_i32_1 = arith.constant 0 : i32
    return %c0_i32, %c0_i32_0 : i32, i32
  }
  func.func @transform_3(%arg0: i32) -> (i32, i32) {
    %c0_i32 = arith.constant 0 : i32
    %c0_i32_0 = arith.constant 0 : i32
    %c0_i32_1 = arith.constant 0 : i32
    return %c0_i32, %c0_i32_0 : i32, i32
  }
  func.func @transform_4(%arg0: i32) -> (i32, i32) {
    %c0_i32 = arith.constant 0 : i32
    %c0_i32_0 = arith.constant 0 : i32
    %c0_i32_1 = arith.constant 0 : i32
    return %c0_i32, %c0_i32_0 : i32, i32
  }
  func.func @transform_5(%arg0: i32) -> (i32, i32) {
    %c0_i32 = arith.constant 0 : i32
    %c0_i32_0 = arith.constant 0 : i32
    %c0_i32_1 = arith.constant 0 : i32
    return %c0_i32, %c0_i32_0 : i32, i32
  }
  func.func @transform_6(%arg0: i32) -> (i32, i32) {
    %c0_i32 = arith.constant 0 : i32
    %c0_i32_0 = arith.constant 0 : i32
    %c0_i32_1 = arith.constant 0 : i32
    return %c0_i32, %c0_i32_0 : i32, i32
  }
  func.func @transform_7(%arg0: i32) -> (i32, i32) {
    %c0_i32 = arith.constant 0 : i32
    %c0_i32_0 = arith.constant 0 : i32
    %c0_i32_1 = arith.constant 0 : i32
    return %c0_i32, %c0_i32_0 : i32, i32
  }
  func.func @transform_8(%arg0: i32) -> (i32, i32, i32) {
    %c0_i32 = arith.constant 0 : i32
    %c0_i32_0 = arith.constant 0 : i32
    %c0_i32_1 = arith.constant 0 : i32
    %c0_i32_2 = arith.constant 0 : i32
    return %c0_i32, %c0_i32_0, %c0_i32_1 : i32, i32, i32
  }
  func.func @transform_9(%arg0: i32) -> (i32, i32, i32) {
    %c0_i32 = arith.constant 0 : i32
    %c0_i32_0 = arith.constant 0 : i32
    %c0_i32_1 = arith.constant 0 : i32
    %c0_i32_2 = arith.constant 0 : i32
    return %c0_i32, %c0_i32_0, %c0_i32_1 : i32, i32, i32
  }
  func.func @transform_10(%arg0: i32) -> (i32, i32, i32) {
    %c0_i32 = arith.constant 0 : i32
    %c0_i32_0 = arith.constant 0 : i32
    %c0_i32_1 = arith.constant 0 : i32
    %c0_i32_2 = arith.constant 0 : i32
    return %c0_i32, %c0_i32_0, %c0_i32_1 : i32, i32, i32
  }
  func.func @transform_11(%arg0: i32) -> (i32, i32, i32) {
    %c0_i32 = arith.constant 0 : i32
    %c0_i32_0 = arith.constant 0 : i32
    %c0_i32_1 = arith.constant 0 : i32
    %c0_i32_2 = arith.constant 0 : i32
    return %c0_i32, %c0_i32_0, %c0_i32_1 : i32, i32, i32
  }
  func.func @transform_12(%arg0: i32) -> (i32, i32, i32) {
    %c0_i32 = arith.constant 0 : i32
    %c0_i32_0 = arith.constant 0 : i32
    %c0_i32_1 = arith.constant 0 : i32
    %c0_i32_2 = arith.constant 0 : i32
    return %c0_i32, %c0_i32_0, %c0_i32_1 : i32, i32, i32
  }
  func.func @transform_13(%arg0: i32) -> (i32, i32, i32) {
    %c0_i32 = arith.constant 0 : i32
    %c0_i32_0 = arith.constant 0 : i32
    %c0_i32_1 = arith.constant 0 : i32
    %c0_i32_2 = arith.constant 0 : i32
    return %c0_i32, %c0_i32_0, %c0_i32_1 : i32, i32, i32
  }
  func.func @transform_14(%arg0: i32) -> (i32, i32, i32) {
    %c0_i32 = arith.constant 0 : i32
    %c0_i32_0 = arith.constant 0 : i32
    %c0_i32_1 = arith.constant 0 : i32
    %c0_i32_2 = arith.constant 0 : i32
    return %c0_i32, %c0_i32_0, %c0_i32_1 : i32, i32, i32
  }
  func.func @transform_15(%arg0: i32) -> (i32, i32, i32) {
    %c0_i32 = arith.constant 0 : i32
    %c0_i32_0 = arith.constant 0 : i32
    %c0_i32_1 = arith.constant 0 : i32
    %c0_i32_2 = arith.constant 0 : i32
    return %c0_i32, %c0_i32_0, %c0_i32_1 : i32, i32, i32
  }
  func.func @transform_16(%arg0: i32) -> (i32, i32, i32) {
    %c0_i32 = arith.constant 0 : i32
    %c0_i32_0 = arith.constant 0 : i32
    %c0_i32_1 = arith.constant 0 : i32
    %c0_i32_2 = arith.constant 0 : i32
    return %c0_i32, %c0_i32_0, %c0_i32_1 : i32, i32, i32
  }
  func.func @transform_17(%arg0: i32) -> (i32, i32, i32) {
    %c0_i32 = arith.constant 0 : i32
    %c0_i32_0 = arith.constant 0 : i32
    %c0_i32_1 = arith.constant 0 : i32
    %c0_i32_2 = arith.constant 0 : i32
    return %c0_i32, %c0_i32_0, %c0_i32_1 : i32, i32, i32
  }
  func.func @transform_18(%arg0: i32) -> (i32, i32, i32) {
    %c0_i32 = arith.constant 0 : i32
    %c0_i32_0 = arith.constant 0 : i32
    %c0_i32_1 = arith.constant 0 : i32
    %c0_i32_2 = arith.constant 0 : i32
    return %c0_i32, %c0_i32_0, %c0_i32_1 : i32, i32, i32
  }
  func.func @transform_19(%arg0: i32) -> (i32, i32, i32) {
    %c0_i32 = arith.constant 0 : i32
    %c0_i32_0 = arith.constant 0 : i32
    %c0_i32_1 = arith.constant 0 : i32
    %c0_i32_2 = arith.constant 0 : i32
    return %c0_i32, %c0_i32_0, %c0_i32_1 : i32, i32, i32
  }
  func.func @transform_20(%arg0: i32) -> (i32, i32) {
    %c0_i32 = arith.constant 0 : i32
    %c0_i32_0 = arith.constant 0 : i32
    %c0_i32_1 = arith.constant 0 : i32
    return %c0_i32, %c0_i32_0 : i32, i32
  }
  func.func @transform_21(%arg0: i32) -> (i32, i32) {
    %c0_i32 = arith.constant 0 : i32
    %c0_i32_0 = arith.constant 0 : i32
    %c0_i32_1 = arith.constant 0 : i32
    return %c0_i32, %c0_i32_0 : i32, i32
  }
  func.func @transform_22(%arg0: i32) -> (i32, i32, i32) {
    %c0_i32 = arith.constant 0 : i32
    %c0_i32_0 = arith.constant 0 : i32
    %c0_i32_1 = arith.constant 0 : i32
    %c0_i32_2 = arith.constant 0 : i32
    return %c0_i32, %c0_i32_0, %c0_i32_1 : i32, i32, i32
  }
  func.func @transform_23(%arg0: i32) -> (i32, i32, i32) {
    %c0_i32 = arith.constant 0 : i32
    %c0_i32_0 = arith.constant 0 : i32
    %c0_i32_1 = arith.constant 0 : i32
    %c0_i32_2 = arith.constant 0 : i32
    return %c0_i32, %c0_i32_0, %c0_i32_1 : i32, i32, i32
  }
  func.func @transform_24(%arg0: i32) -> (i32, i32, i32) {
    %c0_i32 = arith.constant 0 : i32
    %c0_i32_0 = arith.constant 0 : i32
    %c0_i32_1 = arith.constant 0 : i32
    %c0_i32_2 = arith.constant 0 : i32
    return %c0_i32, %c0_i32_0, %c0_i32_1 : i32, i32, i32
  }
  func.func @transform_25(%arg0: i32) -> (i32, i32, i32) {
    %c0_i32 = arith.constant 0 : i32
    %c0_i32_0 = arith.constant 0 : i32
    %c0_i32_1 = arith.constant 0 : i32
    %c0_i32_2 = arith.constant 0 : i32
    return %c0_i32, %c0_i32_0, %c0_i32_1 : i32, i32, i32
  }
  func.func @transform_26(%arg0: i32) -> (i32, i32, i32) {
    %c0_i32 = arith.constant 0 : i32
    %c0_i32_0 = arith.constant 0 : i32
    %c0_i32_1 = arith.constant 0 : i32
    %c0_i32_2 = arith.constant 0 : i32
    return %c0_i32, %c0_i32_0, %c0_i32_1 : i32, i32, i32
  }
  func.func @transform_27(%arg0: i32) -> (i32, i32, i32) {
    %c0_i32 = arith.constant 0 : i32
    %c0_i32_0 = arith.constant 0 : i32
    %c0_i32_1 = arith.constant 0 : i32
    %c0_i32_2 = arith.constant 0 : i32
    return %c0_i32, %c0_i32_0, %c0_i32_1 : i32, i32, i32
  }
  func.func @transform_28(%arg0: i32) -> (i32, i32, i32) {
    %c0_i32 = arith.constant 0 : i32
    %c0_i32_0 = arith.constant 0 : i32
    %c0_i32_1 = arith.constant 0 : i32
    %c0_i32_2 = arith.constant 0 : i32
    return %c0_i32, %c0_i32_0, %c0_i32_1 : i32, i32, i32
  }
  func.func @transform_29(%arg0: i32) -> (i32, i32, i32) {
    %c0_i32 = arith.constant 0 : i32
    %c0_i32_0 = arith.constant 0 : i32
    %c0_i32_1 = arith.constant 0 : i32
    %c0_i32_2 = arith.constant 0 : i32
    return %c0_i32, %c0_i32_0, %c0_i32_1 : i32, i32, i32
  }
  func.func @transform_30(%arg0: i32) -> (i32, i32, i32) {
    %c0_i32 = arith.constant 0 : i32
    %c0_i32_0 = arith.constant 0 : i32
    %c0_i32_1 = arith.constant 0 : i32
    %c0_i32_2 = arith.constant 0 : i32
    return %c0_i32, %c0_i32_0, %c0_i32_1 : i32, i32, i32
  }
  func.func @transform_31(%arg0: i32) -> (i32, i32, i32) {
    %c0_i32 = arith.constant 0 : i32
    %c0_i32_0 = arith.constant 0 : i32
    %c0_i32_1 = arith.constant 0 : i32
    %c0_i32_2 = arith.constant 0 : i32
    return %c0_i32, %c0_i32_0, %c0_i32_1 : i32, i32, i32
  }
  func.func @transform_32(%arg0: i32) -> (i32, i32, i32) {
    %c0_i32 = arith.constant 0 : i32
    %c0_i32_0 = arith.constant 0 : i32
    %c0_i32_1 = arith.constant 0 : i32
    %c0_i32_2 = arith.constant 0 : i32
    return %c0_i32, %c0_i32_0, %c0_i32_1 : i32, i32, i32
  }
  func.func @transform_33(%arg0: i32) -> (i32, i32, i32) {
    %c0_i32 = arith.constant 0 : i32
    %c0_i32_0 = arith.constant 0 : i32
    %c0_i32_1 = arith.constant 0 : i32
    %c0_i32_2 = arith.constant 0 : i32
    return %c0_i32, %c0_i32_0, %c0_i32_1 : i32, i32, i32
  }
  func.func @transform_34(%arg0: i32) -> (i32, i32, i32) {
    %c0_i32 = arith.constant 0 : i32
    %c0_i32_0 = arith.constant 0 : i32
    %c0_i32_1 = arith.constant 0 : i32
    %c0_i32_2 = arith.constant 0 : i32
    return %c0_i32, %c0_i32_0, %c0_i32_1 : i32, i32, i32
  }
  func.func @transform_35(%arg0: i32) -> (i32, i32, i32) {
    %c0_i32 = arith.constant 0 : i32
    %c0_i32_0 = arith.constant 0 : i32
    %c0_i32_1 = arith.constant 0 : i32
    %c0_i32_2 = arith.constant 0 : i32
    return %c0_i32, %c0_i32_0, %c0_i32_1 : i32, i32, i32
  }
  func.func @transform_36(%arg0: i32) -> (i32, i32, i32) {
    %c0_i32 = arith.constant 0 : i32
    %c0_i32_0 = arith.constant 0 : i32
    %c0_i32_1 = arith.constant 0 : i32
    %c0_i32_2 = arith.constant 0 : i32
    return %c0_i32, %c0_i32_0, %c0_i32_1 : i32, i32, i32
  }
  func.func @transform_37(%arg0: i32) -> (i32, i32, i32) {
    %c0_i32 = arith.constant 0 : i32
    %c0_i32_0 = arith.constant 0 : i32
    %c0_i32_1 = arith.constant 0 : i32
    %c0_i32_2 = arith.constant 0 : i32
    return %c0_i32, %c0_i32_0, %c0_i32_1 : i32, i32, i32
  }
  func.func @transform_38(%arg0: i32) -> (i32, i32, i32) {
    %c0_i32 = arith.constant 0 : i32
    %c0_i32_0 = arith.constant 0 : i32
    %c0_i32_1 = arith.constant 0 : i32
    %c0_i32_2 = arith.constant 0 : i32
    return %c0_i32, %c0_i32_0, %c0_i32_1 : i32, i32, i32
  }
  func.func @transform_39(%arg0: i32) -> (i32, i32, i32) {
    %c0_i32 = arith.constant 0 : i32
    %c0_i32_0 = arith.constant 0 : i32
    %c0_i32_1 = arith.constant 0 : i32
    %c0_i32_2 = arith.constant 0 : i32
    return %c0_i32, %c0_i32_0, %c0_i32_1 : i32, i32, i32
  }
  func.func @transform_40(%arg0: i32) -> (i32, i32, i32) {
    %c0_i32 = arith.constant 0 : i32
    %c0_i32_0 = arith.constant 0 : i32
    %c0_i32_1 = arith.constant 0 : i32
    %c0_i32_2 = arith.constant 0 : i32
    return %c0_i32, %c0_i32_0, %c0_i32_1 : i32, i32, i32
  }
  func.func @transform_41(%arg0: i32) -> (i32, i32, i32) {
    %c0_i32 = arith.constant 0 : i32
    %c0_i32_0 = arith.constant 0 : i32
    %c0_i32_1 = arith.constant 0 : i32
    %c0_i32_2 = arith.constant 0 : i32
    return %c0_i32, %c0_i32_0, %c0_i32_1 : i32, i32, i32
  }
  func.func @transform_42(%arg0: i32) -> (i32, i32) {
    %c0_i32 = arith.constant 0 : i32
    %c0_i32_0 = arith.constant 0 : i32
    %c0_i32_1 = arith.constant 0 : i32
    return %c0_i32, %c0_i32_0 : i32, i32
  }
  func.func @transform_43(%arg0: i32) -> (i32, i32) {
    %c0_i32 = arith.constant 0 : i32
    %c0_i32_0 = arith.constant 0 : i32
    %c0_i32_1 = arith.constant 0 : i32
    return %c0_i32, %c0_i32_0 : i32, i32
  }
  func.func @transform_44(%arg0: i32) -> (i32, i32) {
    %c0_i32 = arith.constant 0 : i32
    %c0_i32_0 = arith.constant 0 : i32
    %c0_i32_1 = arith.constant 0 : i32
    return %c0_i32, %c0_i32_0 : i32, i32
  }
  func.func @transform_45(%arg0: i32) -> (i32, i32) {
    %c0_i32 = arith.constant 0 : i32
    %c0_i32_0 = arith.constant 0 : i32
    %c0_i32_1 = arith.constant 0 : i32
    return %c0_i32, %c0_i32_0 : i32, i32
  }
  func.func @transform_46(%arg0: i32) -> (i32, i32, i32) {
    %c0_i32 = arith.constant 0 : i32
    %c0_i32_0 = arith.constant 0 : i32
    %c0_i32_1 = arith.constant 0 : i32
    return %arg0, %c0_i32, %c0_i32_0 : i32, i32, i32
  }
}

</mosaic_0001>

<bundles_post_ra>
// kernel: decoder_transformer_forward.1
= control target key start
LH: loop header
LB: loop body
LE: loop exit
PB: predicated region body
PF: predicated region fallthrough
CT: control target
= control target key end

     0   :  { %s9473_s6 = smov 1   ;;  %s9474_s10 = smov 2   ;;  %s10883_s0 = inlined_call_operand.smem [shape: u32[47], index: -1, kind: input, shape index: {}] }
   0x1   :  { %s9558_s5 = sld [smem:[%s10883_s0]]   ;;  %s9475_s14 = smov 3  }
   0x2   :  { %s9563_s9 = sld [smem:[%s10883_s0 + %s9473_s6]]   ;;  %s9476_s18 = smov 4  }
   0x3   :  { %s9568_s13 = sld [smem:[%s10883_s0 + %s9474_s10]]   ;;  %s9477_s22 = smov 5  }
   0x4   :  { %s9573_s17 = sld [smem:[%s10883_s0 + %s9475_s14]]   ;;  %s9478_s26 = smov 6  }
   0x5   :  { %s9578_s21 = sld [smem:[%s10883_s0 + %s9476_s18]]   ;;  %s9479_s30 = smov 7  }
   0x6   :  { %s9583_s25 = sld [smem:[%s10883_s0 + %s9477_s22]]   ;;  %s9480_s4 = smov 8  }
   0x7   :  { %10936 = sst [smem:[#allocation49_spill]] %s9558_s5  ;;  %s9481_s10 = smov 9  }
   0x8   :  { %10937 = sst [smem:[#allocation50_spill]] %s9563_s9  ;;  %s9482_s15 = smov 10  }
   0x9   :  { %10938 = sst [smem:[#allocation51_spill]] %s9568_s13  ;;  %s9483_s20 = smov 11  }
   0xa   :  { %10939 = sst [smem:[#allocation52_spill]] %s9573_s17  ;;  %s9485_s1 = smov 13  }
   0xb   :  { %10940 = sst [smem:[#allocation53_spill]] %s9578_s21  ;;  %s9486_s7 = smov 14  }
   0xc   :  { %10941 = sst [smem:[#allocation54_spill]] %s9583_s25  ;;  %s9488_s22 = smov 16  }
   0xd   :  { %s9588_s29 = sld [smem:[%s10883_s0 + %s9478_s26]]   ;;  %s9484_s26 = smov 12  }
   0xe   :  { %s9593_s3 = sld [smem:[%s10883_s0 + %s9479_s30]]   ;;  %s9489_s28 = smov 17  }
   0xf   :  { %s9598_s8 = sld [smem:[%s10883_s0 + %s9480_s4]]  }
  0x10   :  { %s9603_s14 = sld [smem:[%s10883_s0 + %s9481_s10]]  }
  0x11   :  { %s9608_s19 = sld [smem:[%s10883_s0 + %s9482_s15]]   ;;  %s9487_s15 = smov 15  }
  0x12   :  { %s9613_s24 = sld [smem:[%s10883_s0 + %s9483_s20]]  }
  0x13   :  { %10942 = sst [smem:[#allocation55_spill]] %s9588_s29 }
  0x14   :  { %10943 = sst [smem:[#allocation56_spill]] %s9593_s3 }
  0x15   :  { %10944 = sst [smem:[#allocation57_spill]] %s9598_s8 }
  0x16   :  { %10945 = sst [smem:[#allocation58_spill]] %s9603_s14 }
  0x17   :  { %10946 = sst [smem:[#allocation59_spill]] %s9608_s19 }
  0x18   :  { %s9618_s30 = sld [smem:[%s10883_s0 + %s9484_s26]]  }
  0x19   :  { %s9623_s6 = sld [smem:[%s10883_s0 + %s9485_s1]]  }
  0x1a   :  { %s9628_s12 = sld [smem:[%s10883_s0 + %s9486_s7]]   ;;  %s9490_s7 = smov 18  }
  0x1b   :  { %s9633_s20 = sld [smem:[%s10883_s0 + %s9487_s15]]   ;;  %s9491_s15 = smov 19  }
  0x1c   :  { %s9638_s27 = sld [smem:[%s10883_s0 + %s9488_s22]]   ;;  %s9492_s22 = smov 20  }
  0x1d   :  { %s9643_s4 = sld [smem:[%s10883_s0 + %s9489_s28]]   ;;  %s9493_s28 = smov 21  }
  0x1e   :  { %s9648_s3 = sld [smem:[%s10883_s0 + %s9490_s7]]   ;;  %s9494_s7 = smov 22  }
  0x1f   :  { %10947 = sst [smem:[#allocation60_spill]] %s9623_s6 }
  0x20   :  { %10948 = sst [smem:[#allocation61_spill]] %s9628_s12 }
  0x21   :  { %10949 = sst [smem:[#allocation62_spill]] %s9633_s20 }
  0x22   :  { %10950 = sst [smem:[#allocation63_spill]] %s9638_s27 }
  0x23   :  { %10951 = sst [smem:[#allocation64_spill]] %s9643_s4 }
  0x24   :  { %10952 = sst [smem:[#allocation65_spill]] %s9648_s3 }
  0x25   :  { %s9653_s29 = sld [smem:[%s10883_s0 + %s9491_s15]]   ;;  %s9495_s15 = smov 23  }
  0x26   :  { %s9658_s25 = sld [smem:[%s10883_s0 + %s9492_s22]]   ;;  %s9496_s22 = smov 24  }
  0x27   :  { %s9663_s9 = sld [smem:[%s10883_s0 + %s9493_s28]]   ;;  %s9497_s28 = smov 25  }
  0x28   :  { %s9668_s3 = sld [smem:[%s10883_s0 + %s9494_s7]]   ;;  %s9498_s7 = smov 26  }
  0x29   :  { %s9678_s27 = sld [smem:[%s10883_s0 + %s9496_s22]]   ;;  %s9500_s22 = smov 28  }
  0x2a   :  { %s9683_s12 = sld [smem:[%s10883_s0 + %s9497_s28]]   ;;  %s9501_s28 = smov 29  }
  0x2b   :  { %10953 = sst [smem:[#allocation66_spill]] %s9653_s29 }
  0x2c   :  { %s9673_s29 = sld [smem:[%s10883_s0 + %s9495_s15]]   ;;  %s9499_s15 = smov 27  }
  0x2d   :  { %10954 = sst [smem:[#allocation67_spill]] %s9663_s9 }
  0x2e   :  { %10955 = sst [smem:[#allocation68_spill]] %s9668_s3 }
  0x2f   :  { %10956 = sst [smem:[#allocation69_spill]] %s9678_s27 }
  0x30   :  { %10957 = sst [smem:[#allocation70_spill]] %s9683_s12 }
  0x31   :  { %s9688_s3 = sld [smem:[%s10883_s0 + %s9498_s7]]   ;;  %s9502_s7 = smov 30  }
  0x32   :  { %s9693_s19 = sld [smem:[%s10883_s0 + %s9499_s15]]   ;;  %s9503_s15 = smov 31  }
  0x33   :  { %s9698_s27 = sld [smem:[%s10883_s0 + %s9500_s22]]   ;;  %s9504_s22 = smov 32  }
  0x34   :  { %s9703_s21 = sld [smem:[%s10883_s0 + %s9501_s28]]   ;;  %s9505_s28 = smov 33  }
  0x35   :  { %s9708_s17 = sld [smem:[%s10883_s0 + %s9502_s7]]   ;;  %s9506_s7 = smov 34  }
  0x36   :  { %s9713_s14 = sld [smem:[%s10883_s0 + %s9503_s15]]   ;;  %s9507_s15 = smov 35  }
  0x37   :  { %10958 = sst [smem:[#allocation71_spill]] %s9688_s3 }
  0x38   :  { %10959 = sst [smem:[#allocation72_spill]] %s9693_s19 }
  0x39   :  { %10960 = sst [smem:[#allocation73_spill]] %s9698_s27 }
  0x3a   :  { %s9718_s27 = sld [smem:[%s10883_s0 + %s9504_s22]]   ;;  %s9508_s22 = smov 36  }
  0x3b   :  { %10961 = sst [smem:[#allocation74_spill]] %s9708_s17 }
  0x3c   :  { %10962 = sst [smem:[#allocation75_spill]] %s9713_s14 }
  0x3d   :  { %s9723_s13 = sld [smem:[%s10883_s0 + %s9505_s28]]   ;;  %s9509_s28 = smov 37  }
  0x3e   :  { %s9728_s17 = sld [smem:[%s10883_s0 + %s9506_s7]]   ;;  %s9510_s7 = smov 38  }
  0x3f   :  { %s9733_s5 = sld [smem:[%s10883_s0 + %s9507_s15]]   ;;  %s9511_s15 = smov 39  }
  0x40   :  { %10963 = sst [smem:[#allocation76_spill]] %s9718_s27 }
  0x41   :  { %s9738_s27 = sld [smem:[%s10883_s0 + %s9508_s22]]   ;;  %s9512_s22 = smov 40  }
  0x42   :  { %s9743_s8 = sld [smem:[%s10883_s0 + %s9509_s28]]   ;;  %s9513_s28 = smov 41  }
  0x43   :  { %s9753_s14 = sld [smem:[%s10883_s0 + %s9511_s15]]   ;;  %s9515_s15 = smov 43  }
  0x44   :  { %10964 = sst [smem:[#allocation77_spill]] %s9728_s17 }
  0x45   :  { %10965 = sst [smem:[#allocation78_spill]] %s9733_s5 }
  0x46   :  { %s9748_s17 = sld [smem:[%s10883_s0 + %s9510_s7]]   ;;  %s9514_s7 = smov 42  }
  0x47   :  { %10966 = sst [smem:[#allocation79_spill]] %s9738_s27 }
  0x48   :  { %10967 = sst [smem:[#allocation80_spill]] %s9743_s8 }
  0x49   :  { %s9758_s27 = sld [smem:[%s10883_s0 + %s9512_s22]]   ;;  %s9516_s22 = smov 44  }
  0x4a   :  { %s9763_s8 = sld [smem:[%s10883_s0 + %s9513_s28]]   ;;  %s9517_s28 = smov 45  }
  0x4b   :  { %s9773_s19 = sld [smem:[%s10883_s0 + %s9515_s15]]  }
  0x4c   :  { %10968 = sst [smem:[#allocation81_spill]] %s9748_s17 }
  0x4d   :  { %s9768_s17 = sld [smem:[%s10883_s0 + %s9514_s7]]   ;;  %s9518_s7 = smov 46  }
  0x4e   :  { %s9783_s12 = sld [smem:[%s10883_s0 + %s9517_s28]]  }
  0x4f   :  { %10969 = sst [smem:[#allocation82_spill]] %s9758_s27 }
  0x50   :  { %10970 = sst [smem:[#allocation83_spill]] %s9763_s8 }
  0x51   :  { %s9778_s27 = sld [smem:[%s10883_s0 + %s9516_s22]]  }
  0x53   :  { %10971 = sst [smem:[#allocation84_spill]] %s9768_s17 }
  0x54   :  { %s9788_s17 = sld [smem:[%s10883_s0 + %s9518_s7]]  }
  0x55   :  { %98 = vsyncpa [#allocation3], 0 }
  0x56   :  { %99 = vsyncpa [#allocation5], 0 }
  0x57   :  { %100 = vsyncpa [#allocation8], 0 }
  0x58   :  { %101 = vsyncpa [#allocation11], 0 }
  0x59   :  { %102 = vsyncpa [#allocation14], 0 }
  0x5a   :  { %103 = vsyncpa [#allocation17], 0 }
  0x5b   :  { %104 = vsyncpa [#allocation20], 0 }
  0x5c   :  { %105 = vsyncpa [#allocation23], 0 }
  0x5d   :  { %106 = vsyncpa [#allocation26], 0 }
  0x5e   :  { %107 = vsyncpa [#allocation29], 0 }
  0x5f   :  { %108 = vsyncpa [#allocation32], 0 }
  0x60   :  { %109 = vsyncpa [#allocation35], 0  ;;  %s9790_s15 = smov 0  }
  0x61 LB: > { %s10972_s9 = sld [smem:[#allocation67_spill]]  ;;  %s10974_s6 = sld [smem:[#allocation60_spill]]  ;;  %s9471_s15 = sphi %s9790_s15, %s115_s15  }
  0x62   : > { %s10973_s8 = sld [smem:[#allocation83_spill]]  ;;  %s10975_s5 = sld [smem:[#allocation78_spill]] }
  0x63   : > { %s10976_s4 = sld [smem:[#allocation64_spill]]  ;;  %s10977_s3 = sld [smem:[#allocation71_spill]] }
  0x64   : > { %s10978_s20 = sld [smem:[#allocation62_spill]]  ;;  %s9796_s0 = sadd.s32 4294967295, %s9471_s15  }
  0x65   : > { %p7001_p0 = scmp.ge.s32.totalorder %s9471_s15, 1  ;;  %p1122_p1 = scmp.lt.s32.totalorder %s9471_s15, 3 }
  0x66   : > { %p10911_p2 = scmp.eq.s32.totalorder %s9796_s0, 0  ;;  %s9519_s18 = smov [#allocation4]  }
  0x67   : > { %p9801_p3 = pnand %p7001_p0, %p1122_p1  ;;  %s1174_s22 = sshll.u32 %s9519_s18, 4  ;;  %s9805_s22 = int_to_ptr.vmem [resolvable:$true] %s1174_s22 }
  0x68   : > { %s9520_s23 = smov [#allocation7]   ;;  %s9521_s1 = smov [#allocation10]  }
  0x69   : > { %s10979_s16 = scalar_select %p9801_p3, 1, 0 }
  0x6a   : > { %p8516_p4 = pneg %p9801_p3  ;;  %s1203_s26 = sshll.u32 %s9520_s23, 4  ;;  %s9809_s26 = int_to_ptr.vmem [resolvable:$true] %s1203_s26 }
  0x6b   : > { %s1239_s2 = sshll.u32 %s9521_s1, 4  ;;  %s9522_s7 = smov [#allocation13]   ;;  %s9817_s2 = int_to_ptr.vmem [resolvable:$true] %s1239_s2 }
  0x6c   : > { %p9813_p5 = pnand %p10911_p2, %p8516_p4  ;;  %s9819_s10 = sshll.u32 %s9522_s7, 4  ;;  %s1264_s10 = int_to_ptr.vmem [resolvable:$true] %s9819_s10 }
  0x6d   : > { %s8773_s11 = scalar_lea.hbm %s9618_s30, 32 }
  0x6e   : > { %p8774_p6 = scmp.ne.s32.totalorder %s9618_s30, %s8773_s11  ;;  %p9825_p7 = pneg %p9813_p5 }
  0x6f   : > { %p8780_p10 = scmp.lt.u32.totalorder %s8773_s11, %s9618_s30 }
  0x70   : > { %p8776_p8 = pnand %p9825_p7, %p8774_p6 }
  0x72   : > { %p8777_p9 = pneg %p8776_p8 }
  0x74   : > { %p8782_p11 = pnand %p8780_p10, %p8777_p9 }
  0x76   : > { %8785 = shalt.err (!%p8782_p11)
}
  0x77   : > { %s8786_s23 = scalar_lea.vmem %s9805_s22, 32  ;;  %p8794_p1 = scmp.lt.s32.totalorder %s9805_s22, %s9805_s22 }
  0x78   : > { %p8787_p12 = scmp.ne.s32.totalorder %s9805_s22, %s8786_s23  ;;  %p8795_p4 = scmp.lt.s32.totalorder %s8786_s23, %s8786_s23 }
  0x7a   : > { %p8789_p13 = pnand %p8787_p12, %p9825_p7  ;;  %p8796_p2 = por %p8795_p4, %p8794_p1 }
  0x7c   : > { %p8790_p0 = pneg %p8789_p13 }
  0x7e   : > { %p8797_p3 = pnand %p8796_p2, %p8790_p0 }
  0x80   : > { %8800 = shalt.err (!%p8797_p3)
}
  0x81   : > { %s9523_s1 = smov 16   ;;  %s9524_s7 = smov 1  }
  0x82   : > { %8522 = dma.hbm_to_vmem [thread:$0]  (!%p9813_p5), %s9618_s30, 32, %s9805_s22, [#allocation5], %s9523_s1, %s9523_s1, %s9524_s7  }
  0x83   : > { %s8801_s11 = scalar_lea.hbm %s10978_s20, 32 }
  0x84   : > { %p8802_p6 = scmp.ne.s32.totalorder %s10978_s20, %s8801_s11  ;;  %p8808_p3 = scmp.lt.u32.totalorder %s8801_s11, %s10978_s20 }
  0x86   : > { %p8804_p8 = pnand %p8802_p6, %p9825_p7 }
  0x88   : > { %p8805_p2 = pneg %p8804_p8 }
  0x8a   : > { %p8810_p9 = pnand %p8808_p3, %p8805_p2 }
  0x8c   : > { %8813 = shalt.err (!%p8810_p9)
}
  0x8d   : > { %s8814_s23 = scalar_lea.vmem %s9809_s26, 32  ;;  %p8822_p13 = scmp.lt.s32.totalorder %s9809_s26, %s9809_s26 }
  0x8e   : > { %p8815_p10 = scmp.ne.s32.totalorder %s9809_s26, %s8814_s23  ;;  %p8823_p0 = scmp.lt.s32.totalorder %s8814_s23, %s8814_s23 }
  0x90   : > { %p8817_p11 = pnand %p8815_p10, %p9825_p7  ;;  %p8824_p1 = por %p8823_p0, %p8822_p13 }
  0x92   : > { %p8818_p12 = pneg %p8817_p11 }
  0x94   : > { %p8825_p4 = pnand %p8824_p1, %p8818_p12 }
  0x96   : > { %8828 = shalt.err (!%p8825_p4)
}
  0x97   : > { %8528 = dma.hbm_to_vmem [thread:$0]  (!%p9813_p5), %s10978_s20, 32, %s9809_s26, [#allocation8], %s9523_s1, %s9523_s1, %s9524_s7  }
  0x98   : > { %s8829_s22 = scalar_lea.hbm %s9658_s25, 16 }
  0x99   : > { %p8830_p6 = scmp.ne.s32.totalorder %s9658_s25, %s8829_s22  ;;  %p8836_p3 = scmp.lt.u32.totalorder %s8829_s22, %s9658_s25 }
  0x9b   : > { %p8832_p8 = pnand %p8830_p6, %p9825_p7 }
  0x9d   : > { %p8833_p2 = pneg %p8832_p8 }
  0x9f   : > { %p8838_p9 = pnand %p8836_p3, %p8833_p2 }
  0xa1   : > { %8841 = shalt.err (!%p8838_p9)
}
  0xa2   : > { %s8842_s11 = scalar_lea.vmem %s9817_s2, 16  ;;  %s8849_s23 = scalar_lea.vmem %s9817_s2, 32 }
  0xa3   : > { %p8843_p10 = scmp.ne.s32.totalorder %s9817_s2, %s8842_s11  ;;  %p8850_p13 = scmp.lt.s32.totalorder %s9817_s2, %s9817_s2 }
  0xa4   : > { %p8851_p0 = scmp.lt.s32.totalorder %s8849_s23, %s8842_s11 }
  0xa5   : > { %p8845_p11 = pnand %p8843_p10, %p9825_p7 }
  0xa6   : > { %p8852_p1 = por %p8851_p0, %p8850_p13 }
  0xa7   : > { %p8846_p12 = pneg %p8845_p11 }
  0xa9   : > { %p8853_p4 = pnand %p8852_p1, %p8846_p12 }
  0xab   : > { %8856 = shalt.err (!%p8853_p4)
}
  0xac   : > { %8534 = dma.hbm_to_vmem [thread:$0]  (!%p9813_p5), %s9658_s25, 16, %s9817_s2, [#allocation11]  }
  0xad   : > { %s8857_s26 = scalar_lea.hbm %s9673_s29, 32 }
  0xae   : > { %p8858_p6 = scmp.ne.s32.totalorder %s9673_s29, %s8857_s26  ;;  %p8864_p3 = scmp.lt.u32.totalorder %s8857_s26, %s9673_s29 }
  0xb0   : > { %p8860_p8 = pnand %p8858_p6, %p9825_p7 }
  0xb2   : > { %p8861_p2 = pneg %p8860_p8 }
  0xb4   : > { %p8866_p9 = pnand %p8864_p3, %p8861_p2 }
  0xb6   : > { %8869 = shalt.err (!%p8866_p9)
}
  0xb7   : > { %s8870_s22 = scalar_lea.vmem %s1264_s10, 32  ;;  %p8878_p13 = scmp.lt.s32.totalorder %s1264_s10, %s1264_s10 }
  0xb8   : > { %p8871_p10 = scmp.ne.s32.totalorder %s1264_s10, %s8870_s22  ;;  %p8879_p0 = scmp.lt.s32.totalorder %s8870_s22, %s8870_s22 }
  0xba   : > { %p8873_p11 = pnand %p8871_p10, %p9825_p7  ;;  %p8880_p1 = por %p8879_p0, %p8878_p13 }
  0xbc   : > { %p8874_p12 = pneg %p8873_p11 }
  0xbe   : > { %p8881_p4 = pnand %p8880_p1, %p8874_p12 }
  0xc0   : > { %8884 = shalt.err (!%p8881_p4)
}
  0xc1   : > { %8540 = dma.hbm_to_vmem [thread:$0]  (!%p9813_p5), %s9673_s29, 32, %s1264_s10, [#allocation14], %s9523_s1, %s9523_s1, %s9524_s7  }
  0xc2   : > { %s9525_s2 = smov [#allocation16]   ;;  %s9526_s23 = smov [#allocation19]  }
  0xc3   : > { %s1292_s11 = sshll.u32 %s9525_s2, 4  ;;  %s1321_s26 = sshll.u32 %s9526_s23, 4  ;;  %s1293_s11 = int_to_ptr.vmem [resolvable:$true] %s1292_s11  ;;  %s1322_s26 = int_to_ptr.vmem [resolvable:$true] %s1321_s26 }
  0xc4   : > { %s8885_s22 = scalar_lea.hbm %s10977_s3, 32 }
  0xc5   : > { %p8886_p6 = scmp.ne.s32.totalorder %s10977_s3, %s8885_s22  ;;  %p8892_p3 = scmp.lt.u32.totalorder %s8885_s22, %s10977_s3 }
  0xc7   : > { %p8888_p8 = pnand %p8886_p6, %p9825_p7 }
  0xc9   : > { %p8889_p2 = pneg %p8888_p8 }
  0xcb   : > { %p8894_p9 = pnand %p8892_p3, %p8889_p2 }
  0xcd   : > { %8897 = shalt.err (!%p8894_p9)
}
  0xce   : > { %s8898_s20 = scalar_lea.vmem %s1293_s11, 32  ;;  %p8906_p13 = scmp.lt.s32.totalorder %s1293_s11, %s1293_s11 }
  0xcf   : > { %p8899_p10 = scmp.ne.s32.totalorder %s1293_s11, %s8898_s20  ;;  %p8907_p0 = scmp.lt.s32.totalorder %s8898_s20, %s8898_s20 }
  0xd1   : > { %p8901_p11 = pnand %p8899_p10, %p9825_p7  ;;  %p8908_p1 = por %p8907_p0, %p8906_p13 }
  0xd3   : > { %p8902_p12 = pneg %p8901_p11 }
  0xd5   : > { %p8909_p4 = pnand %p8908_p1, %p8902_p12 }
  0xd7   : > { %8912 = shalt.err (!%p8909_p4)
}
  0xd8   : > { %8546 = dma.hbm_to_vmem [thread:$0]  (!%p9813_p5), %s10977_s3, 32, %s1293_s11, [#allocation17], %s9523_s1, %s9523_s1, %s9524_s7  }
  0xd9   : > { %s8913_s10 = scalar_lea.hbm %s9703_s21, 32 }
  0xda   : > { %p8914_p6 = scmp.ne.s32.totalorder %s9703_s21, %s8913_s10  ;;  %p8920_p3 = scmp.lt.u32.totalorder %s8913_s10, %s9703_s21 }
  0xdc   : > { %p8916_p8 = pnand %p8914_p6, %p9825_p7 }
  0xde   : > { %p8917_p2 = pneg %p8916_p8 }
  0xe0   : > { %p8922_p9 = pnand %p8920_p3, %p8917_p2 }
  0xe2   : > { %8925 = shalt.err (!%p8922_p9)
}
  0xe3   : > { %s8926_s20 = scalar_lea.vmem %s1322_s26, 32  ;;  %p8934_p13 = scmp.lt.s32.totalorder %s1322_s26, %s1322_s26 }
  0xe4   : > { %p8927_p10 = scmp.ne.s32.totalorder %s1322_s26, %s8926_s20  ;;  %p8935_p0 = scmp.lt.s32.totalorder %s8926_s20, %s8926_s20 }
  0xe6   : > { %p8929_p11 = pnand %p8927_p10, %p9825_p7  ;;  %p8936_p1 = por %p8935_p0, %p8934_p13 }
  0xe8   : > { %p8930_p12 = pneg %p8929_p11 }
  0xea   : > { %p8937_p4 = pnand %p8936_p1, %p8930_p12 }
  0xec   : > { %8940 = shalt.err (!%p8937_p4)
}
  0xed   : > { %8552 = dma.hbm_to_vmem [thread:$0]  (!%p9813_p5), %s9703_s21, 32, %s1322_s26, [#allocation20], %s9523_s1, %s9523_s1, %s9524_s7  }
  0xee   : > { %s9527_s2 = smov [#allocation22]   ;;  %s9528_s23 = smov [#allocation25]  }
  0xef   : > { %s1353_s11 = sshll.u32 %s9527_s2, 4  ;;  %s1379_s22 = sshll.u32 %s9528_s23, 4  ;;  %s1354_s11 = int_to_ptr.vmem [resolvable:$true] %s1353_s11  ;;  %s1380_s22 = int_to_ptr.vmem [resolvable:$true] %s1379_s22 }
  0xf0   : > { %s8941_s10 = scalar_lea.hbm %s9723_s13, 32 }
  0xf1   : > { %p8942_p6 = scmp.ne.s32.totalorder %s9723_s13, %s8941_s10  ;;  %p8948_p3 = scmp.lt.u32.totalorder %s8941_s10, %s9723_s13 }
  0xf3   : > { %p8944_p8 = pnand %p8942_p6, %p9825_p7 }
  0xf5   : > { %p8945_p2 = pneg %p8944_p8 }
  0xf7   : > { %p8950_p9 = pnand %p8948_p3, %p8945_p2 }
  0xf9   : > { %8953 = shalt.err (!%p8950_p9)
}
  0xfa   : > { %s8954_s20 = scalar_lea.vmem %s1354_s11, 32  ;;  %p8962_p13 = scmp.lt.s32.totalorder %s1354_s11, %s1354_s11 }
  0xfb   : > { %p8955_p10 = scmp.ne.s32.totalorder %s1354_s11, %s8954_s20  ;;  %p8963_p0 = scmp.lt.s32.totalorder %s8954_s20, %s8954_s20 }
  0xfd   : > { %p8957_p11 = pnand %p8955_p10, %p9825_p7  ;;  %p8964_p1 = por %p8963_p0, %p8962_p13 }
  0xff   : > { %p8958_p12 = pneg %p8957_p11 }
 0x101   : > { %p8965_p4 = pnand %p8964_p1, %p8958_p12 }
 0x103   : > { %8968 = shalt.err (!%p8965_p4)
}
 0x104   : > { %8558 = dma.hbm_to_vmem [thread:$0]  (!%p9813_p5), %s9723_s13, 32, %s1354_s11, [#allocation23], %s9523_s1, %s9523_s1, %s9524_s7  }
 0x105   : > { %s8969_s26 = scalar_lea.hbm %s10975_s5, 32 }
 0x106   : > { %p8970_p6 = scmp.ne.s32.totalorder %s10975_s5, %s8969_s26  ;;  %p8976_p3 = scmp.lt.u32.totalorder %s8969_s26, %s10975_s5 }
 0x108   : > { %p8972_p8 = pnand %p8970_p6, %p9825_p7 }
 0x10a   : > { %p8973_p2 = pneg %p8972_p8 }
 0x10c   : > { %p8978_p9 = pnand %p8976_p3, %p8973_p2 }
 0x10e   : > { %8981 = shalt.err (!%p8978_p9)
}
 0x10f   : > { %s8982_s2 = scalar_lea.vmem %s1380_s22, 32  ;;  %p8990_p13 = scmp.lt.s32.totalorder %s1380_s22, %s1380_s22 }
 0x110   : > { %p8983_p10 = scmp.ne.s32.totalorder %s1380_s22, %s8982_s2  ;;  %p8991_p0 = scmp.lt.s32.totalorder %s8982_s2, %s8982_s2 }
 0x112   : > { %p8985_p11 = pnand %p8983_p10, %p9825_p7  ;;  %p8992_p1 = por %p8991_p0, %p8990_p13 }
 0x114   : > { %p8986_p12 = pneg %p8985_p11 }
 0x116   : > { %p8993_p4 = pnand %p8992_p1, %p8986_p12 }
 0x118   : > { %8996 = shalt.err (!%p8993_p4)
}
 0x119   : > { %8564 = dma.hbm_to_vmem [thread:$0]  (!%p9813_p5), %s10975_s5, 32, %s1380_s22, [#allocation26], %s9523_s1, %s9523_s1, %s9524_s7  }
 0x11a   : > { %s9529_s11 = smov [#allocation28]   ;;  %s9530_s10 = smov [#allocation31]  }
 0x11b   : > { %s1411_s23 = sshll.u32 %s9529_s11, 4  ;;  %s1437_s20 = sshll.u32 %s9530_s10, 4  ;;  %s1412_s23 = int_to_ptr.vmem [resolvable:$true] %s1411_s23  ;;  %s1438_s20 = int_to_ptr.vmem [resolvable:$true] %s1437_s20 }
 0x11c   : > { %s8997_s26 = scalar_lea.hbm %s9753_s14, 32 }
 0x11d   : > { %p8998_p6 = scmp.ne.s32.totalorder %s9753_s14, %s8997_s26  ;;  %p9004_p3 = scmp.lt.u32.totalorder %s8997_s26, %s9753_s14 }
 0x11f   : > { %p9000_p8 = pnand %p8998_p6, %p9825_p7 }
 0x121   : > { %p9001_p2 = pneg %p9000_p8 }
 0x123   : > { %p9006_p9 = pnand %p9004_p3, %p9001_p2 }
 0x125   : > { %9009 = shalt.err (!%p9006_p9)
}
 0x126   : > { %s9010_s2 = scalar_lea.vmem %s1412_s23, 32  ;;  %p9018_p13 = scmp.lt.s32.totalorder %s1412_s23, %s1412_s23 }
 0x127   : > { %p9011_p10 = scmp.ne.s32.totalorder %s1412_s23, %s9010_s2  ;;  %p9019_p0 = scmp.lt.s32.totalorder %s9010_s2, %s9010_s2 }
 0x129   : > { %p9013_p11 = pnand %p9011_p10, %p9825_p7  ;;  %p9020_p1 = por %p9019_p0, %p9018_p13 }
 0x12b   : > { %p9014_p12 = pneg %p9013_p11 }
 0x12d   : > { %p9021_p4 = pnand %p9020_p1, %p9014_p12 }
 0x12f   : > { %9024 = shalt.err (!%p9021_p4)
}
 0x130   : > { %8570 = dma.hbm_to_vmem [thread:$0]  (!%p9813_p5), %s9753_s14, 32, %s1412_s23, [#allocation29], %s9523_s1, %s9523_s1, %s9524_s7  }
 0x131   : > { %s9025_s22 = scalar_lea.hbm %s10973_s8, 32 }
 0x132   : > { %p9026_p6 = scmp.ne.s32.totalorder %s10973_s8, %s9025_s22  ;;  %p9032_p3 = scmp.lt.u32.totalorder %s9025_s22, %s10973_s8 }
 0x134   : > { %p9028_p8 = pnand %p9026_p6, %p9825_p7 }
 0x136   : > { %p9029_p2 = pneg %p9028_p8 }
 0x138   : > { %p9034_p9 = pnand %p9032_p3, %p9029_p2 }
 0x13a   : > { %9037 = shalt.err (!%p9034_p9)
}
 0x13b   : > { %s9038_s11 = scalar_lea.vmem %s1438_s20, 32  ;;  %p9046_p13 = scmp.lt.s32.totalorder %s1438_s20, %s1438_s20 }
 0x13c   : > { %p9039_p10 = scmp.ne.s32.totalorder %s1438_s20, %s9038_s11  ;;  %p9047_p0 = scmp.lt.s32.totalorder %s9038_s11, %s9038_s11 }
 0x13e   : > { %p9041_p11 = pnand %p9039_p10, %p9825_p7  ;;  %p9048_p1 = por %p9047_p0, %p9046_p13 }
 0x140   : > { %p9042_p12 = pneg %p9041_p11 }
 0x142   : > { %p9049_p4 = pnand %p9048_p1, %p9042_p12 }
 0x144   : > { %9052 = shalt.err (!%p9049_p4)
}
 0x145   : > { %8576 = dma.hbm_to_vmem [thread:$0]  (!%p9813_p5), %s10973_s8, 32, %s1438_s20, [#allocation32], %s9523_s1, %s9523_s1, %s9524_s7  }
 0x146   : > { %s9531_s23 = smov [#allocation34]   ;;  %s9532_s26 = smov [#allocation2]  }
 0x147   : > { %s1462_s10 = sshll.u32 %s9531_s23, 4  ;;  %s1161_s2 = sshll.u32 %s9532_s26, 4  ;;  %s1463_s10 = int_to_ptr.vmem [resolvable:$true] %s1462_s10  ;;  %s1162_s2 = int_to_ptr.vmem [resolvable:$true] %s1161_s2 }
 0x148   : > { %s9053_s22 = scalar_lea.hbm %s9773_s19, 16 }
 0x149   : > { %p9054_p6 = scmp.ne.s32.totalorder %s9773_s19, %s9053_s22  ;;  %p9060_p3 = scmp.lt.u32.totalorder %s9053_s22, %s9773_s19 }
 0x14b   : > { %p9056_p8 = pnand %p9054_p6, %p9825_p7 }
 0x14d   : > { %p9057_p2 = pneg %p9056_p8 }
 0x14f   : > { %p9062_p9 = pnand %p9060_p3, %p9057_p2 }
 0x151   : > { %9065 = shalt.err (!%p9062_p9)
}
 0x152   : > { %s9066_s11 = scalar_lea.vmem %s1463_s10, 16  ;;  %s9073_s20 = scalar_lea.vmem %s1463_s10, 32 }
 0x153   : > { %p9067_p10 = scmp.ne.s32.totalorder %s1463_s10, %s9066_s11  ;;  %p9074_p13 = scmp.lt.s32.totalorder %s1463_s10, %s1463_s10 }
 0x154   : > { %p9075_p0 = scmp.lt.s32.totalorder %s9073_s20, %s9066_s11 }
 0x155   : > { %p9069_p11 = pnand %p9067_p10, %p9825_p7 }
 0x156   : > { %p9076_p1 = por %p9075_p0, %p9074_p13 }
 0x157   : > { %p9070_p12 = pneg %p9069_p11 }
 0x159   : > { %p9077_p4 = pnand %p9076_p1, %p9070_p12 }
 0x15b   : > { %9080 = shalt.err (!%p9077_p4)
}
 0x15c   : > { %8582 = dma.hbm_to_vmem [thread:$0]  (!%p9813_p5), %s9773_s19, 16, %s1463_s10, [#allocation35]  }
 0x15d   : > { %s9081_s23 = scalar_lea.hbm %s9613_s24, 32 }
 0x15e   : > { %p9082_p6 = scmp.ne.s32.totalorder %s9613_s24, %s9081_s23  ;;  %p9088_p3 = scmp.lt.u32.totalorder %s9081_s23, %s9613_s24 }
 0x160   : > { %p9084_p8 = pnand %p9082_p6, %p9825_p7 }
 0x162   : > { %p9085_p2 = pneg %p9084_p8 }
 0x164   : > { %p9090_p9 = pnand %p9088_p3, %p9085_p2 }
 0x166   : > { %9093 = shalt.err (!%p9090_p9)
}
 0x167   : > { %s9094_s26 = scalar_lea.vmem %s1162_s2, 32  ;;  %p9102_p13 = scmp.lt.s32.totalorder %s1162_s2, %s1162_s2 }
 0x168   : > { %p9095_p10 = scmp.ne.s32.totalorder %s1162_s2, %s9094_s26  ;;  %p9103_p0 = scmp.lt.s32.totalorder %s9094_s26, %s9094_s26 }
 0x16a   : > { %p9097_p11 = pnand %p9095_p10, %p9825_p7  ;;  %p9104_p1 = por %p9103_p0, %p9102_p13 }
 0x16c   : > { %p9098_p12 = pneg %p9097_p11 }
 0x16e   : > { %p9105_p4 = pnand %p9104_p1, %p9098_p12 }
 0x170   : > { %9108 = shalt.err (!%p9105_p4)
}
 0x171   : > { %8519 = dma.hbm_to_vmem [thread:$0]  (!%p9813_p5), %s9613_s24, 32, %s1162_s2, [#allocation3], %s9523_s1, %s9523_s1, %s9524_s7  }
 0x172   : > { %s9533_s10 = smov [#allocation6]   ;;  %s9534_s11 = smov [#allocation9]  }
 0x173   : > { %s1187_s22 = sshll.u32 %s9533_s10, 4  ;;  %s1219_s20 = sshll.u32 %s9534_s11, 4  ;;  %s1188_s22 = int_to_ptr.vmem [resolvable:$true] %s1187_s22  ;;  %s1220_s20 = int_to_ptr.vmem [resolvable:$true] %s1219_s20 }
 0x174   : > { %s9109_s23 = scalar_lea.hbm %s10974_s6, 32 }
 0x175   : > { %p9110_p6 = scmp.ne.s32.totalorder %s10974_s6, %s9109_s23  ;;  %p9116_p3 = scmp.lt.u32.totalorder %s9109_s23, %s10974_s6 }
 0x177   : > { %p9112_p8 = pnand %p9110_p6, %p9825_p7 }
 0x179   : > { %p9113_p2 = pneg %p9112_p8 }
 0x17b   : > { %p9118_p9 = pnand %p9116_p3, %p9113_p2 }
 0x17d   : > { %9121 = shalt.err (!%p9118_p9)
}
 0x17e   : > { %s9122_s26 = scalar_lea.vmem %s1188_s22, 32  ;;  %p9130_p13 = scmp.lt.s32.totalorder %s1188_s22, %s1188_s22 }
 0x17f   : > { %p9123_p10 = scmp.ne.s32.totalorder %s1188_s22, %s9122_s26  ;;  %p9131_p0 = scmp.lt.s32.totalorder %s9122_s26, %s9122_s26 }
 0x181   : > { %p9125_p11 = pnand %p9123_p10, %p9825_p7  ;;  %p9132_p1 = por %p9131_p0, %p9130_p13 }
 0x183   : > { %p9126_p12 = pneg %p9125_p11 }
 0x185   : > { %p9133_p4 = pnand %p9132_p1, %p9126_p12 }
 0x187   : > { %9136 = shalt.err (!%p9133_p4)
}
 0x188   : > { %8525 = dma.hbm_to_vmem [thread:$0]  (!%p9813_p5), %s10974_s6, 32, %s1188_s22, [#allocation5], %s9523_s1, %s9523_s1, %s9524_s7  }
 0x189   : > { %s9137_s2 = scalar_lea.hbm %s10976_s4, 32 }
 0x18a   : > { %p9138_p6 = scmp.ne.s32.totalorder %s10976_s4, %s9137_s2  ;;  %p9144_p3 = scmp.lt.u32.totalorder %s9137_s2, %s10976_s4 }
 0x18c   : > { %p9140_p8 = pnand %p9138_p6, %p9825_p7 }
 0x18e   : > { %p9141_p2 = pneg %p9140_p8 }
 0x190   : > { %p9146_p9 = pnand %p9144_p3, %p9141_p2 }
 0x192   : > { %9149 = shalt.err (!%p9146_p9)
}
 0x193   : > { %s9150_s10 = scalar_lea.vmem %s1220_s20, 32  ;;  %p9158_p13 = scmp.lt.s32.totalorder %s1220_s20, %s1220_s20 }
 0x194   : > { %p9151_p10 = scmp.ne.s32.totalorder %s1220_s20, %s9150_s10  ;;  %p9159_p0 = scmp.lt.s32.totalorder %s9150_s10, %s9150_s10 }
 0x196   : > { %p9153_p11 = pnand %p9151_p10, %p9825_p7  ;;  %p9160_p1 = por %p9159_p0, %p9158_p13 }
 0x198   : > { %p9154_p12 = pneg %p9153_p11 }
 0x19a   : > { %p9161_p4 = pnand %p9160_p1, %p9154_p12 }
 0x19c   : > { %9164 = shalt.err (!%p9161_p4)
}
 0x19d   : > { %8531 = dma.hbm_to_vmem [thread:$0]  (!%p9813_p5), %s10976_s4, 32, %s1220_s20, [#allocation8], %s9523_s1, %s9523_s1, %s9524_s7  }
 0x19e   : > { %s9535_s22 = smov [#allocation12]   ;;  %s9536_s23 = smov [#allocation15]  }
 0x19f   : > { %s1250_s11 = sshll.u32 %s9535_s22, 4  ;;  %s1279_s26 = sshll.u32 %s9536_s23, 4  ;;  %s1251_s11 = int_to_ptr.vmem [resolvable:$true] %s1250_s11  ;;  %s1280_s26 = int_to_ptr.vmem [resolvable:$true] %s1279_s26 }
 0x1a0   : > { %s9165_s2 = scalar_lea.hbm %s10972_s9, 16 }
 0x1a1   : > { %p9166_p6 = scmp.ne.s32.totalorder %s10972_s9, %s9165_s2  ;;  %p9172_p3 = scmp.lt.u32.totalorder %s9165_s2, %s10972_s9 }
 0x1a3   : > { %p9168_p8 = pnand %p9166_p6, %p9825_p7 }
 0x1a5   : > { %p9169_p2 = pneg %p9168_p8 }
 0x1a7   : > { %p9174_p9 = pnand %p9172_p3, %p9169_p2 }
 0x1a9   : > { %9177 = shalt.err (!%p9174_p9)
}
 0x1aa   : > { %s9178_s10 = scalar_lea.vmem %s1251_s11, 16  ;;  %s9185_s20 = scalar_lea.vmem %s1251_s11, 32 }
 0x1ab   : > { %p9179_p10 = scmp.ne.s32.totalorder %s1251_s11, %s9178_s10  ;;  %p9186_p13 = scmp.lt.s32.totalorder %s1251_s11, %s1251_s11 }
 0x1ac   : > { %p9187_p0 = scmp.lt.s32.totalorder %s9185_s20, %s9178_s10 }
 0x1ad   : > { %p9181_p11 = pnand %p9179_p10, %p9825_p7 }
 0x1ae   : > { %p9188_p1 = por %p9187_p0, %p9186_p13 }
 0x1af   : > { %p9182_p12 = pneg %p9181_p11 }
 0x1b1   : > { %p9189_p4 = pnand %p9188_p1, %p9182_p12 }
 0x1b3   : > { %9192 = shalt.err (!%p9189_p4)
}
 0x1b4   : > { %s10982_s22 = sld [smem:[#allocation70_spill]] }
 0x1b5   : > { %8537 = dma.hbm_to_vmem [thread:$0]  (!%p9813_p5), %s10972_s9, 16, %s1251_s11, [#allocation11]  }
 0x1ba   : > { %s9193_s23 = scalar_lea.hbm %s10982_s22, 32 }
 0x1bb   : > { %p9194_p6 = scmp.ne.s32.totalorder %s10982_s22, %s9193_s23  ;;  %p9200_p3 = scmp.lt.u32.totalorder %s9193_s23, %s10982_s22 }
 0x1bd   : > { %p9196_p8 = pnand %p9194_p6, %p9825_p7 }
 0x1bf   : > { %p9197_p2 = pneg %p9196_p8 }
 0x1c1   : > { %p9202_p9 = pnand %p9200_p3, %p9197_p2 }
 0x1c3   : > { %9205 = shalt.err (!%p9202_p9)
}
 0x1c4   : > { %s9206_s2 = scalar_lea.vmem %s1280_s26, 32  ;;  %p9214_p13 = scmp.lt.s32.totalorder %s1280_s26, %s1280_s26 }
 0x1c5   : > { %p9207_p10 = scmp.ne.s32.totalorder %s1280_s26, %s9206_s2  ;;  %p9215_p0 = scmp.lt.s32.totalorder %s9206_s2, %s9206_s2 }
 0x1c7   : > { %p9209_p11 = pnand %p9207_p10, %p9825_p7  ;;  %p9216_p1 = por %p9215_p0, %p9214_p13 }
 0x1c9   : > { %p9210_p12 = pneg %p9209_p11 }
 0x1cb   : > { %p9217_p4 = pnand %p9216_p1, %p9210_p12 }
 0x1cd   : > { %9220 = shalt.err (!%p9217_p4)
}
 0x1ce   : > { %s10983_s11 = sld [smem:[#allocation72_spill]]  ;;  %s9537_s10 = smov [#allocation18]  }
 0x1cf   : > { %8543 = dma.hbm_to_vmem [thread:$0]  (!%p9813_p5), %s10982_s22, 32, %s1280_s26, [#allocation14], %s9523_s1, %s9523_s1, %s9524_s7  }
 0x1d0   : > { %s1305_s20 = sshll.u32 %s9537_s10, 4  ;;  %s9538_s23 = smov [#allocation21]   ;;  %s1306_s20 = int_to_ptr.vmem [resolvable:$true] %s1305_s20 }
 0x1d1   : > { %s1337_s3 = sshll.u32 %s9538_s23, 4  ;;  %s1338_s3 = int_to_ptr.vmem [resolvable:$true] %s1337_s3 }
 0x1d4   : > { %s9221_s2 = scalar_lea.hbm %s10983_s11, 32 }
 0x1d5   : > { %p9222_p6 = scmp.ne.s32.totalorder %s10983_s11, %s9221_s2  ;;  %p9228_p3 = scmp.lt.u32.totalorder %s9221_s2, %s10983_s11 }
 0x1d7   : > { %p9224_p8 = pnand %p9222_p6, %p9825_p7 }
 0x1d9   : > { %p9225_p2 = pneg %p9224_p8 }
 0x1db   : > { %p9230_p9 = pnand %p9228_p3, %p9225_p2 }
 0x1dd   : > { %9233 = shalt.err (!%p9230_p9)
}
 0x1de   : > { %s9234_s4 = scalar_lea.vmem %s1306_s20, 32  ;;  %p9242_p13 = scmp.lt.s32.totalorder %s1306_s20, %s1306_s20 }
 0x1df   : > { %p9235_p10 = scmp.ne.s32.totalorder %s1306_s20, %s9234_s4  ;;  %p9243_p0 = scmp.lt.s32.totalorder %s9234_s4, %s9234_s4 }
 0x1e1   : > { %p9237_p11 = pnand %p9235_p10, %p9825_p7  ;;  %p9244_p1 = por %p9243_p0, %p9242_p13 }
 0x1e3   : > { %p9238_p12 = pneg %p9237_p11 }
 0x1e5   : > { %p9245_p4 = pnand %p9244_p1, %p9238_p12 }
 0x1e7   : > { %9248 = shalt.err (!%p9245_p4)
}
 0x1e8   : > { %s10984_s26 = sld [smem:[#allocation75_spill]] }
 0x1e9   : > { %8549 = dma.hbm_to_vmem [thread:$0]  (!%p9813_p5), %s10983_s11, 32, %s1306_s20, [#allocation17], %s9523_s1, %s9523_s1, %s9524_s7  }
 0x1ee   : > { %s9249_s10 = scalar_lea.hbm %s10984_s26, 32 }
 0x1ef   : > { %p9250_p6 = scmp.ne.s32.totalorder %s10984_s26, %s9249_s10  ;;  %p9256_p3 = scmp.lt.u32.totalorder %s9249_s10, %s10984_s26 }
 0x1f1   : > { %p9252_p8 = pnand %p9250_p6, %p9825_p7 }
 0x1f3   : > { %p9253_p2 = pneg %p9252_p8 }
 0x1f5   : > { %p9258_p9 = pnand %p9256_p3, %p9253_p2 }
 0x1f7   : > { %9261 = shalt.err (!%p9258_p9)
}
 0x1f8   : > { %s9262_s4 = scalar_lea.vmem %s1338_s3, 32  ;;  %p9270_p13 = scmp.lt.s32.totalorder %s1338_s3, %s1338_s3 }
 0x1f9   : > { %p9263_p10 = scmp.ne.s32.totalorder %s1338_s3, %s9262_s4  ;;  %p9271_p0 = scmp.lt.s32.totalorder %s9262_s4, %s9262_s4 }
 0x1fb   : > { %p9265_p11 = pnand %p9263_p10, %p9825_p7  ;;  %p9272_p1 = por %p9271_p0, %p9270_p13 }
 0x1fd   : > { %p9266_p12 = pneg %p9265_p11 }
 0x1ff   : > { %p9273_p4 = pnand %p9272_p1, %p9266_p12 }
 0x201   : > { %9276 = shalt.err (!%p9273_p4)
}
 0x202   : > { %s10985_s20 = sld [smem:[#allocation77_spill]]  ;;  %s9539_s23 = smov [#allocation24]  }
 0x203   : > { %8555 = dma.hbm_to_vmem [thread:$0]  (!%p9813_p5), %s10984_s26, 32, %s1338_s3, [#allocation20], %s9523_s1, %s9523_s1, %s9524_s7  }
 0x204   : > { %s1366_s2 = sshll.u32 %s9539_s23, 4  ;;  %s9540_s10 = smov [#allocation27]   ;;  %s1367_s2 = int_to_ptr.vmem [resolvable:$true] %s1366_s2 }
 0x205   : > { %s1395_s5 = sshll.u32 %s9540_s10, 4  ;;  %s1396_s5 = int_to_ptr.vmem [resolvable:$true] %s1395_s5 }
 0x208   : > { %s9277_s4 = scalar_lea.hbm %s10985_s20, 32 }
 0x209   : > { %p9278_p6 = scmp.ne.s32.totalorder %s10985_s20, %s9277_s4  ;;  %p9284_p3 = scmp.lt.u32.totalorder %s9277_s4, %s10985_s20 }
 0x20b   : > { %p9280_p8 = pnand %p9278_p6, %p9825_p7 }
 0x20d   : > { %p9281_p2 = pneg %p9280_p8 }
 0x20f   : > { %p9286_p9 = pnand %p9284_p3, %p9281_p2 }
 0x211   : > { %9289 = shalt.err (!%p9286_p9)
}
 0x212   : > { %s9290_s6 = scalar_lea.vmem %s1367_s2, 32  ;;  %p9298_p13 = scmp.lt.s32.totalorder %s1367_s2, %s1367_s2 }
 0x213   : > { %p9291_p10 = scmp.ne.s32.totalorder %s1367_s2, %s9290_s6  ;;  %p9299_p0 = scmp.lt.s32.totalorder %s9290_s6, %s9290_s6 }
 0x215   : > { %p9293_p11 = pnand %p9291_p10, %p9825_p7  ;;  %p9300_p1 = por %p9299_p0, %p9298_p13 }
 0x217   : > { %p9294_p12 = pneg %p9293_p11 }
 0x219   : > { %p9301_p4 = pnand %p9300_p1, %p9294_p12 }
 0x21b   : > { %9304 = shalt.err (!%p9301_p4)
}
 0x21c   : > { %s10986_s3 = sld [smem:[#allocation80_spill]] }
 0x21d   : > { %8561 = dma.hbm_to_vmem [thread:$0]  (!%p9813_p5), %s10985_s20, 32, %s1367_s2, [#allocation23], %s9523_s1, %s9523_s1, %s9524_s7  }
 0x222   : > { %s9305_s23 = scalar_lea.hbm %s10986_s3, 32 }
 0x223   : > { %p9306_p6 = scmp.ne.s32.totalorder %s10986_s3, %s9305_s23  ;;  %p9312_p3 = scmp.lt.u32.totalorder %s9305_s23, %s10986_s3 }
 0x225   : > { %p9308_p8 = pnand %p9306_p6, %p9825_p7 }
 0x227   : > { %p9309_p2 = pneg %p9308_p8 }
 0x229   : > { %p9314_p9 = pnand %p9312_p3, %p9309_p2 }
 0x22b   : > { %9317 = shalt.err (!%p9314_p9)
}
 0x22c   : > { %s9318_s6 = scalar_lea.vmem %s1396_s5, 32  ;;  %p9326_p13 = scmp.lt.s32.totalorder %s1396_s5, %s1396_s5 }
 0x22d   : > { %p9319_p10 = scmp.ne.s32.totalorder %s1396_s5, %s9318_s6  ;;  %p9327_p0 = scmp.lt.s32.totalorder %s9318_s6, %s9318_s6 }
 0x22f   : > { %p9321_p11 = pnand %p9319_p10, %p9825_p7  ;;  %p9328_p1 = por %p9327_p0, %p9326_p13 }
 0x231   : > { %p9322_p12 = pneg %p9321_p11 }
 0x233   : > { %p9329_p4 = pnand %p9328_p1, %p9322_p12 }
 0x235   : > { %9332 = shalt.err (!%p9329_p4)
}
 0x236   : > { %s10987_s2 = sld [smem:[#allocation82_spill]]  ;;  %s9541_s10 = smov [#allocation30]  }
 0x237   : > { %8567 = dma.hbm_to_vmem [thread:$0]  (!%p9813_p5), %s10986_s3, 32, %s1396_s5, [#allocation26], %s9523_s1, %s9523_s1, %s9524_s7  }
 0x238   : > { %s1424_s4 = sshll.u32 %s9541_s10, 4  ;;  %s9542_s23 = smov [#allocation33]   ;;  %s1425_s4 = int_to_ptr.vmem [resolvable:$true] %s1424_s4 }
 0x239   : > { %s1451_s8 = sshll.u32 %s9542_s23, 4  ;;  %s1452_s8 = int_to_ptr.vmem [resolvable:$true] %s1451_s8 }
 0x23c   : > { %s9333_s6 = scalar_lea.hbm %s10987_s2, 32 }
 0x23d   : > { %p9334_p6 = scmp.ne.s32.totalorder %s10987_s2, %s9333_s6  ;;  %p9340_p3 = scmp.lt.u32.totalorder %s9333_s6, %s10987_s2 }
 0x23f   : > { %p9336_p8 = pnand %p9334_p6, %p9825_p7 }
 0x241   : > { %p9337_p2 = pneg %p9336_p8 }
 0x243   : > { %p9342_p9 = pnand %p9340_p3, %p9337_p2 }
 0x245   : > { %9345 = shalt.err (!%p9342_p9)
}
 0x246   : > { %s9346_s9 = scalar_lea.vmem %s1425_s4, 32  ;;  %p9354_p13 = scmp.lt.s32.totalorder %s1425_s4, %s1425_s4 }
 0x247   : > { %p9347_p10 = scmp.ne.s32.totalorder %s1425_s4, %s9346_s9  ;;  %p9355_p0 = scmp.lt.s32.totalorder %s9346_s9, %s9346_s9 }
 0x249   : > { %p9349_p11 = pnand %p9347_p10, %p9825_p7  ;;  %p9356_p1 = por %p9355_p0, %p9354_p13 }
 0x24b   : > { %p9350_p12 = pneg %p9349_p11 }
 0x24d   : > { %p9357_p4 = pnand %p9356_p1, %p9350_p12 }
 0x24f   : > { %9360 = shalt.err (!%p9357_p4)
}
 0x250   : > { %s10988_s5 = sld [smem:[#allocation84_spill]] }
 0x251   : > { %8573 = dma.hbm_to_vmem [thread:$0]  (!%p9813_p5), %s10987_s2, 32, %s1425_s4, [#allocation29], %s9523_s1, %s9523_s1, %s9524_s7  }
 0x256   : > { %s9361_s10 = scalar_lea.hbm %s10988_s5, 16 }
 0x257   : > { %p9362_p6 = scmp.ne.s32.totalorder %s10988_s5, %s9361_s10  ;;  %p9368_p3 = scmp.lt.u32.totalorder %s9361_s10, %s10988_s5 }
 0x259   : > { %p9364_p8 = pnand %p9362_p6, %p9825_p7 }
 0x25b   : > { %p9365_p2 = pneg %p9364_p8 }
 0x25d   : > { %p9370_p9 = pnand %p9368_p3, %p9365_p2 }
 0x25f   : > { %9373 = shalt.err (!%p9370_p9)
}
 0x260   : > { %s9374_s9 = scalar_lea.vmem %s1452_s8, 16  ;;  %s9381_s23 = scalar_lea.vmem %s1452_s8, 32 }
 0x261   : > { %p9375_p10 = scmp.ne.s32.totalorder %s1452_s8, %s9374_s9  ;;  %p9382_p13 = scmp.lt.s32.totalorder %s1452_s8, %s1452_s8 }
 0x262   : > { %p9383_p0 = scmp.lt.s32.totalorder %s9381_s23, %s9374_s9 }
 0x263   : > { %p9377_p11 = pnand %p9375_p10, %p9825_p7 }
 0x264   : > { %p9384_p1 = por %p9383_p0, %p9382_p13 }
 0x265   : > { %p9378_p12 = pneg %p9377_p11 }
 0x267   : > { %p9385_p4 = pnand %p9384_p1, %p9378_p12 }
 0x269   : > { %9388 = shalt.err (!%p9385_p4)
}
 0x26a   : > { %8579 = dma.hbm_to_vmem [thread:$0]  (!%p9813_p5), %s10988_s5, 16, %s1452_s8, [#allocation32]  }
 0x26b   : > { %s9543_s1 = smov [#allocation36]   ;;  %s9389_s4 = scalar_lea.hbm %s9783_s12, 16 }
 0x26c   : > { %s1476_s7 = sshll.u32 %s9543_s1, 4  ;;  %p9390_p6 = scmp.ne.s32.totalorder %s9783_s12, %s9389_s4  ;;  %s1477_s7 = int_to_ptr.vmem [resolvable:$true] %s1476_s7 }
 0x26d   : > { %p9396_p3 = scmp.lt.u32.totalorder %s9389_s4, %s9783_s12 }
 0x26e   : > { %p9392_p8 = pnand %p9390_p6, %p9825_p7 }
 0x270   : > { %p9393_p2 = pneg %p9392_p8 }
 0x272   : > { %p9398_p9 = pnand %p9396_p3, %p9393_p2 }
 0x274   : > { %9401 = shalt.err (!%p9398_p9)
}
 0x275   : > { %s9402_s6 = scalar_lea.vmem %s1477_s7, 16  ;;  %s9409_s10 = scalar_lea.vmem %s1477_s7, 32 }
 0x276   : > { %p9403_p10 = scmp.ne.s32.totalorder %s1477_s7, %s9402_s6  ;;  %p9410_p13 = scmp.lt.s32.totalorder %s1477_s7, %s1477_s7 }
 0x277   : > { %p9411_p0 = scmp.lt.s32.totalorder %s9409_s10, %s9402_s6 }
 0x278   : > { %p9405_p11 = pnand %p9403_p10, %p9825_p7 }
 0x279   : > { %p9412_p1 = por %p9411_p0, %p9410_p13 }
 0x27a   : > { %p9406_p12 = pneg %p9405_p11 }
 0x27c   : > { %p9413_p4 = pnand %p9412_p1, %p9406_p12 }
 0x27e   : > { %9416 = shalt.err (!%p9413_p4)
}
 0x27f   : > { %8585 = dma.hbm_to_vmem [thread:$0]  (!%p9813_p5), %s9783_s12, 16, %s1477_s7, [#allocation35]  }
 0x280   : > { %p10989_p6 = scmp.ne.s32.totalorder %s10979_s16, 0 }
 0x281   : > { %p10990_p8 = scmp.eq.s32.totalorder (!%p10989_p6), %s9796_s0, 0 }
 0x282   : > { %1502 = sbr.rel (%p10989_p6) target bundleno = 14223 (0x378f), region = 204 }
 0x289   : > { %9422 = dma.done.wait (%p10990_p8), [#allocation3], 32   ;;  %p10991_p2 = pmov %p10990_p8 }
 0x28b   : > { %9424 = vsyncadd (%p10991_p2), [#allocation3], 4294967264  ;;  %p10992_p7 = pmov %p10991_p2 }
 0x28c   : > { %p10993_p3 = pmov %p10991_p2 }
 0x28d   : > { %9426 = dma.done.wait (%p10992_p7), [#allocation5], 64  }
 0x28e   : > { %9428 = vsyncadd (%p10993_p3), [#allocation5], 4294967232  ;;  %p10994_p9 = pmov %p10991_p2 }
 0x28f   : > { %p10995_p5 = pmov %p10991_p2 }
 0x290   : > { %9430 = dma.done.wait (%p10994_p9), [#allocation8], 64  }
 0x291   : > { %9432 = vsyncadd (%p10995_p5), [#allocation8], 4294967232  ;;  %p10996_p10 = pmov %p10991_p2 }
 0x292   : > { %p10997_p11 = pmov %p10991_p2 }
 0x293   : > { %9434 = dma.done.wait (%p10996_p10), [#allocation11], 32  }
 0x294   : > { %9436 = vsyncadd (%p10997_p11), [#allocation11], 4294967264  ;;  %p10998_p12 = pmov %p10991_p2 }
 0x295   : > { %p10999_p13 = pmov %p10991_p2 }
 0x296   : > { %9438 = dma.done.wait (%p10998_p12), [#allocation14], 64  }
 0x297   : > { %9440 = vsyncadd (%p10999_p13), [#allocation14], 4294967232  ;;  %p11000_p0 = pmov %p10991_p2 }
 0x299   : > { %9442 = dma.done.wait (%p11000_p0), [#allocation17], 64   ;;  %p11001_p1 = pmov %p11000_p0 }
 0x29a   : > { %p11002_p4 = pmov %p11000_p0 }
 0x29b   : > { %9444 = vsyncadd (%p11001_p1), [#allocation17], 4294967232 }
 0x29c   : > { %9446 = dma.done.wait (%p11002_p4), [#allocation20], 64   ;;  %p11003_p6 = pmov %p11000_p0 }
 0x29d   : > { %p11004_p8 = pmov %p11000_p0 }
 0x29e   : > { %9448 = vsyncadd (%p11003_p6), [#allocation20], 4294967232 }
 0x29f   : > { %9450 = dma.done.wait (%p11004_p8), [#allocation23], 64   ;;  %p11005_p2 = pmov %p11000_p0 }
 0x2a0   : > { %p11006_p7 = pmov %p11000_p0 }
 0x2a1   : > { %9452 = vsyncadd (%p11005_p2), [#allocation23], 4294967232 }
 0x2a2   : > { %9454 = dma.done.wait (%p11006_p7), [#allocation26], 64   ;;  %p11007_p3 = pmov %p11000_p0 }
 0x2a3   : > { %p11008_p9 = pmov %p11000_p0 }
 0x2a4   : > { %9456 = vsyncadd (%p11007_p3), [#allocation26], 4294967232 }
 0x2a5   : > { %9458 = dma.done.wait (%p11008_p9), [#allocation29], 64   ;;  %p11009_p5 = pmov %p11000_p0 }
 0x2a6   : > { %p11010_p10 = pmov %p11000_p0 }
 0x2a7   : > { %9460 = vsyncadd (%p11009_p5), [#allocation29], 4294967232 }
 0x2a8   : > { %9462 = dma.done.wait (%p11010_p10), [#allocation32], 48   ;;  %p11011_p11 = pmov %p11000_p0 }
 0x2a9   : > { %p11012_p12 = pmov %p11000_p0 }
 0x2aa   : > { %9464 = vsyncadd (%p11011_p11), [#allocation32], 4294967248 }
 0x2ab   : > { %9466 = dma.done.wait (%p11012_p12), [#allocation35], 32   ;;  %p11013_p13 = pmov %p11000_p0 }
 0x2ac   : > { %s11014_s8 = sld [smem:[#allocation57_spill]]  ;;  %v9544_v0 = vmov 0.0|0.0   ;;  %vm9545_vm0 = vmmov 0   ;;  %v9546_v1 = vmov 0.0   ;;  %p1701_p0 = scmp.lt.s32.totalorder %s9796_s0, 1  ;;  %vm1759_vm1 = vcmask 261120  }
 0x2ad   : > { %9468 = vsyncadd (%p11013_p13), [#allocation35], 4294967264  ;;  %s11015_s16 = sld [smem:[#allocation49_spill]]  ;;  %8138 = vmatprep.subr.bf16.mxu0 %v9544_v0  ;;  %7567 = vmatprep.mubr.msk.f32.mxu0 %vm9545_vm0, %v9546_v1  ;;  %s11016_s28 = sld [smem:[#allocation51_spill]]  ;;  %vm1836_vm2 = vcmask 64512   ;;  %vm2479_vm4 = vcmask 523264  }
 0x2ae   : > { %s11044_s0 = smov (!%p1701_p0, %s9796_s0), 1  ;;  %s11017_s18 = sld [smem:[#allocation58_spill]]  ;;  %vm10246_vm3 = vmpackc.low %vm1759_vm1, %vm1759_vm1  ;;  %vm3542_vm5 = vcmask 56320   ;;  %vm3555_vm6 = vcmask 1046528   ;;  %vm3825_vm7 = vcmask 227328   ;;  %vm3836_vm8 = vcmask 1043456  }
 0x2af   : > { %s10920_s23 = smov 64   ;;  %s10922_s1 = smov 96   ;;  %vm9549_vm9 = vmmov 1   ;;  %vm3832_vm11 = vcmask 228352   ;;  %vm4070_vm12 = vcmask 260096  }
 0x2b0   : > { %s11018_s7 = sld [smem:[#allocation52_spill]]  ;;  %s11021_s4 = sld [smem:[#allocation53_spill]]  ;;  %vm10510_vm10 = vmpackc.low %vm3836_vm8, %vm9549_vm9 }
 0x2b1   : > { %s11022_s6 = sld [smem:[#allocation59_spill]]  ;;  %s11023_s10 = sld [smem:[#allocation61_spill]] }
 0x2b2   : > { %v1743_v2 = vld [vmem:[%s11014_s8] sm:$0xff]  ;;  %v1744_v3 = vld [vmem:[%s11014_s8 + $0x8] sm:$0xff]  ;;  %v1745_v4 = vld [vmem:[%s11014_s8 + $0x10] sm:$0xff]  ;;  %s11028_s2 = sld [smem:[#allocation68_spill]]  ;;  %s11029_s3 = sld [smem:[#allocation50_spill]] }
 0x2b3   : > { %v8139_v5 = vpack.c.bf16 %v1744_v3, %v1743_v2  ;;  %v1746_v6 = vld [vmem:[%s11014_s8 + $0x18] sm:$0xff]  ;;  %s1703_s9 = scalar_lea.vmem %s11015_s16, %s11044_s0  ;;  %v10200_v9 = vld [vmem:[%s11016_s28] sm:$0xff]  ;;  %v10208_v15 = vld [vmem:[%s11016_s28 + $0x8] sm:$0xff]  ;;  %s11024_s16 = sld [smem:[#allocation63_spill]] }
 0x2b4   : > { %v8142_v7 = vpack.c.bf16 %v1746_v6, %v1745_v4  ;;  %v10192_v8 = vld [vmem:[%s1703_s9] ss:$0 sm:$0xff]  ;;  %7572 = vmatprep.mubr.msk.f32.mxu1 %vm1836_vm2, %v10200_v9  ;;  %v10211_v16 = vld [vmem:[%s11016_s28 + $0x10] sm:$0xff]  ;;  %v10218_v18 = vld [vmem:[%s11016_s28 + $0x18] sm:$0xff]  ;;  %s11025_s9 = sld [smem:[#allocation65_spill]]  ;;  %s10929_s5 = sshll.u32 %s11044_s0, 3 }
 0x2b5   : > { %8140 = vmatpush3.bf16.msra.mxu0 %v8139_v5  ;;  %v7053_v10 = vld [vmem:[%s11017_s18] ss:$0 sm:$0xff] }
 0x2b6   : > { %8141 = vmatprep.subr.bf16.mxu0 %v9544_v0  ;;  %v10234_v19 = vld [vmem:[%s11018_s7 + $0x8] sm:$0xff]  ;;  %v10237_v20 = vld [vmem:[%s11018_s7] sm:$0xff]  ;;  %v10242_v25 = vld [vmem:[%s11018_s7 + $0x18] sm:$0xff] }
 0x2b7   : > { %v10251_v27 = vld [vmem:[%s11018_s7 + $0x10] sm:$0xff]  ;;  %v1720_v38 = vld [vmem:[%s11021_s4] sm:$0xff]  ;;  %v1721_v39 = vld [vmem:[%s11021_s4 + $0x8] sm:$0xff] }
 0x2b8   : > { %v1722_v40 = vld [vmem:[%s11021_s4 + $0x10] sm:$0xff]  ;;  %v10268_v41 = vpack.c.bf16 %v1721_v39, %v1720_v38  ;;  %v1723_v42 = vld [vmem:[%s11021_s4 + $0x18] sm:$0xff]  ;;  %v1748_v58 = vld [vmem:[%s11022_s6] sm:$0xff]  ;;  %s11030_s4 = sld [smem:[#allocation54_spill]] }
 0x2b9   : > { %8143 = vmatpush3.bf16.msra.mxu0 %v8142_v7  ;;  %v10272_v43 = vpack.c.bf16 %v1723_v42, %v1722_v40  ;;  %v1749_v59 = vld [vmem:[%s11022_s6 + $0x8] sm:$0xff]  ;;  %v1750_v60 = vld [vmem:[%s11022_s6 + $0x10] sm:$0xff]  ;;  %v1751_v62 = vld [vmem:[%s11022_s6 + $0x18] sm:$0xff] }
 0x2ba   : > { %8144 = vmatprep.subr.bf16.mxu0 %v9544_v0  ;;  %v8165_v61 = vpack.c.bf16 %v1749_v59, %v1748_v58  ;;  %v8168_v63 = vpack.c.bf16 %v1751_v62, %v1750_v60  ;;  %v2387_v38 = vld [vmem:[%s11024_s16 + $0x18] sm:$0xff]  ;;  %v2388_v40 = vld [vmem:[%s11024_s16 + $0x20] sm:$0xff]  ;;  %v2389_v42 = vld [vmem:[%s11024_s16 + $0x28] sm:$0xff] }
 0x2bb   : > { %v7076_v62 = vld [vmem:[#allocation9] ss:$0 sm:$0xff] }
 0x2bc   : > { %7568 = vmatmul.mubr.msk.f32.vlgmr.msra.gmra.mrb[0].mxu0 %vm1759_vm1, %v10192_v8 }
 0x2bd   : > { %7594 = vmatprep.mubr.msk.f32.mxu0 %vm9545_vm0, %v9546_v1 }
 0x38f   : > { %v1828_v11 = vpop.f32.mrb[0].mxu0 }
 0x390   : > { %v1829_v12 = vadd.f32 %v7053_v10, %v1828_v11  ;;  %v7569_v13 = vpop.f32.mrb[1].mxu0  ;;  %v7070_v10 = vld [vmem:[#allocation2] ss:$0 sm:$0xff] }
 0x392   : > { %1938 = vrot.lane.b32.xlu1 %v1829_v12, %s10920_s23  ;;  %1833 = vrot.lane.b32.xlu0 %v1829_v12, %s10922_s1  ;;  %s11026_s23 = sld [smem:[#allocation66_spill]] }
 0x404   : > { %v1834_v14 = vpop.permute.xlu0 %1833  ;;  %v1939_v17 = vpop.permute.xlu1 %1938 }
 0x405   : > { %7570 = vmatprep.subr.mxu1 %v1834_v14 }
 0x406   : > { %7571 = vmatpush3.msra.mxu1 %v1834_v14 }
 0x407   : > { %7573 = vmatmul.mubr.msk.f32.vlgmr.msra.gmra.mrb[0].mxu1 %vm1836_vm2, %v10208_v15  ;;  %7578 = vmatprep.subr.mxu1 %v1939_v17 }
 0x408   : > { %7579 = vmatpush3.msra.mxu1 %v1939_v17  ;;  %7575 = vmatprep.mubr.msk.f32.mxu1 %vm1836_vm2, %v10211_v16 }
 0x409   : > { %8152 = vmatprep.subr.bf16.mxu1 %v9544_v0 }
 0x40b   : > { %7576 = vmatmul.mubr.msk.f32.gmra.mrb[2].mxu1 %vm1836_vm2, %v10218_v18 }
 0x40c   : > { %7580 = vmatprep.mubr.msk.f32.mxu1 %vm1836_vm2, %v10200_v9 }
 0x40f   : > { %7581 = vmatmul.mubr.msk.f32.vlgmr.msra.gmra.mrb[4].mxu1 %vm1836_vm2, %v10208_v15 }
 0x410   : > { %7583 = vmatprep.mubr.msk.f32.mxu1 %vm1836_vm2, %v10211_v16  ;;  %8154 = vmatpush3.bf16.msra.mxu1 %v10268_v41 }
 0x411   : > { %8155 = vmatprep.subr.bf16.mxu1 %v9544_v0 }
 0x413   : > { %7584 = vmatmul.mubr.msk.f32.gmra.mrb[6].mxu1 %vm1836_vm2, %v10218_v18 }
 0x414   : > { %7605 = vmatprep.mubr.msk.f32.mxu1 %vm9545_vm0, %v9546_v1  ;;  %8157 = vmatpush3.bf16.msra.mxu1 %v10272_v43 }
 0x415   : > { %8158 = vmatprep.subr.bf16.mxu1 %v9544_v0 }
 0x4da   : > { %v7574_v21 = vpop.f32.mrb[0].mxu1 }
 0x4db   : > { %v1935_v22 = vmul.f32 %v7574_v21, %v10234_v19  ;;  %v1915_v23 = vpop.f32.mrb[1].mxu1 }
 0x4dc   : > { %v1934_v24 = vmul.f32 %v1915_v23, %v10237_v20 }
 0x4de   : > { %v8145_v28 = vpack.c.bf16 %v1935_v22, %v1934_v24  ;;  %v7577_v29 = vpop.f32.mrb[2].mxu1 }
 0x4df   : > { %v1937_v30 = vmul.f32 %v7577_v29, %v10242_v25  ;;  %v1925_v31 = vpop.f32.mrb[3].mxu1  ;;  %v2379_v29 = vld [vmem:[%s11023_s10] sm:$0xff] }
 0x4e0   : > { %8147 = vmatpush3.bf16.xpose.msk.msra.mxu0 %vm10246_vm3, %v8145_v28  ;;  %v1936_v32 = vmul.f32 %v1925_v31, %v10251_v27 }
 0x4e1   : > { %8148 = vmatprep.subr.bf16.mxu0 %v9544_v0 }
 0x4e2   : > { %v8149_v33 = vpack.c.bf16 %v1937_v30, %v1936_v32  ;;  %v7582_v44 = vpop.f32.mrb[4].mxu1  ;;  %v2380_v30 = vld [vmem:[%s11023_s10 + $0x8] sm:$0xff]  ;;  %v2382_v32 = vld [vmem:[%s11023_s10 + $0x18] sm:$0xff] }
 0x4e3   : > { %v2027_v45 = vmul.f32 %v7582_v44, %v10234_v19  ;;  %v2007_v46 = vpop.f32.mrb[5].mxu1  ;;  %v8171_v31 = vpack.c.bf16 %v2380_v30, %v2379_v29  ;;  %v8183_v44 = vpack.c.bf16 %v2389_v42, %v2388_v40 }
 0x4e4   : > { %v2026_v47 = vmul.f32 %v2007_v46, %v10237_v20 }
 0x4e6   : > { %v7585_v48 = vpop.f32.mrb[6].mxu1  ;;  %v8159_v51 = vpack.c.bf16 %v2027_v45, %v2026_v47 }
 0x4e7   : > { %v2029_v49 = vmul.f32 %v7585_v48, %v10242_v25  ;;  %v2017_v50 = vpop.f32.mrb[7].mxu1 }
 0x4e8   : > { %8151 = vmatpush3.bf16.xpose.msk.msra.mxu0 %vm10246_vm3, %v8149_v33  ;;  %v2028_v52 = vmul.f32 %v2017_v50, %v10251_v27 }
 0x4e9   : > { %8164 = vmatprep.subr.bf16.mxu0 %v9544_v0 }
 0x4ea   : > { %v8162_v53 = vpack.c.bf16 %v2029_v49, %v2028_v52  ;;  %v7072_v49 = vld [vmem:[#allocation4] ss:$0 sm:$0xff] }
 0x4ef   : > { %7595 = vmatmul.mubr.msk.f32.vlgmr.msra.gmra.mrb[2].mxu0 %vm1759_vm1, %v1829_v12 }
 0x4f0   : > { %7627 = vmatprep.mubr.msk.f32.mxu0 %vm9545_vm0, %v9546_v1  ;;  %8166 = vmatpush3.bf16.msra.mxu0 %v8165_v61 }
 0x4f1   : > { %8167 = vmatprep.subr.bf16.mxu0 %v9544_v0 }
 0x4f4   : > { %8169 = vmatpush3.bf16.msra.mxu0 %v8168_v63 }
 0x4f5   : > { %8176 = vmatprep.subr.bf16.mxu0 %v9544_v0 }
 0x5c2   : > { %v2110_v34 = vpop.f32.mrb[2].mxu0 }
 0x5c3   : > { %v2114_v35 = vmul.f32 0.35355338, %v2110_v34  ;;  %v7596_v36 = vpop.f32.mrb[3].mxu0  ;;  %v2384_v34 = vld [vmem:[%s11024_s16] sm:$0xff] }
 0x5c4   : > { %v2386_v36 = vld [vmem:[%s11024_s16 + $0x10] sm:$0xff] }
 0x5c5   : > { %v2115_v37 = vsel %vm1759_vm1, %v2114_v35, -inf  ;;  %v8180_v39 = vpack.c.bf16 %v2387_v38, %v2386_v36 }
 0x5c6   : > { %2116 = vmax.xlane.f32.xlu0 %v2115_v37 }
 0x653   : > { %v2117_v54 = vpop.xlane.xlu0 %2116 }
 0x654   : > { %v2118_v55 = vsub.f32 %v2114_v35, %v2117_v54  ;;  %v2385_v35 = vld [vmem:[%s11024_s16 + $0x8] sm:$0xff]  ;;  %v2390_v54 = vld [vmem:[%s11024_s16 + $0x30] sm:$0xff] }
 0x655   : > { %v8177_v37 = vpack.c.bf16 %v2385_v35, %v2384_v34  ;;  %v7089_v35 = vld [vmem:[%s11017_s18 + $0x1] ss:$0 sm:$0xff] }
 0x656   : > { %v2119_v56 = vmul.f32 1.442695, %v2118_v55  ;;  %v2391_v55 = vld [vmem:[%s11024_s16 + $0x38] sm:$0xff] }
 0x658   : > { %8717 = vpow2.f32 %v2119_v56  ;;  %v8186_v56 = vpack.c.bf16 %v2391_v55, %v2390_v54 }
 0x662   : > { %v8718_v57 = vpop.eup %8717 }
 0x663   : > { %7606 = vmatmul.mubr.msk.f32.vlgmr.msra.gmra.mrb[8].mxu1 %vm1759_vm1, %v8718_v57 }
 0x664   : > { %8160 = vmatpush3.bf16.msra.mxu1 %v8159_v51  ;;  %7616 = vmatprep.mubr.msk.f32.mxu1 %vm9545_vm0, %v9546_v1  ;;  %v7073_v51 = vld [vmem:[#allocation6] ss:$0 sm:$0xff] }
 0x665   : > { %8161 = vmatprep.subr.bf16.mxu1 %v9544_v0 }
 0x668   : > { %8163 = vmatpush3.bf16.msra.mxu1 %v8162_v53 }
 0x669   : > { %8170 = vmatprep.subr.bf16.mxu1 %v9544_v0 }
 0x736   : > { %v2190_v2 = vpop.f32.mrb[8].mxu1 }
 0x737   : > { %8719 = vrcp.f32 %v2190_v2  ;;  %v7607_v3 = vpop.f32.mrb[9].mxu1 }
 0x741   : > { %v8720_v4 = vpop.eup %8719 }
 0x742   : > { %v2195_v5 = vmul.f32 %v8720_v4, %v8718_v57  ;;  %v7074_v57 = vld [vmem:[#allocation7] ss:$0 sm:$0xff] }
 0x744   : > { %7617 = vmatmul.mubr.msk.f32.vlgmr.msra.gmra.mrb[10].mxu1 %vm1759_vm1, %v2195_v5 }
 0x745   : > { %7638 = vmatprep.mubr.msk.f32.mxu1 %vm9545_vm0, %v9546_v1  ;;  %8172 = vmatpush3.bf16.msra.mxu1 %v8171_v31  ;;  %v7078_v31 = vld [vmem:[%s11025_s9] ss:$0 sm:$0xff] }
 0x746   : > { %8173 = vmatprep.subr.bf16.mxu1 %v9544_v0 }
 0x817   : > { %v2265_v6 = vpop.f32.mrb[10].mxu1 }
 0x818   : > { %v7618_v7 = vpop.f32.mrb[11].mxu1  ;;  %7628 = vmatmul.mubr.msk.f32.vlgmr.msra.gmra.mrb[4].mxu0 %vm1759_vm1, %v2265_v6 }
 0x819   : > { %7657 = vmatprep.mubr.msk.f32.mxu0 %vm9545_vm0, %v9546_v1  ;;  %8178 = vmatpush3.bf16.msra.mxu0 %v8177_v37 }
 0x81a   : > { %8179 = vmatprep.subr.bf16.mxu0 %v9544_v0 }
 0x81d   : > { %8181 = vmatpush3.bf16.msra.mxu0 %v8180_v39 }
 0x81e   : > { %8182 = vmatprep.subr.bf16.mxu0 %v9544_v0 }
 0x821   : > { %8184 = vmatpush3.bf16.msra.mxu0 %v8183_v44 }
 0x822   : > { %8185 = vmatprep.subr.bf16.mxu0 %v9544_v0 }
 0x825   : > { %8187 = vmatpush3.bf16.msra.mxu0 %v8186_v56 }
 0x8eb   : > { %v2344_v11 = vpop.f32.mrb[4].mxu0 }
 0x8ec   : > { %v2345_v12 = vadd.f32 %v7070_v10, %v2344_v11  ;;  %v7629_v13 = vpop.f32.mrb[5].mxu0 }
 0x8ed   : > { %v7080_v13 = vld [vmem:[%s11014_s8 + $0x20] sm:$0xff] }
 0x8ee   : > { %v2348_v14 = vadd.f32 %v10192_v8, %v2345_v12  ;;  %v2381_v8 = vld [vmem:[%s11023_s10 + $0x10] sm:$0xff] }
 0x8ef   : > { %v8174_v33 = vpack.c.bf16 %v2382_v32, %v2381_v8  ;;  %v7079_v32 = vld [vmem:[%s11026_s23] ss:$0 sm:$0xff] }
 0x8f0   : > { %v2351_v17 = vsel %vm1759_vm1, %v2348_v14, 0.0 }
 0x8f1   : > { %2352 = vadd.xlane.f32.xlu1 %v2351_v17  ;;  %8175 = vmatpush3.bf16.msra.mxu1 %v8174_v33 }
 0x8f2   : > { %8188 = vmatprep.subr.bf16.mxu1 %v9544_v0 }
 0x97e   : > { %v2353_v21 = vpop.xlane.xlu1 %2352 }
 0x97f   : > { %v2355_v22 = vmul.f32 0.03125, %v2353_v21  ;;  %v7082_v21 = vld [vmem:[%s11014_s8 + $0x30] sm:$0xff] }
 0x981   : > { %v2356_v23 = vsub.f32 %v2348_v14, %v2355_v22  ;;  %v7081_v14 = vld [vmem:[%s11014_s8 + $0x28] sm:$0xff]  ;;  %v7083_v22 = vld [vmem:[%s11014_s8 + $0x38] sm:$0xff]  ;;  %s11040_s8 = sld [smem:[#allocation79_spill]] }
 0x982   : > { %v8189_v17 = vpack.c.bf16 %v7081_v14, %v7080_v13 }
 0x983   : > { %v2357_v24 = vmul.f32 %v2356_v23, %v2356_v23 }
 0x985   : > { %v2358_v28 = vsel %vm1759_vm1, %v2357_v24, 0.0 }
 0x986   : > { %2359 = vadd.xlane.f32.xlu0 %v2358_v28 }
 0xa13   : > { %v2360_v45 = vpop.xlane.xlu0 %2359 }
 0xa14   : > { %v2361_v46 = vmul.f32 0.03125, %v2360_v45 }
 0xa16   : > { %v2362_v47 = vadd.f32 1e-05, %v2361_v46 }
 0xa18   : > { %8721 = vrsqrt.f32 %v2362_v47 }
 0xa22   : > { %v8722_v48 = vpop.eup %8721 }
 0xa23   : > { %v2364_v50 = vmul.f32 %v8722_v48, %v2356_v23  ;;  %v8192_v23 = vpack.c.bf16 %v7083_v22, %v7082_v21 }
 0xa25   : > { %v2371_v52 = vmul.f32 %v7072_v49, %v2364_v50 }
 0xa27   : > { %v2378_v53 = vadd.f32 %v7073_v51, %v2371_v52 }
 0xa29   : > { %7639 = vmatmul.mubr.msk.f32.vlgmr.msra.gmra.mrb[12].mxu1 %vm1759_vm1, %v2378_v53 }
 0xa2a   : > { %7668 = vmatprep.mubr.msk.f32.mxu1 %vm9545_vm0, %v9546_v1  ;;  %8190 = vmatpush3.bf16.msra.mxu1 %v8189_v17 }
 0xa2b   : > { %8191 = vmatprep.subr.bf16.mxu1 %v9544_v0 }
 0xa2e   : > { %8193 = vmatpush3.bf16.msra.mxu1 %v8192_v23 }
 0xafc   : > { %v2468_v58 = vpop.f32.mrb[12].mxu1 }
 0xafd   : > { %v2469_v59 = vadd.f32 %v7074_v57, %v2468_v58  ;;  %v7640_v60 = vpop.f32.mrb[13].mxu1 }
 0xafe   : > { %v7087_v60 = vld [vmem:[%s11022_s6 + $0x30] sm:$0xff] }
 0xaff   : > { %v2472_v61 = vmax.f32 %v2469_v59, 0.0  ;;  %v7085_v59 = vld [vmem:[%s11022_s6 + $0x20] sm:$0xff] }
 0xb01   : > { %7658 = vmatmul.mubr.msk.f32.vlgmr.msra.gmra.mrb[6].mxu0 %vm2479_vm4, %v2472_v61 }
 0xb02   : > { %7681 = vmatprep.mubr.msk.f32.mxu0 %vm1836_vm2, %v10200_v9 }
 0xbd4   : > { %v2549_v63 = vpop.f32.mrb[6].mxu0 }
 0xbd5   : > { %v2550_v2 = vadd.f32 %v7076_v62, %v2549_v63  ;;  %v7659_v3 = vpop.f32.mrb[7].mxu0  ;;  %v7088_v62 = vld [vmem:[%s11022_s6 + $0x38] sm:$0xff] }
 0xbd7   : > { %v2553_v4 = vadd.f32 %v2550_v2, %v2378_v53 }
 0xbd9   : > { %v2556_v5 = vsel %vm1759_vm1, %v2553_v4, 0.0 }
 0xbda   : > { %2557 = vadd.xlane.f32.xlu0 %v2556_v5 }
 0xc67   : > { %v2558_v6 = vpop.xlane.xlu0 %2557 }
 0xc68   : > { %v2559_v7 = vmul.f32 0.03125, %v2558_v6 }
 0xc6a   : > { %v2560_v10 = vsub.f32 %v2553_v4, %v2559_v7 }
 0xc6c   : > { %v2561_v11 = vmul.f32 %v2560_v10, %v2560_v10 }
 0xc6e   : > { %v2562_v12 = vsel %vm1759_vm1, %v2561_v11, 0.0 }
 0xc6f   : > { %2563 = vadd.xlane.f32.xlu1 %v2562_v12 }
 0xcfc   : > { %v2564_v24 = vpop.xlane.xlu1 %2563 }
 0xcfd   : > { %v2565_v28 = vmul.f32 0.03125, %v2564_v24 }
 0xcff   : > { %v2566_v29 = vadd.f32 1e-05, %v2565_v28 }
 0xd01   : > { %8723 = vrsqrt.f32 %v2566_v29 }
 0xd0b   : > { %v8724_v30 = vpop.eup %8723 }
 0xd0c   : > { %v2568_v8 = vmul.f32 %v8724_v30, %v2560_v10 }
 0xd0e   : > { %v2575_v33 = vmul.f32 %v7078_v31, %v2568_v8 }
 0xd10   : > { %v10333_v34 = vadd.f32 %v7079_v32, %v2575_v33  ;;  %v7110_v33 = vld [vmem:[%s11023_s10 + $0x20] sm:$0xff] }
 0xd12   : > { %7669 = vmatmul.mubr.msk.f32.vlgmr.msra.gmra.mrb[14].mxu1 %vm1759_vm1, %v10333_v34 }
 0xd13   : > { %7673 = vmatprep.mubr.msk.f32.mxu1 %vm1836_vm2, %v10200_v9 }
 0xde5   : > { %v2672_v36 = vpop.f32.mrb[14].mxu1 }
 0xde6   : > { %v2673_v37 = vadd.f32 %v7089_v35, %v2672_v36  ;;  %v7670_v38 = vpop.f32.mrb[15].mxu1  ;;  %v7111_v35 = vld [vmem:[%s11023_s10 + $0x28] sm:$0xff] }
 0xde7   : > { %v8221_v36 = vpack.c.bf16 %v7111_v35, %v7110_v33 }
 0xde8   : > { %2677 = vrot.lane.b32.xlu0 %v2673_v37, %s10922_s1  ;;  %s11027_s1 = smov 64  }
 0xe5a   : > { %v2678_v39 = vpop.permute.xlu0 %2677 }
 0xe5b   : > { %7671 = vmatprep.subr.mxu1 %v2678_v39 }
 0xe5c   : > { %7672 = vmatpush3.msra.mxu1 %v2678_v39  ;;  %v7114_v39 = vld [vmem:[%s11024_s16 + $0x40] sm:$0xff] }
 0xe5d   : > { %7674 = vmatmul.mubr.msk.f32.vlgmr.msra.gmra.mrb[16].mxu1 %vm1836_vm2, %v10208_v15  ;;  %8194 = vmatprep.subr.bf16.mxu1 %v9544_v0 }
 0xe5e   : > { %7676 = vmatprep.mubr.msk.f32.mxu1 %vm1836_vm2, %v10211_v16 }
 0xe61   : > { %7677 = vmatmul.mubr.msk.f32.gmra.mrb[18].mxu1 %vm1836_vm2, %v10218_v18 }
 0xe62   : > { %7695 = vmatprep.mubr.msk.f32.mxu1 %vm9545_vm0, %v9546_v1 }
 0xf30   : > { %v7675_v9 = vpop.f32.mrb[16].mxu1 }
 0xf31   : > { %v2766_v40 = vmul.f32 %v7675_v9, %v10234_v19  ;;  %v2746_v42 = vpop.f32.mrb[17].mxu1  ;;  %v7115_v9 = vld [vmem:[%s11024_s16 + $0x48] sm:$0xff] }
 0xf32   : > { %v2765_v44 = vmul.f32 %v2746_v42, %v10237_v20  ;;  %v8227_v42 = vpack.c.bf16 %v7115_v9, %v7114_v39 }
 0xf34   : > { %v8195_v45 = vpack.c.bf16 %v2766_v40, %v2765_v44  ;;  %v7678_v46 = vpop.f32.mrb[18].mxu1  ;;  %v7116_v40 = vld [vmem:[%s11024_s16 + $0x50] sm:$0xff]  ;;  %v7117_v44 = vld [vmem:[%s11024_s16 + $0x58] sm:$0xff] }
 0xf35   : > { %v2768_v47 = vmul.f32 %v7678_v46, %v10242_v25  ;;  %v2756_v48 = vpop.f32.mrb[19].mxu1  ;;  %v7118_v46 = vld [vmem:[%s11024_s16 + $0x60] sm:$0xff] }
 0xf36   : > { %8197 = vmatpush3.bf16.xpose.msk.msra.mxu1 %vm10246_vm3, %v8195_v45  ;;  %v2767_v49 = vmul.f32 %v2756_v48, %v10251_v27  ;;  %v8230_v45 = vpack.c.bf16 %v7117_v44, %v7116_v40 }
 0xf37   : > { %8198 = vmatprep.subr.bf16.mxu1 %v9544_v0 }
 0xf38   : > { %v8199_v50 = vpack.c.bf16 %v2768_v47, %v2767_v49  ;;  %v7119_v47 = vld [vmem:[%s11024_s16 + $0x68] sm:$0xff] }
 0xf39   : > { %v8233_v48 = vpack.c.bf16 %v7119_v47, %v7118_v46 }
 0xf3e   : > { %8201 = vmatpush3.bf16.xpose.msk.msra.mxu1 %vm10246_vm3, %v8199_v50 }
 0xf3f   : > { %8214 = vmatprep.subr.bf16.mxu1 %v9544_v0 }
 0xf45   : > { %7696 = vmatmul.mubr.msk.f32.vlgmr.msra.gmra.mrb[20].mxu1 %vm1759_vm1, %v2673_v37 }
 0xf46   : > { %7728 = vmatprep.mubr.msk.f32.mxu1 %vm9545_vm0, %v9546_v1 }
0x1018   : > { %v2941_v51 = vpop.f32.mrb[20].mxu1 }
0x1019   : > { %v2945_v52 = vmul.f32 0.35355338, %v2941_v51  ;;  %v7697_v53 = vpop.f32.mrb[21].mxu1 }
0x101a   : > { %v7108_v53 = vld [vmem:[#allocation4 + $0x1] ss:$0 sm:$0xff] }
0x101b   : > { %v2946_v54 = vsel %vm1759_vm1, %v2945_v52, -inf }
0x101c   : > { %2947 = vmax.xlane.f32.xlu1 %v2946_v54 }
0x102d   : > { %2769 = vrot.lane.b32.xlu1 %v2673_v37, %s11027_s1  ;;  %v7113_v37 = vld [vmem:[%s11023_s10 + $0x38] sm:$0xff] }
0x10a9   : > { %v2948_v55 = vpop.xlane.xlu1 %2947 }
0x10aa   : > { %v2949_v56 = vsub.f32 %v2945_v52, %v2948_v55  ;;  %v3450_v55 = vld [vmem:[%s11028_s2] sm:$0xff] }
0x10ac   : > { %v2950_v57 = vmul.f32 1.442695, %v2949_v56  ;;  %v3451_v56 = vld [vmem:[%s11028_s2 + $0x8] sm:$0xff] }
0x10ad   : > { %v2770_v58 = vpop.permute.xlu1 %2769 }
0x10ae   : > { %8725 = vpow2.f32 %v2950_v57  ;;  %7679 = vmatprep.subr.mxu0 %v2770_v58  ;;  %v7109_v57 = vld [vmem:[#allocation6 + $0x1] ss:$0 sm:$0xff] }
0x10af   : > { %7680 = vmatpush3.msra.mxu0 %v2770_v58 }
0x10b0   : > { %7682 = vmatmul.mubr.msk.f32.vlgmr.msra.gmra.mrb[8].mxu0 %vm1836_vm2, %v10208_v15  ;;  %8202 = vmatprep.subr.bf16.mxu0 %v9544_v0 }
0x10b1   : > { %8204 = vmatpush3.bf16.msra.mxu0 %v10268_v41  ;;  %7684 = vmatprep.mubr.msk.f32.mxu0 %vm1836_vm2, %v10211_v16  ;;  %v7086_v16 = vld [vmem:[%s11022_s6 + $0x28] sm:$0xff]  ;;  %s1707_s6 = scalar_lea.vmem %s11029_s3, %s10929_s5  ;;  %s11031_s3 = smov 96  }
0x10b2   : > { %8205 = vmatprep.subr.bf16.mxu0 %v9544_v0  ;;  %v8215_v61 = vpack.c.bf16 %v7086_v16, %v7085_v59  ;;  %v3452_v16 = vld [vmem:[%s11028_s2 + $0x10] sm:$0xff]  ;;  %s11033_s5 = sld [smem:[#allocation56_spill]] }
0x10b4   : > { %7685 = vmatmul.mubr.msk.f32.gmra.mrb[10].mxu0 %vm1836_vm2, %v10218_v18  ;;  %8216 = vmatpush3.bf16.msra.mxu1 %v8215_v61  ;;  %v8218_v18 = vpack.c.bf16 %v7088_v62, %v7087_v60  ;;  %v3453_v60 = vld [vmem:[%s11028_s2 + $0x18] sm:$0xff]  ;;  %v10429_v62 = vld [vmem:[%s1707_s6] sm:$0x7f]  ;;  %s11032_s6 = sld [smem:[#allocation55_spill]] }
0x10b5   : > { %8207 = vmatpush3.bf16.msra.mxu0 %v10272_v43  ;;  %7706 = vmatprep.mubr.msk.f32.mxu0 %vm9545_vm0, %v9546_v1  ;;  %v8242_v61 = vpack.c.bf16 %v3453_v60, %v3452_v16 }
0x10b6   : > { %8208 = vmatprep.subr.bf16.mxu0 %v9544_v0  ;;  %8217 = vmatprep.subr.bf16.mxu1 %v9544_v0 }
0x10b8   : > { %v8726_v15 = vpop.eup %8725  ;;  %8219 = vmatpush3.bf16.msra.mxu1 %v8218_v18  ;;  %v7120_v18 = vld [vmem:[%s11024_s16 + $0x70] sm:$0xff] }
0x10b9   : > { %7707 = vmatmul.mubr.msk.f32.vlgmr.msra.gmra.mrb[12].mxu0 %vm1759_vm1, %v8726_v15  ;;  %8226 = vmatprep.subr.bf16.mxu1 %v9544_v0 }
0x10ba   : > { %7717 = vmatprep.mubr.msk.f32.mxu0 %vm9545_vm0, %v9546_v1  ;;  %v10474_v35 = vld [vmem:[%s11032_s6 + $0x18] sm:$0xf] }
0x1183   : > { %v7683_v63 = vpop.f32.mrb[8].mxu0 }
0x1184   : > { %v2858_v2 = vmul.f32 %v7683_v63, %v10234_v19  ;;  %v2838_v3 = vpop.f32.mrb[9].mxu0  ;;  %v7121_v63 = vld [vmem:[%s11024_s16 + $0x78] sm:$0xff] }
0x1185   : > { %v2857_v4 = vmul.f32 %v2838_v3, %v10237_v20  ;;  %v7122_v3 = vld [vmem:[#allocation7 + $0x1] ss:$0 sm:$0xff] }
0x1187   : > { %v8209_v5 = vpack.c.bf16 %v2858_v2, %v2857_v4  ;;  %v7686_v6 = vpop.f32.mrb[10].mxu0  ;;  %v8236_v2 = vpack.c.bf16 %v7121_v63, %v7120_v18  ;;  %v10436_v4 = vld [vmem:[%s11030_s4] sm:$0xff] }
0x1188   : > { %v2860_v7 = vmul.f32 %v7686_v6, %v10242_v25  ;;  %v2848_v10 = vpop.f32.mrb[11].mxu0 }
0x1189   : > { %v2859_v11 = vmul.f32 %v2848_v10, %v10251_v27  ;;  %8210 = vmatpush3.bf16.msra.mxu0 %v8209_v5  ;;  %v7106_v27 = vld [vmem:[#allocation2 + $0x1] ss:$0 sm:$0xff] }
0x118a   : > { %8211 = vmatprep.subr.bf16.mxu0 %v9544_v0 }
0x118b   : > { %v8212_v12 = vpack.c.bf16 %v2860_v7, %v2859_v11  ;;  %v7132_v11 = vld [vmem:[#allocation13] ss:$0 sm:$0xff] }
0x118c   : > { %v3021_v13 = vpop.f32.mrb[12].mxu0 }
0x118d   : > { %8727 = vrcp.f32 %v3021_v13  ;;  %v7708_v14 = vpop.f32.mrb[13].mxu0  ;;  %8213 = vmatpush3.bf16.msra.mxu0 %v8212_v12 }
0x118e   : > { %8220 = vmatprep.subr.bf16.mxu0 %v9544_v0 }
0x1197   : > { %v8728_v19 = vpop.eup %8727 }
0x1198   : > { %v3026_v17 = vmul.f32 %v8728_v19, %v8726_v15  ;;  %v8239_v15 = vpack.c.bf16 %v3451_v56, %v3450_v55  ;;  %v1733_v55 = vld [vmem:[%s11033_s5 + $0x8] sm:$0xff] }
0x119a   : > { %7718 = vmatmul.mubr.msk.f32.vlgmr.msra.gmra.mrb[14].mxu0 %vm1759_vm1, %v3026_v17  ;;  %v10445_v17 = vld [vmem:[%s11030_s4 + $0x8] sm:$0xff] }
0x119b   : > { %7739 = vmatprep.mubr.msk.f32.mxu0 %vm9545_vm0, %v9546_v1  ;;  %8222 = vmatpush3.bf16.msra.mxu0 %v8221_v36  ;;  %v10477_v36 = vld [vmem:[%s11032_s6 + $0x10] sm:$0xff] }
0x119c   : > { %8223 = vmatprep.subr.bf16.mxu0 %v9544_v0 }
0x126d   : > { %v3096_v20 = vpop.f32.mrb[14].mxu0 }
0x126e   : > { %v7719_v25 = vpop.f32.mrb[15].mxu0  ;;  %7729 = vmatmul.mubr.msk.f32.vlgmr.msra.gmra.mrb[22].mxu1 %vm1759_vm1, %v3096_v20  ;;  %v10449_v20 = vld [vmem:[%s11030_s4 + $0x10] sm:$0xff] }
0x126f   : > { %7758 = vmatprep.mubr.msk.f32.mxu1 %vm9545_vm0, %v9546_v1  ;;  %8228 = vmatpush3.bf16.msra.mxu1 %v8227_v42  ;;  %v10458_v25 = vld [vmem:[%s11030_s4 + $0x18] sm:$0xf]  ;;  %s11036_s4 = sld [smem:[#allocation69_spill]] }
0x1270   : > { %8229 = vmatprep.subr.bf16.mxu1 %v9544_v0 }
0x1273   : > { %8231 = vmatpush3.bf16.msra.mxu1 %v8230_v45 }
0x1274   : > { %8232 = vmatprep.subr.bf16.mxu1 %v9544_v0 }
0x1277   : > { %8234 = vmatpush3.bf16.msra.mxu1 %v8233_v48 }
0x1278   : > { %8235 = vmatprep.subr.bf16.mxu1 %v9544_v0 }
0x127b   : > { %8237 = vmatpush3.bf16.msra.mxu1 %v8236_v2 }
0x1341   : > { %v3175_v21 = vpop.f32.mrb[22].mxu1 }
0x1342   : > { %v3176_v22 = vadd.f32 %v7106_v27, %v3175_v21  ;;  %v7730_v23 = vpop.f32.mrb[23].mxu1  ;;  %v7124_v27 = vld [vmem:[#allocation9 + $0x1] ss:$0 sm:$0xff] }
0x1344   : > { %v3179_v24 = vadd.f32 %v3176_v22, %v10333_v34  ;;  %v7112_v34 = vld [vmem:[%s11023_s10 + $0x30] sm:$0xff] }
0x1345   : > { %v8224_v38 = vpack.c.bf16 %v7113_v37, %v7112_v34 }
0x1346   : > { %v3184_v28 = vsel %vm1759_vm1, %v3179_v24, 0.0 }
0x1347   : > { %3185 = vadd.xlane.f32.xlu0 %v3184_v28  ;;  %8225 = vmatpush3.bf16.msra.mxu0 %v8224_v38 }
0x1348   : > { %8238 = vmatprep.subr.bf16.mxu0 %v9544_v0 }
0x13d4   : > { %v3186_v29 = vpop.xlane.xlu0 %3185 }
0x13d5   : > { %v3187_v30 = vmul.f32 0.03125, %v3186_v29  ;;  %v10466_v29 = vld [vmem:[%s11032_s6 + $0x8] sm:$0xff] }
0x13d7   : > { %v3188_v31 = vsub.f32 %v3179_v24, %v3187_v30  ;;  %v10469_v30 = vld [vmem:[%s11032_s6] sm:$0xff]  ;;  %s11038_s6 = sld [smem:[#allocation73_spill]] }
0x13d9   : > { %v3189_v8 = vmul.f32 %v3188_v31, %v3188_v31 }
0x13db   : > { %v3190_v32 = vsel %vm1759_vm1, %v3189_v8, 0.0 }
0x13dc   : > { %3191 = vadd.xlane.f32.xlu1 %v3190_v32 }
0x1469   : > { %v3192_v49 = vpop.xlane.xlu1 %3191 }
0x146a   : > { %v3193_v50 = vmul.f32 0.03125, %v3192_v49 }
0x146c   : > { %v3194_v51 = vadd.f32 1e-05, %v3193_v50 }
0x146e   : > { %8729 = vrsqrt.f32 %v3194_v51 }
0x1478   : > { %v8730_v52 = vpop.eup %8729 }
0x1479   : > { %v3196_v54 = vmul.f32 %v8730_v52, %v3188_v31 }
0x147b   : > { %v3203_v58 = vmul.f32 %v7108_v53, %v3196_v54  ;;  %v1732_v54 = vld [vmem:[%s11033_s5] sm:$0xff] }
0x147d   : > { %v3210_v59 = vadd.f32 %v7109_v57, %v3203_v58  ;;  %v10495_v58 = vpack.c.bf16 %v1733_v55, %v1732_v54 }
0x147f   : > { %7740 = vmatmul.mubr.msk.f32.vlgmr.msra.gmra.mrb[16].mxu0 %vm1759_vm1, %v3210_v59 }
0x1480   : > { %8240 = vmatpush3.bf16.msra.mxu0 %v8239_v15  ;;  %7769 = vmatprep.mubr.msk.f32.mxu0 %vm9545_vm0, %v9546_v1  ;;  %v1734_v15 = vld [vmem:[%s11033_s5 + $0x10] sm:$0xff] }
0x1481   : > { %8241 = vmatprep.subr.bf16.mxu0 %v9544_v0 }
0x1484   : > { %8243 = vmatpush3.bf16.msra.mxu0 %v8242_v61 }
0x1487   : > { %7770 = vmatmul.mubr.msk.f32.vlgmr.msra.gmra.mrb[18].mxu0 %vm1759_vm1, %v10429_v62 }
0x1488   : > { %7774 = vmatprep.mubr.msk.f32.mxu0 %vm3542_vm5, %v10436_v4 }
0x1552   : > { %v3304_v5 = vpop.f32.mrb[16].mxu0 }
0x1553   : > { %v3305_v6 = vadd.f32 %v7122_v3, %v3304_v5  ;;  %v7741_v7 = vpop.f32.mrb[17].mxu0  ;;  %v7128_v5 = vld [vmem:[%s11025_s9 + $0x1] ss:$0 sm:$0xff]  ;;  %s11041_s9 = sld [smem:[#allocation81_spill]] }
0x1554   : > { %v7129_v7 = vld [vmem:[%s11026_s23 + $0x1] ss:$0 sm:$0xff] }
0x1555   : > { %v3308_v10 = vmax.f32 %v3305_v6, 0.0 }
0x1557   : > { %7759 = vmatmul.mubr.msk.f32.vlgmr.msra.gmra.mrb[24].mxu1 %vm2479_vm4, %v3308_v10 }
0x1558   : > { %7782 = vmatprep.mubr.msk.f32.mxu1 %vm3542_vm5, %v10436_v4 }
0x155a   : > { %v3535_v12 = vpop.f32.mrb[18].mxu0 }
0x155b   : > { %v3536_v13 = vadd.f32 %v7132_v11, %v3535_v12  ;;  %v7771_v14 = vpop.f32.mrb[19].mxu0 }
0x155d   : > { %3540 = vrot.lane.b32.xlu0 %v3536_v13, %s11031_s3 }
0x15cf   : > { %v3541_v19 = vpop.permute.xlu0 %3540 }
0x15d0   : > { %7772 = vmatprep.subr.msk.mxu0 %vm3555_vm6, %v3541_v19 }
0x15d1   : > { %7773 = vmatpush3.msk.msra.mxu0 %vm3555_vm6, %v3541_v19 }
0x15d2   : > { %7775 = vmatmul.mubr.msk.f32.vlgmr.msra.gmra.mrb[20].mxu0 %vm3542_vm5, %v10445_v17  ;;  %8244 = vmatprep.subr.bf16.mxu0 %v9544_v0 }
0x15d3   : > { %7777 = vmatprep.mubr.msk.f32.mxu0 %vm3542_vm5, %v10449_v20 }
0x15d6   : > { %7778 = vmatmul.mubr.msk.f32.gmra.mrb[22].mxu0 %vm3542_vm5, %v10458_v25 }
0x15d7   : > { %7796 = vmatprep.mubr.msk.f32.mxu0 %vm9545_vm0, %v9546_v1 }
0x162a   : > { %v3384_v21 = vpop.f32.mrb[24].mxu1 }
0x162b   : > { %v3385_v22 = vadd.f32 %v7124_v27, %v3384_v21  ;;  %v7760_v23 = vpop.f32.mrb[25].mxu1 }
0x162d   : > { %v3388_v24 = vadd.f32 %v3385_v22, %v3210_v59  ;;  %v1735_v59 = vld [vmem:[%s11033_s5 + $0x18] sm:$0xf]  ;;  %s11037_s5 = sld [smem:[#allocation74_spill]] }
0x162e   : > { %v10507_v16 = vpack.c.bf16 %v1735_v59, %v1734_v15 }
0x162f   : > { %v3393_v28 = vsel %vm1759_vm1, %v3388_v24, 0.0 }
0x1630   : > { %3394 = vadd.xlane.f32.xlu0 %v3393_v28 }
0x1633   : > { %v4106_v15 = vld [vmem:[%s11037_s5 + $0x18] sm:$0xff] }
0x16a5   : > { %v7776_v31 = vpop.f32.mrb[20].mxu0 }
0x16a6   : > { %v3644_v8 = vmul.f32 %v7776_v31, %v10466_v29  ;;  %v3624_v32 = vpop.f32.mrb[21].mxu0 }
0x16a7   : > { %v3643_v33 = vmul.f32 %v3624_v32, %v10469_v30 }
0x16a9   : > { %v8245_v34 = vpack.c.bf16 %v3644_v8, %v3643_v33  ;;  %v7779_v37 = vpop.f32.mrb[22].mxu0 }
0x16aa   : > { %v3646_v38 = vmul.f32 %v7779_v37, %v10474_v35  ;;  %v3634_v39 = vpop.f32.mrb[23].mxu0 }
0x16ab   : > { %8247 = vmatpush3.bf16.xpose.msk.msra.mxu0 %vm10246_vm3, %v8245_v34  ;;  %v3645_v9 = vmul.f32 %v3634_v39, %v10477_v36 }
0x16ac   : > { %8248 = vmatprep.subr.bf16.mxu0 %v9544_v0 }
0x16ad   : > { %v8249_v40 = vpack.c.bf16 %v3646_v38, %v3645_v9 }
0x16b3   : > { %8251 = vmatpush3.bf16.xpose.msk.msra.mxu0 %vm10246_vm3, %v8249_v40 }
0x16b4   : > { %8266 = vmatprep.subr.bf16.mxu0 %v9544_v0 }
0x16ba   : > { %7797 = vmatmul.mubr.msk.f32.vlgmr.msra.gmra.mrb[24].mxu0 %vm1759_vm1, %v3536_v13 }
0x16bb   : > { %7829 = vmatprep.mubr.msk.f32.mxu0 %vm9545_vm0, %v9546_v1 }
0x16bd   : > { %v3395_v47 = vpop.xlane.xlu0 %3394 }
0x16be   : > { %v3396_v48 = vmul.f32 0.03125, %v3395_v47  ;;  %v3458_v47 = vld [vmem:[%s11036_s4 + $0x18] sm:$0xff] }
0x16c0   : > { %v3397_v49 = vsub.f32 %v3388_v24, %v3396_v48 }
0x16c2   : > { %v3398_v50 = vmul.f32 %v3397_v49, %v3397_v49 }
0x16c4   : > { %v3399_v51 = vsel %vm1759_vm1, %v3398_v50, 0.0 }
0x178d   : > { %v3820_v42 = vpop.f32.mrb[24].mxu0 }
0x178e   : > { %v3824_v44 = vmul.f32 0.35355338, %v3820_v42  ;;  %v7798_v45 = vpop.f32.mrb[25].mxu0  ;;  %v3455_v42 = vld [vmem:[%s11036_s4] sm:$0xff] }
0x178f   : > { %v3457_v45 = vld [vmem:[%s11036_s4 + $0x10] sm:$0xff] }
0x1790   : > { %v3826_v46 = vsel %vm3825_vm7, %v3824_v44, -inf  ;;  %v8270_v48 = vpack.c.bf16 %v3458_v47, %v3457_v45  ;;  %v10580_v45 = vld [vmem:[%s11016_s28 + $0x10] sm:$0xff] }
0x1791   : > { %3827 = vmax.xlane.f32.xlu1 %v3826_v46 }
0x17a2   : > { %3647 = vrot.lane.b32.xlu1 %v3536_v13, %s11027_s1 }
0x17c6   : > { %3400 = vadd.xlane.f32.xlu1 %v3399_v51 }
0x181e   : > { %v3828_v52 = vpop.xlane.xlu1 %3827 }
0x181f   : > { %v3829_v53 = vsub.f32 %v3824_v44, %v3828_v52  ;;  %v3456_v44 = vld [vmem:[%s11036_s4 + $0x8] sm:$0xff]  ;;  %v4103_v52 = vld [vmem:[%s11037_s5] sm:$0xff] }
0x1820   : > { %v8267_v46 = vpack.c.bf16 %v3456_v44, %v3455_v42  ;;  %v10573_v44 = vld [vmem:[%s11016_s28 + $0x8] sm:$0xff] }
0x1821   : > { %v3830_v56 = vmul.f32 1.442695, %v3829_v53  ;;  %v4104_v53 = vld [vmem:[%s11037_s5 + $0x8] sm:$0xff] }
0x1822   : > { %v3648_v57 = vpop.permute.xlu1 %3647  ;;  %8268 = vmatpush3.bf16.msra.mxu0 %v8267_v46  ;;  %v8279_v55 = vpack.c.bf16 %v4104_v53, %v4103_v52  ;;  %v10586_v46 = vld [vmem:[%s11016_s28 + $0x18] sm:$0xff] }
0x1823   : > { %8731 = vpow2.f32 %v3830_v56  ;;  %7780 = vmatprep.subr.msk.mxu1 %vm3555_vm6, %v3648_v57  ;;  %8269 = vmatprep.subr.bf16.mxu0 %v9544_v0 }
0x1824   : > { %7781 = vmatpush3.msk.msra.mxu1 %vm3555_vm6, %v3648_v57  ;;  %v4105_v57 = vld [vmem:[%s11037_s5 + $0x10] sm:$0xff] }
0x1825   : > { %7783 = vmatmul.mubr.msk.f32.vlgmr.msra.gmra.mrb[26].mxu1 %vm3542_vm5, %v10445_v17  ;;  %8252 = vmatprep.subr.bf16.mxu1 %v9544_v0 }
0x1826   : > { %8254 = vmatpush3.bf16.msra.mxu1 %v10495_v58  ;;  %7785 = vmatprep.mubr.msk.f32.mxu1 %vm3542_vm5, %v10449_v20 }
0x1827   : > { %8255 = vmatprep.subr.bf16.mxu1 %v9544_v0  ;;  %8271 = vmatpush3.bf16.msra.mxu0 %v8270_v48  ;;  %v7155_v48 = vld [vmem:[#allocation16] ss:$0 sm:$0xff] }
0x1828   : > { %8278 = vmatprep.subr.bf16.mxu0 %v9544_v0 }
0x1829   : > { %7786 = vmatmul.mubr.msk.f32.gmra.mrb[28].mxu1 %vm3542_vm5, %v10458_v25 }
0x182a   : > { %8258 = vmatpush3.bf16.msk.msra.mxu1 %vm10510_vm10, %v10507_v16  ;;  %7807 = vmatprep.mubr.msk.f32.mxu1 %vm9545_vm0, %v9546_v1 }
0x182b   : > { %8259 = vmatprep.subr.bf16.mxu1 %v9544_v0 }
0x182d   : > { %v8732_v61 = vpop.eup %8731 }
0x182e   : > { %7808 = vmatmul.mubr.msk.f32.vlgmr.msra.gmra.mrb[30].mxu1 %vm3832_vm11, %v8732_v61 }
0x182f   : > { %7818 = vmatprep.mubr.msk.f32.mxu1 %vm9545_vm0, %v9546_v1 }
0x1853   : > { %v3401_v18 = vpop.xlane.xlu1 %3400 }
0x1854   : > { %v3402_v63 = vmul.f32 0.03125, %v3401_v18 }
0x1856   : > { %v3403_v2 = vadd.f32 1e-05, %v3402_v63  ;;  %v8282_v63 = vpack.c.bf16 %v4106_v15, %v4105_v57 }
0x1858   : > { %8733 = vrsqrt.f32 %v3403_v2 }
0x1862   : > { %v8734_v3 = vpop.eup %8733 }
0x1863   : > { %v3405_v6 = vmul.f32 %v8734_v3, %v3397_v49  ;;  %v7131_v3 = vld [vmem:[#allocation12] ss:$0 sm:$0xff] }
0x1865   : > { %v3412_v10 = vmul.f32 %v7128_v5, %v3405_v6  ;;  %v10559_v6 = vld [vmem:[%s11016_s28] sm:$0xff] }
0x1867   : > { %v3419_v11 = vadd.f32 %v7129_v7, %v3412_v10  ;;  %v4098_v7 = vld [vmem:[%s11038_s6] sm:$0xff]  ;;  %v4099_v10 = vld [vmem:[%s11038_s6 + $0x8] sm:$0xff] }
0x1869   : > { %v3422_v12 = vsel %vm1759_vm1, %v3419_v11, 0.0 }
0x186a   : > { %3423 = vadd.xlane.f32.xlu0 %v3422_v12  ;;  %v4100_v12 = vld [vmem:[%s11038_s6 + $0x10] sm:$0xff] }
0x18f7   : > { %v3424_v13 = vpop.xlane.xlu0 %3423 }
0x18f8   : > { %v3425_v14 = vmul.f32 0.03125, %v3424_v13  ;;  %v7784_v19 = vpop.f32.mrb[26].mxu1  ;;  %v4101_v13 = vld [vmem:[%s11038_s6 + $0x18] sm:$0xff] }
0x18f9   : > { %v3737_v27 = vmul.f32 %v7784_v19, %v10466_v29  ;;  %v3717_v21 = vpop.f32.mrb[27].mxu1  ;;  %v7153_v19 = vld [vmem:[#allocation15] ss:$0 sm:$0xff] }
0x18fa   : > { %v3426_v22 = vsub.f32 %v3419_v11, %v3425_v14  ;;  %v3736_v23 = vmul.f32 %v3717_v21, %v10469_v30  ;;  %v8273_v11 = vpack.c.bf16 %v4099_v10, %v4098_v7  ;;  %v8276_v14 = vpack.c.bf16 %v4101_v13, %v4100_v12  ;;  %v10624_v10 = vld [vmem:[%s11018_s7 + $0x10] sm:$0xff] }
0x18fb   : > { %v7157_v13 = vld [vmem:[#allocation19] ss:$0 sm:$0xff] }
0x18fc   : > { %v8260_v24 = vpack.c.bf16 %v3737_v27, %v3736_v23  ;;  %v7787_v28 = vpop.f32.mrb[28].mxu1  ;;  %v3427_v31 = vmul.f32 %v3426_v22, %v3426_v22 }
0x18fd   : > { %v3739_v8 = vmul.f32 %v7787_v28, %v10474_v35  ;;  %v3727_v32 = vpop.f32.mrb[29].mxu1  ;;  %v7159_v28 = vld [vmem:[#allocation21] ss:$0 sm:$0xff] }
0x18fe   : > { %v3738_v33 = vmul.f32 %v3727_v32, %v10477_v36  ;;  %8261 = vmatpush3.bf16.msra.mxu1 %v8260_v24  ;;  %v3428_v34 = vsel %vm1759_vm1, %v3427_v31, 0.0 }
0x18ff   : > { %3429 = vadd.xlane.f32.xlu0 %v3428_v34  ;;  %8262 = vmatprep.subr.bf16.mxu1 %v9544_v0 }
0x1900   : > { %v8263_v37 = vpack.c.bf16 %v3739_v8, %v3738_v33 }
0x1901   : > { %v3906_v38 = vpop.f32.mrb[30].mxu1 }
0x1902   : > { %8735 = vrcp.f32 %v3906_v38  ;;  %v7809_v39 = vpop.f32.mrb[31].mxu1  ;;  %8265 = vmatpush3.bf16.msk.msra.mxu1 %vm10510_vm10, %v8263_v37 }
0x1903   : > { %8272 = vmatprep.subr.bf16.mxu1 %v9544_v0 }
0x190c   : > { %v8736_v9 = vpop.eup %8735 }
0x190d   : > { %v3911_v40 = vmul.f32 %v8736_v9, %v8732_v61  ;;  %v7130_v61 = vld [vmem:[#allocation10] ss:$0 sm:$0xff] }
0x190f   : > { %7819 = vmatmul.mubr.msk.f32.vlgmr.msra.gmra.mrb[32].mxu1 %vm3832_vm11, %v3911_v40 }
0x1910   : > { %7840 = vmatprep.mubr.msk.f32.mxu1 %vm9545_vm0, %v9546_v1  ;;  %8274 = vmatpush3.bf16.msra.mxu1 %v8273_v11 }
0x1911   : > { %8275 = vmatprep.subr.bf16.mxu1 %v9544_v0 }
0x1914   : > { %8277 = vmatpush3.bf16.msra.mxu1 %v8276_v14 }
0x198c   : > { %v3430_v49 = vpop.xlane.xlu0 %3429 }
0x198d   : > { %v3431_v50 = vmul.f32 0.03125, %v3430_v49 }
0x198f   : > { %v3432_v51 = vadd.f32 1e-05, %v3431_v50  ;;  %v7156_v50 = vld [vmem:[#allocation18] ss:$0 sm:$0xff] }
0x1991   : > { %8737 = vrsqrt.f32 %v3432_v51 }
0x199b   : > { %v8738_v54 = vpop.eup %8737 }
0x199c   : > { %v3434_v56 = vmul.f32 %v8738_v54, %v3426_v22 }
0x199e   : > { %v3441_v2 = vmul.f32 %v7130_v61, %v3434_v56  ;;  %v10610_v56 = vld [vmem:[%s11018_s7 + $0x8] sm:$0xff] }
0x19a0   : > { %v10554_v5 = vadd.f32 %v7131_v3, %v3441_v2  ;;  %v10618_v2 = vld [vmem:[%s11018_s7 + $0x18] sm:$0xff] }
0x19e2   : > { %v3984_v59 = vpop.f32.mrb[32].mxu1 }
0x19e3   : > { %v7820_v18 = vpop.f32.mrb[33].mxu1  ;;  %7830 = vmatmul.mubr.msk.f32.vlgmr.msra.gmra.mrb[26].mxu0 %vm1759_vm1, %v3984_v59  ;;  %v10614_v59 = vld [vmem:[%s11018_s7] sm:$0xff]  ;;  %s11039_s7 = sld [smem:[#allocation76_spill]] }
0x19e4   : > { %8280 = vmatpush3.bf16.msra.mxu0 %v8279_v55  ;;  %7851 = vmatprep.mubr.msk.f32.mxu0 %vm9545_vm0, %v9546_v1 }
0x19e5   : > { %8281 = vmatprep.subr.bf16.mxu0 %v9544_v0 }
0x19e8   : > { %8283 = vmatpush3.bf16.msra.mxu0 %v8282_v63 }
0x19eb   : > { %7852 = vmatmul.mubr.msk.f32.vlgmr.msra.gmra.mrb[28].mxu0 %vm1759_vm1, %v10554_v5 }
0x19ec   : > { %7864 = vmatprep.mubr.msk.f32.mxu0 %vm1836_vm2, %v10559_v6 }
0x1ab6   : > { %v4063_v27 = vpop.f32.mrb[26].mxu0 }
0x1ab7   : > { %v4064_v21 = vadd.f32 %v7153_v19, %v4063_v27  ;;  %v7831_v22 = vpop.f32.mrb[27].mxu0 }
0x1ab9   : > { %v4067_v23 = vadd.f32 %v4064_v21, %v10429_v62 }
0x1abb   : > { %v4071_v24 = vsel %vm4070_vm12, %v4067_v23, 0.0 }
0x1abc   : > { %4072 = vadd.xlane.f32.xlu0 %v4071_v24 }
0x1abe   : > { %v4267_v31 = vpop.f32.mrb[28].mxu0 }
0x1abf   : > { %v4268_v8 = vadd.f32 %v7159_v28, %v4267_v31  ;;  %v7853_v32 = vpop.f32.mrb[29].mxu0 }
0x1ac1   : > { %7854 = vmatprep.subr.mxu1 %v4268_v8 }
0x1b49   : > { %v4073_v33 = vpop.xlane.xlu0 %4072 }
0x1b4a   : > { %v4074_v34 = vmul.f32 0.03125, %v4073_v33 }
0x1b4c   : > { %v4075_v37 = vsub.f32 %v4067_v23, %v4074_v34 }
0x1b4e   : > { %v4076_v38 = vmul.f32 %v4075_v37, %v4075_v37 }
0x1b50   : > { %v4077_v39 = vsel %vm4070_vm12, %v4076_v38, 0.0 }
0x1b51   : > { %4078 = vadd.xlane.f32.xlu1 %v4077_v39 }
0x1b62   : > { %4361 = vrot.lane.b32.xlu1 %v4268_v8, %s11031_s3 }
0x1bde   : > { %v4079_v62 = vpop.xlane.xlu1 %4078 }
0x1bdf   : > { %v4080_v9 = vmul.f32 0.03125, %v4079_v62 }
0x1be1   : > { %v4081_v40 = vadd.f32 1e-05, %v4080_v9 }
0x1be2   : > { %v4362_v42 = vpop.permute.xlu1 %4361 }
0x1be3   : > { %8739 = vrsqrt.f32 %v4081_v40  ;;  %7862 = vmatprep.subr.mxu0 %v4362_v42 }
0x1be4   : > { %7863 = vmatpush3.msra.mxu0 %v4362_v42  ;;  %v4108_v42 = vld [vmem:[%s11039_s7] sm:$0xff] }
0x1be5   : > { %7865 = vmatmul.mubr.msk.f32.vlgmr.msra.gmra.mrb[30].mxu0 %vm1836_vm2, %v10573_v44  ;;  %8292 = vmatprep.subr.bf16.mxu0 %v9544_v0 }
0x1be6   : > { %8294 = vmatpush3.bf16.msra.mxu0 %v10268_v41  ;;  %7867 = vmatprep.mubr.msk.f32.mxu0 %vm1836_vm2, %v10580_v45 }
0x1be7   : > { %8295 = vmatprep.subr.bf16.mxu0 %v9544_v0 }
0x1be9   : > { %7868 = vmatmul.mubr.msk.f32.gmra.mrb[32].mxu0 %vm1836_vm2, %v10586_v46 }
0x1bea   : > { %8297 = vmatpush3.bf16.msra.mxu0 %v10272_v43  ;;  %7889 = vmatprep.mubr.msk.f32.mxu0 %vm9545_vm0, %v9546_v1 }
0x1beb   : > { %8298 = vmatprep.subr.bf16.mxu0 %v9544_v0 }
0x1bed   : > { %v8740_v47 = vpop.eup %8739 }
0x1bee   : > { %v4083_v49 = vmul.f32 %v8740_v47, %v4075_v37  ;;  %v4109_v47 = vld [vmem:[%s11039_s7 + $0x8] sm:$0xff] }
0x1bf0   : > { %v4090_v51 = vmul.f32 %v7155_v48, %v4083_v49  ;;  %v4110_v48 = vld [vmem:[%s11039_s7 + $0x10] sm:$0xff]  ;;  %v8305_v49 = vpack.c.bf16 %v4109_v47, %v4108_v42 }
0x1bf2   : > { %v10594_v52 = vadd.f32 %v7156_v50, %v4090_v51  ;;  %v4111_v50 = vld [vmem:[%s11039_s7 + $0x18] sm:$0xff] }
0x1bf3   : > { %v8308_v51 = vpack.c.bf16 %v4111_v50, %v4110_v48 }
0x1bf4   : > { %7841 = vmatmul.mubr.msk.f32.vlgmr.msra.gmra.mrb[34].mxu1 %vm1759_vm1, %v10594_v52 }
0x1bf5   : > { %7855 = vmatpush3.msra.mxu1 %v4268_v8  ;;  %7856 = vmatprep.mubr.msk.f32.mxu1 %vm1836_vm2, %v10559_v6 }
0x1bf6   : > { %8284 = vmatprep.subr.bf16.mxu1 %v9544_v0 }
0x1bf8   : > { %7857 = vmatmul.mubr.msk.f32.vlgmr.msra.gmra.mrb[36].mxu1 %vm1836_vm2, %v10573_v44 }
0x1bf9   : > { %7859 = vmatprep.mubr.msk.f32.mxu1 %vm1836_vm2, %v10580_v45 }
0x1bfc   : > { %7860 = vmatmul.mubr.msk.f32.gmra.mrb[38].mxu1 %vm1836_vm2, %v10586_v46 }
0x1bfd   : > { %7878 = vmatprep.mubr.msk.f32.mxu1 %vm9545_vm0, %v9546_v1 }
0x1cb8   : > { %v7866_v23 = vpop.f32.mrb[30].mxu0 }
0x1cb9   : > { %v4450_v24 = vmul.f32 %v10610_v56, %v7866_v23  ;;  %v4430_v28 = vpop.f32.mrb[31].mxu0  ;;  %v4803_v23 = vld [vmem:[%s11040_s8 + $0x8] sm:$0xff] }
0x1cba   : > { %v4449_v31 = vmul.f32 %v10614_v59, %v4430_v28  ;;  %v4805_v28 = vld [vmem:[%s11040_s8 + $0x18] sm:$0xff] }
0x1cbc   : > { %v7869_v8 = vpop.f32.mrb[32].mxu0  ;;  %v8299_v34 = vpack.c.bf16 %v4450_v24, %v4449_v31 }
0x1cbd   : > { %v4452_v32 = vmul.f32 %v10618_v2, %v7869_v8  ;;  %v4440_v33 = vpop.f32.mrb[33].mxu0  ;;  %v4807_v8 = vld [vmem:[%s11041_s9] sm:$0xff] }
0x1cbe   : > { %v4451_v37 = vmul.f32 %v10624_v10, %v4440_v33  ;;  %v4809_v33 = vld [vmem:[%s11041_s9 + $0x10] sm:$0xff] }
0x1cc0   : > { %v8302_v38 = vpack.c.bf16 %v4452_v32, %v4451_v37  ;;  %v4808_v32 = vld [vmem:[%s11041_s9 + $0x8] sm:$0xff]  ;;  %v4810_v37 = vld [vmem:[%s11041_s9 + $0x18] sm:$0xff] }
0x1cc7   : > { %v4188_v53 = vpop.f32.mrb[34].mxu1 }
0x1cc8   : > { %v7842_v54 = vpop.f32.mrb[35].mxu1  ;;  %v4189_v14 = vadd.f32 %v7157_v13, %v4188_v53 }
0x1ccb   : > { %v7858_v55 = vpop.f32.mrb[36].mxu1 }
0x1ccc   : > { %v4357_v57 = vmul.f32 %v10610_v56, %v7858_v55  ;;  %v4337_v15 = vpop.f32.mrb[37].mxu1 }
0x1ccd   : > { %v4356_v61 = vmul.f32 %v10614_v59, %v4337_v15 }
0x1ccf   : > { %v8285_v18 = vpack.c.bf16 %v4357_v57, %v4356_v61  ;;  %v7861_v63 = vpop.f32.mrb[38].mxu1 }
0x1cd0   : > { %v4359_v3 = vmul.f32 %v10618_v2, %v7861_v63  ;;  %v4347_v7 = vpop.f32.mrb[39].mxu1 }
0x1cd1   : > { %8287 = vmatpush3.bf16.xpose.msk.msra.mxu1 %vm10246_vm3, %v8285_v18  ;;  %v4358_v11 = vmul.f32 %v10624_v10, %v4347_v7  ;;  %v7176_v18 = vld [vmem:[#allocation22] ss:$0 sm:$0xff] }
0x1cd2   : > { %8288 = vmatprep.subr.bf16.mxu1 %v9544_v0 }
0x1cd3   : > { %v8289_v12 = vpack.c.bf16 %v4359_v3, %v4358_v11 }
0x1cd9   : > { %8291 = vmatpush3.bf16.xpose.msk.msra.mxu1 %vm10246_vm3, %v8289_v12 }
0x1cda   : > { %8304 = vmatprep.subr.bf16.mxu1 %v9544_v0 }
0x1ce0   : > { %7879 = vmatmul.mubr.msk.f32.vlgmr.msra.gmra.mrb[40].mxu1 %vm1759_vm1, %v4189_v14 }
0x1ce1   : > { %7911 = vmatprep.mubr.msk.f32.mxu1 %vm9545_vm0, %v9546_v1  ;;  %8306 = vmatpush3.bf16.msra.mxu1 %v8305_v49  ;;  %v7178_v49 = vld [vmem:[#allocation24] ss:$0 sm:$0xff] }
0x1ce2   : > { %8307 = vmatprep.subr.bf16.mxu1 %v9544_v0 }
0x1ce5   : > { %8309 = vmatpush3.bf16.msra.mxu1 %v8308_v51  ;;  %v7179_v51 = vld [vmem:[#allocation25] ss:$0 sm:$0xff] }
0x1ce6   : > { %8316 = vmatprep.subr.bf16.mxu1 %v9544_v0 }
0x1db3   : > { %v4534_v19 = vpop.f32.mrb[40].mxu1 }
0x1db4   : > { %v4538_v27 = vmul.f32 0.35355338, %v4534_v19  ;;  %v7880_v21 = vpop.f32.mrb[41].mxu1 }
0x1db6   : > { %v4539_v22 = vsel %vm4070_vm12, %v4538_v27, -inf }
0x1db7   : > { %4540 = vmax.xlane.f32.xlu0 %v4539_v22  ;;  %v4802_v22 = vld [vmem:[%s11040_s8] sm:$0xff] }
0x1db8   : > { %v8311_v24 = vpack.c.bf16 %v4803_v23, %v4802_v22 }
0x1e44   : > { %v4541_v39 = vpop.xlane.xlu0 %4540 }
0x1e45   : > { %v4542_v62 = vsub.f32 %v4538_v27, %v4541_v39  ;;  %v4811_v39 = vld [vmem:[%s11041_s9 + $0x20] sm:$0xff] }
0x1e47   : > { %v4543_v9 = vmul.f32 1.442695, %v4542_v62  ;;  %v4812_v62 = vld [vmem:[%s11041_s9 + $0x28] sm:$0xff] }
0x1e49   : > { %8741 = vpow2.f32 %v4543_v9  ;;  %v8323_v9 = vpack.c.bf16 %v4812_v62, %v4811_v39 }
0x1e53   : > { %v8742_v40 = vpop.eup %8741 }
0x1e54   : > { %7890 = vmatmul.mubr.msk.f32.vlgmr.msra.gmra.mrb[34].mxu0 %vm1759_vm1, %v8742_v40 }
0x1e55   : > { %8300 = vmatpush3.bf16.msra.mxu0 %v8299_v34  ;;  %7900 = vmatprep.mubr.msk.f32.mxu0 %vm9545_vm0, %v9546_v1  ;;  %v8317_v34 = vpack.c.bf16 %v4808_v32, %v4807_v8  ;;  %v7188_v32 = vld [vmem:[%s11028_s2 + $0x30] sm:$0xff] }
0x1e56   : > { %8301 = vmatprep.subr.bf16.mxu0 %v9544_v0 }
0x1e59   : > { %8303 = vmatpush3.bf16.msra.mxu0 %v8302_v38  ;;  %v8320_v38 = vpack.c.bf16 %v4810_v37, %v4809_v33  ;;  %v7189_v33 = vld [vmem:[%s11028_s2 + $0x38] sm:$0xff] }
0x1e5a   : > { %8310 = vmatprep.subr.bf16.mxu0 %v9544_v0 }
0x1f27   : > { %v4614_v53 = vpop.f32.mrb[34].mxu0 }
0x1f28   : > { %8743 = vrcp.f32 %v4614_v53  ;;  %v7891_v54 = vpop.f32.mrb[35].mxu0 }
0x1f32   : > { %v8744_v55 = vpop.eup %8743 }
0x1f33   : > { %v4619_v57 = vmul.f32 %v8744_v55, %v8742_v40  ;;  %v4813_v55 = vld [vmem:[%s11041_s9 + $0x30] sm:$0xff] }
0x1f35   : > { %7901 = vmatmul.mubr.msk.f32.vlgmr.msra.gmra.mrb[36].mxu0 %vm1759_vm1, %v4619_v57  ;;  %v4814_v57 = vld [vmem:[%s11041_s9 + $0x38] sm:$0xff] }
0x1f36   : > { %7922 = vmatprep.mubr.msk.f32.mxu0 %vm9545_vm0, %v9546_v1  ;;  %8312 = vmatpush3.bf16.msra.mxu0 %v8311_v24 }
0x1f37   : > { %8313 = vmatprep.subr.bf16.mxu0 %v9544_v0 }
0x2008   : > { %v4689_v15 = vpop.f32.mrb[36].mxu0 }
0x2009   : > { %v7902_v61 = vpop.f32.mrb[37].mxu0  ;;  %7912 = vmatmul.mubr.msk.f32.vlgmr.msra.gmra.mrb[42].mxu1 %vm1759_vm1, %v4689_v15  ;;  %v8326_v15 = vpack.c.bf16 %v4814_v57, %v4813_v55 }
0x200a   : > { %7941 = vmatprep.mubr.msk.f32.mxu1 %vm9545_vm0, %v9546_v1  ;;  %8318 = vmatpush3.bf16.msra.mxu1 %v8317_v34  ;;  %v7180_v61 = vld [vmem:[#allocation27] ss:$0 sm:$0xff]  ;;  %v8332_v34 = vpack.c.bf16 %v7189_v33, %v7188_v32  ;;  %v7193_v33 = vld [vmem:[%s11036_s4 + $0x38] sm:$0xff] }
0x200b   : > { %8319 = vmatprep.subr.bf16.mxu1 %v9544_v0 }
0x200e   : > { %8321 = vmatpush3.bf16.msra.mxu1 %v8320_v38 }
0x200f   : > { %8322 = vmatprep.subr.bf16.mxu1 %v9544_v0 }
0x2012   : > { %8324 = vmatpush3.bf16.msra.mxu1 %v8323_v9  ;;  %v7184_v9 = vld [vmem:[#allocation30] ss:$0 sm:$0xff] }
0x2013   : > { %8325 = vmatprep.subr.bf16.mxu1 %v9544_v0 }
0x2016   : > { %8327 = vmatpush3.bf16.msra.mxu1 %v8326_v15 }
0x20dc   : > { %v4768_v63 = vpop.f32.mrb[42].mxu1 }
0x20dd   : > { %v4769_v3 = vadd.f32 %v7176_v18, %v4768_v63  ;;  %v7913_v7 = vpop.f32.mrb[43].mxu1 }
0x20df   : > { %v4772_v11 = vadd.f32 %v4769_v3, %v10594_v52  ;;  %v4804_v52 = vld [vmem:[%s11040_s8 + $0x10] sm:$0xff] }
0x20e0   : > { %v8314_v31 = vpack.c.bf16 %v4805_v28, %v4804_v52  ;;  %v7186_v28 = vld [vmem:[%s11028_s2 + $0x20] sm:$0xff] }
0x20e1   : > { %v4775_v12 = vsel %vm4070_vm12, %v4772_v11, 0.0 }
0x20e2   : > { %4776 = vadd.xlane.f32.xlu0 %v4775_v12  ;;  %8315 = vmatpush3.bf16.msra.mxu0 %v8314_v31  ;;  %v7187_v31 = vld [vmem:[%s11028_s2 + $0x28] sm:$0xff] }
0x20e3   : > { %8328 = vmatprep.subr.bf16.mxu0 %v9544_v0  ;;  %v8329_v8 = vpack.c.bf16 %v7187_v31, %v7186_v28 }
0x216f   : > { %v4777_v13 = vpop.xlane.xlu0 %4776 }
0x2170   : > { %v4778_v14 = vmul.f32 0.03125, %v4777_v13 }
0x2172   : > { %v4779_v19 = vsub.f32 %v4772_v11, %v4778_v14  ;;  %v7182_v11 = vld [vmem:[#allocation28] ss:$0 sm:$0xff] }
0x2174   : > { %v4780_v27 = vmul.f32 %v4779_v19, %v4779_v19 }
0x2176   : > { %v4781_v21 = vsel %vm4070_vm12, %v4780_v27, 0.0 }
0x2177   : > { %4782 = vadd.xlane.f32.xlu0 %v4781_v21 }
0x2204   : > { %v4783_v40 = vpop.xlane.xlu0 %4782 }
0x2205   : > { %v4784_v42 = vmul.f32 0.03125, %v4783_v40 }
0x2207   : > { %v4785_v47 = vadd.f32 1e-05, %v4784_v42  ;;  %v7185_v42 = vld [vmem:[#allocation31] ss:$0 sm:$0xff] }
0x2209   : > { %8745 = vrsqrt.f32 %v4785_v47 }
0x2213   : > { %v8746_v48 = vpop.eup %8745 }
0x2214   : > { %v4787_v50 = vmul.f32 %v8746_v48, %v4779_v19 }
0x2216   : > { %v4794_v53 = vmul.f32 %v7178_v49, %v4787_v50  ;;  %v7194_v49 = vld [vmem:[#allocation13 + $0x1] ss:$0 sm:$0xff] }
0x2218   : > { %v4801_v54 = vadd.f32 %v7179_v51, %v4794_v53 }
0x221a   : > { %7923 = vmatmul.mubr.msk.f32.vlgmr.msra.gmra.mrb[38].mxu0 %vm1759_vm1, %v4801_v54 }
0x221b   : > { %7952 = vmatprep.mubr.msk.f32.mxu0 %vm9545_vm0, %v9546_v1  ;;  %8330 = vmatpush3.bf16.msra.mxu0 %v8329_v8 }
0x221c   : > { %8331 = vmatprep.subr.bf16.mxu0 %v9544_v0 }
0x221f   : > { %8333 = vmatpush3.bf16.msra.mxu0 %v8332_v34 }
0x22ed   : > { %v4891_v18 = vpop.f32.mrb[38].mxu0 }
0x22ee   : > { %v4892_v63 = vadd.f32 %v7180_v61, %v4891_v18  ;;  %v7924_v3 = vpop.f32.mrb[39].mxu0 }
0x22f0   : > { %v4895_v7 = vmax.f32 %v4892_v63, 0.0 }
0x22f2   : > { %7942 = vmatmul.mubr.msk.f32.vlgmr.msra.gmra.mrb[44].mxu1 %vm2479_vm4, %v4895_v7 }
0x22f3   : > { %7965 = vmatprep.mubr.msk.f32.mxu1 %vm3542_vm5, %v10436_v4 }
0x23c5   : > { %v4971_v12 = vpop.f32.mrb[44].mxu1 }
0x23c6   : > { %v4972_v13 = vadd.f32 %v7182_v11, %v4971_v12  ;;  %v7943_v14 = vpop.f32.mrb[45].mxu1 }
0x23c8   : > { %v4975_v19 = vadd.f32 %v4972_v13, %v4801_v54 }
0x23ca   : > { %v4978_v27 = vsel %vm4070_vm12, %v4975_v19, 0.0 }
0x23cb   : > { %4979 = vadd.xlane.f32.xlu0 %v4978_v27 }
0x2458   : > { %v4980_v21 = vpop.xlane.xlu0 %4979 }
0x2459   : > { %v4981_v22 = vmul.f32 0.03125, %v4980_v21 }
0x245b   : > { %v4982_v23 = vsub.f32 %v4975_v19, %v4981_v22 }
0x245d   : > { %v4983_v24 = vmul.f32 %v4982_v23, %v4982_v23 }
0x245f   : > { %v4984_v52 = vsel %vm4070_vm12, %v4983_v24, 0.0 }
0x2460   : > { %4985 = vadd.xlane.f32.xlu0 %v4984_v52 }
0x24ed   : > { %v4986_v37 = vpop.xlane.xlu0 %4985 }
0x24ee   : > { %v4987_v38 = vmul.f32 0.03125, %v4986_v37 }
0x24f0   : > { %v4988_v39 = vadd.f32 1e-05, %v4987_v38 }
0x24f2   : > { %8747 = vrsqrt.f32 %v4988_v39 }
0x24fc   : > { %v8748_v62 = vpop.eup %8747 }
0x24fd   : > { %v4990_v40 = vmul.f32 %v8748_v62, %v4982_v23  ;;  %v7223_v62 = vld [vmem:[%s11037_s5 + $0x20] sm:$0xff] }
0x24ff   : > { %v4997_v47 = vmul.f32 %v7184_v9, %v4990_v40  ;;  %v7224_v9 = vld [vmem:[%s11037_s5 + $0x28] sm:$0xff] }
0x2500   : > { %v8369_v40 = vpack.c.bf16 %v7224_v9, %v7223_v62 }
0x2501   : > { %v10689_v48 = vadd.f32 %v7185_v42, %v4997_v47  ;;  %v7225_v42 = vld [vmem:[%s11037_s5 + $0x30] sm:$0xff]  ;;  %v7226_v47 = vld [vmem:[%s11037_s5 + $0x38] sm:$0xff] }
0x2503   : > { %7953 = vmatmul.mubr.msk.f32.vlgmr.msra.gmra.mrb[40].mxu0 %vm1759_vm1, %v10689_v48 }
0x2504   : > { %7957 = vmatprep.mubr.msk.f32.mxu0 %vm3542_vm5, %v10436_v4 }
0x25d6   : > { %v5094_v50 = vpop.f32.mrb[40].mxu0 }
0x25d7   : > { %v5095_v51 = vadd.f32 %v7194_v49, %v5094_v50  ;;  %v7954_v53 = vpop.f32.mrb[41].mxu0 }
0x25d8   : > { %v7219_v53 = vld [vmem:[%s11038_s6 + $0x20] sm:$0xff] }
0x25d9   : > { %5099 = vrot.lane.b32.xlu1 %v5095_v51, %s11031_s3 }
0x25dd   : > { %5192 = vrot.lane.b32.xlu1 %v5095_v51, %s11027_s1  ;;  %s11042_s1 = sshll.u32 %s11044_s0, 3 }
0x264b   : > { %v5100_v54 = vpop.permute.xlu1 %5099 }
0x264c   : > { %7955 = vmatprep.subr.msk.mxu0 %vm3555_vm6, %v5100_v54 }
0x264d   : > { %7956 = vmatpush3.msk.msra.mxu0 %vm3555_vm6, %v5100_v54  ;;  %v7220_v54 = vld [vmem:[%s11038_s6 + $0x28] sm:$0xff] }
0x264e   : > { %7958 = vmatmul.mubr.msk.f32.vlgmr.msra.gmra.mrb[42].mxu0 %vm3542_vm5, %v10445_v17  ;;  %8334 = vmatprep.subr.bf16.mxu0 %v9544_v0 }
0x264f   : > { %v5193_v55 = vpop.permute.xlu1 %5192  ;;  %7960 = vmatprep.mubr.msk.f32.mxu0 %vm3542_vm5, %v10449_v20 }
0x2650   : > { %7963 = vmatprep.subr.msk.mxu1 %vm3555_vm6, %v5193_v55 }
0x2651   : > { %7964 = vmatpush3.msk.msra.mxu1 %vm3555_vm6, %v5193_v55  ;;  %v8363_v55 = vpack.c.bf16 %v7220_v54, %v7219_v53  ;;  %v7230_v54 = vld [vmem:[%s11039_s7 + $0x38] sm:$0xff] }
0x2652   : > { %7961 = vmatmul.mubr.msk.f32.gmra.mrb[44].mxu0 %vm3542_vm5, %v10458_v25  ;;  %7966 = vmatmul.mubr.msk.f32.vlgmr.msra.gmra.mrb[46].mxu1 %vm3542_vm5, %v10445_v17 }
0x2653   : > { %7979 = vmatprep.mubr.msk.f32.mxu0 %vm9545_vm0, %v9546_v1  ;;  %8342 = vmatprep.subr.bf16.mxu1 %v9544_v0 }
0x2654   : > { %8344 = vmatpush3.bf16.msra.mxu1 %v10495_v58  ;;  %7968 = vmatprep.mubr.msk.f32.mxu1 %vm3542_vm5, %v10449_v20 }
0x2655   : > { %8345 = vmatprep.subr.bf16.mxu1 %v9544_v0 }
0x2656   : > { %7969 = vmatmul.mubr.msk.f32.gmra.mrb[48].mxu1 %vm3542_vm5, %v10458_v25 }
0x2657   : > { %7990 = vmatprep.mubr.msk.f32.mxu1 %vm9545_vm0, %v9546_v1 }
0x2658   : > { %8348 = vmatpush3.bf16.msk.msra.mxu1 %vm10510_vm10, %v10507_v16 }
0x2659   : > { %8349 = vmatprep.subr.bf16.mxu1 %v9544_v0 }
0x2721   : > { %v7959_v4 = vpop.f32.mrb[42].mxu0 }
0x2722   : > { %v5189_v17 = vmul.f32 %v7959_v4, %v10466_v29  ;;  %v5169_v58 = vpop.f32.mrb[43].mxu0  ;;  %v7221_v4 = vld [vmem:[%s11038_s6 + $0x30] sm:$0xff] }
0x2723   : > { %v5188_v20 = vmul.f32 %v5169_v58, %v10469_v30 }
0x2725   : > { %v8335_v57 = vpack.c.bf16 %v5189_v17, %v5188_v20  ;;  %v7962_v15 = vpop.f32.mrb[44].mxu0  ;;  %v7967_v12 = vpop.f32.mrb[46].mxu1  ;;  %v7222_v17 = vld [vmem:[%s11038_s6 + $0x38] sm:$0xff]  ;;  %v7215_v20 = vld [vmem:[#allocation15 + $0x1] ss:$0 sm:$0xff] }
0x2726   : > { %v5191_v61 = vmul.f32 %v7962_v15, %v10474_v35  ;;  %v5179_v25 = vpop.f32.mrb[45].mxu0  ;;  %v5282_v13 = vmul.f32 %v7967_v12, %v10466_v29  ;;  %v5262_v14 = vpop.f32.mrb[47].mxu1  ;;  %v8366_v58 = vpack.c.bf16 %v7222_v17, %v7221_v4 }
0x2727   : > { %8337 = vmatpush3.bf16.xpose.msk.msra.mxu0 %vm10246_vm3, %v8335_v57  ;;  %v5190_v18 = vmul.f32 %v5179_v25, %v10477_v36  ;;  %v5281_v19 = vmul.f32 %v5262_v14, %v10469_v30  ;;  %v7190_v30 = vld [vmem:[%s11036_s4 + $0x20] sm:$0xff] }
0x2728   : > { %8338 = vmatprep.subr.bf16.mxu0 %v9544_v0 }
0x2729   : > { %v8339_v16 = vpack.c.bf16 %v5191_v61, %v5190_v18  ;;  %v7970_v27 = vpop.f32.mrb[48].mxu1  ;;  %v8350_v23 = vpack.c.bf16 %v5282_v13, %v5281_v19  ;;  %v7233_v18 = vld [vmem:[#allocation21 + $0x1] ss:$0 sm:$0xff] }
0x272a   : > { %v5284_v21 = vmul.f32 %v7970_v27, %v10474_v35  ;;  %v5272_v22 = vpop.f32.mrb[49].mxu1  ;;  %v7191_v35 = vld [vmem:[%s11036_s4 + $0x28] sm:$0xff] }
0x272b   : > { %v5283_v24 = vmul.f32 %v5272_v22, %v10477_v36  ;;  %v7192_v36 = vld [vmem:[%s11036_s4 + $0x30] sm:$0xff]  ;;  %v8357_v32 = vpack.c.bf16 %v7191_v35, %v7190_v30 }
0x272c   : > { %v8360_v34 = vpack.c.bf16 %v7193_v33, %v7192_v36  ;;  %v7217_v22 = vld [vmem:[#allocation16 + $0x1] ss:$0 sm:$0xff] }
0x272d   : > { %v8353_v52 = vpack.c.bf16 %v5284_v21, %v5283_v24  ;;  %v7218_v24 = vld [vmem:[#allocation18 + $0x1] ss:$0 sm:$0xff] }
0x272f   : > { %8341 = vmatpush3.bf16.xpose.msk.msra.mxu0 %vm10246_vm3, %v8339_v16 }
0x2730   : > { %8356 = vmatprep.subr.bf16.mxu0 %v9544_v0 }
0x2736   : > { %7980 = vmatmul.mubr.msk.f32.vlgmr.msra.gmra.mrb[46].mxu0 %vm1759_vm1, %v5095_v51  ;;  %v8372_v51 = vpack.c.bf16 %v7226_v47, %v7225_v42 }
0x2737   : > { %8012 = vmatprep.mubr.msk.f32.mxu0 %vm9545_vm0, %v9546_v1  ;;  %8358 = vmatpush3.bf16.msra.mxu0 %v8357_v32 }
0x2738   : > { %8359 = vmatprep.subr.bf16.mxu0 %v9544_v0 }
0x273b   : > { %8361 = vmatpush3.bf16.msra.mxu0 %v8360_v34 }
0x273c   : > { %8368 = vmatprep.subr.bf16.mxu0 %v9544_v0 }
0x2809   : > { %v5365_v63 = vpop.f32.mrb[46].mxu0 }
0x280a   : > { %v5369_v3 = vmul.f32 0.35355338, %v5365_v63  ;;  %v7981_v7 = vpop.f32.mrb[47].mxu0 }
0x280c   : > { %v5370_v11 = vsel %vm3825_vm7, %v5369_v3, -inf }
0x280d   : > { %5371 = vmax.xlane.f32.xlu0 %v5370_v11 }
0x289a   : > { %v5372_v28 = vpop.xlane.xlu0 %5371 }
0x289b   : > { %v5373_v31 = vsub.f32 %v5369_v3, %v5372_v28 }
0x289d   : > { %v5374_v8 = vmul.f32 1.442695, %v5373_v31 }
0x289f   : > { %8749 = vpow2.f32 %v5374_v8 }
0x28a9   : > { %v8750_v29 = vpop.eup %8749 }
0x28aa   : > { %7991 = vmatmul.mubr.msk.f32.vlgmr.msra.gmra.mrb[50].mxu1 %vm3832_vm11, %v8750_v29 }
0x28ab   : > { %8351 = vmatpush3.bf16.msra.mxu1 %v8350_v23  ;;  %8001 = vmatprep.mubr.msk.f32.mxu1 %vm9545_vm0, %v9546_v1 }
0x28ac   : > { %8352 = vmatprep.subr.bf16.mxu1 %v9544_v0 }
0x28af   : > { %8355 = vmatpush3.bf16.msk.msra.mxu1 %vm10510_vm10, %v8353_v52 }
0x28b0   : > { %8362 = vmatprep.subr.bf16.mxu1 %v9544_v0 }
0x297d   : > { %v5445_v60 = vpop.f32.mrb[50].mxu1 }
0x297e   : > { %8751 = vrcp.f32 %v5445_v60  ;;  %v7992_v37 = vpop.f32.mrb[51].mxu1 }
0x2988   : > { %v8752_v38 = vpop.eup %8751 }
0x2989   : > { %v5450_v39 = vmul.f32 %v8752_v38, %v8750_v29  ;;  %v7231_v38 = vld [vmem:[#allocation19 + $0x1] ss:$0 sm:$0xff] }
0x298b   : > { %8002 = vmatmul.mubr.msk.f32.vlgmr.msra.gmra.mrb[52].mxu1 %vm3832_vm11, %v5450_v39 }
0x298c   : > { %8023 = vmatprep.mubr.msk.f32.mxu1 %vm9545_vm0, %v9546_v1  ;;  %8364 = vmatpush3.bf16.msra.mxu1 %v8363_v55 }
0x298d   : > { %8365 = vmatprep.subr.bf16.mxu1 %v9544_v0 }
0x2990   : > { %8367 = vmatpush3.bf16.msra.mxu1 %v8366_v58 }
0x2a5e   : > { %v5523_v49 = vpop.f32.mrb[52].mxu1 }
0x2a5f   : > { %v8003_v50 = vpop.f32.mrb[53].mxu1  ;;  %8013 = vmatmul.mubr.msk.f32.vlgmr.msra.gmra.mrb[48].mxu0 %vm1759_vm1, %v5523_v49 }
0x2a60   : > { %8370 = vmatpush3.bf16.msra.mxu0 %v8369_v40  ;;  %8034 = vmatprep.mubr.msk.f32.mxu0 %vm9545_vm0, %v9546_v1 }
0x2a61   : > { %8371 = vmatprep.subr.bf16.mxu0 %v9544_v0 }
0x2a64   : > { %8373 = vmatpush3.bf16.msra.mxu0 %v8372_v51  ;;  %v7229_v51 = vld [vmem:[%s11039_s7 + $0x30] sm:$0xff] }
0x2a67   : > { %8035 = vmatmul.mubr.msk.f32.vlgmr.msra.gmra.mrb[50].mxu0 %vm1759_vm1, %v10554_v5 }
0x2a68   : > { %8047 = vmatprep.mubr.msk.f32.mxu0 %vm1836_vm2, %v10559_v6 }
0x2b32   : > { %v5602_v57 = vpop.f32.mrb[48].mxu0 }
0x2b33   : > { %v5603_v15 = vadd.f32 %v7215_v20, %v5602_v57  ;;  %v8014_v61 = vpop.f32.mrb[49].mxu0 }
0x2b35   : > { %v5606_v25 = vadd.f32 %v5603_v15, %v10689_v48 }
0x2b37   : > { %v5611_v5 = vsel %vm4070_vm12, %v5606_v25, 0.0 }
0x2b38   : > { %5612 = vadd.xlane.f32.xlu0 %v5611_v5 }
0x2b3a   : > { %v5810_v16 = vpop.f32.mrb[50].mxu0 }
0x2b3b   : > { %v5811_v63 = vadd.f32 %v7233_v18, %v5810_v16  ;;  %v8036_v3 = vpop.f32.mrb[51].mxu0 }
0x2b3d   : > { %8037 = vmatprep.subr.mxu1 %v5811_v63 }
0x2bc5   : > { %v5613_v7 = vpop.xlane.xlu0 %5612 }
0x2bc6   : > { %v5614_v11 = vmul.f32 0.03125, %v5613_v7 }
0x2bc8   : > { %v5615_v12 = vsub.f32 %v5606_v25, %v5614_v11 }
0x2bca   : > { %v5616_v13 = vmul.f32 %v5615_v12, %v5615_v12 }
0x2bcc   : > { %v5617_v14 = vsel %vm4070_vm12, %v5616_v13, 0.0 }
0x2bcd   : > { %5618 = vadd.xlane.f32.xlu1 %v5617_v14 }
0x2c5a   : > { %v5619_v19 = vpop.xlane.xlu1 %5618 }
0x2c5b   : > { %v5620_v27 = vmul.f32 0.03125, %v5619_v19 }
0x2c5d   : > { %v5621_v21 = vadd.f32 1e-05, %v5620_v27 }
0x2c5f   : > { %8753 = vrsqrt.f32 %v5621_v21 }
0x2c69   : > { %v8754_v48 = vpop.eup %8753 }
0x2c6a   : > { %v5623_v23 = vmul.f32 %v8754_v48, %v5615_v12  ;;  %v7254_v48 = vld [vmem:[%s11040_s8 + $0x20] sm:$0xff] }
0x2c6c   : > { %v5630_v52 = vmul.f32 %v7217_v22, %v5623_v23  ;;  %v7255_v22 = vld [vmem:[%s11040_s8 + $0x28] sm:$0xff] }
0x2c6d   : > { %v8401_v23 = vpack.c.bf16 %v7255_v22, %v7254_v48 }
0x2c6e   : > { %v10779_v28 = vadd.f32 %v7218_v24, %v5630_v52  ;;  %v7256_v24 = vld [vmem:[%s11040_s8 + $0x30] sm:$0xff]  ;;  %v7257_v52 = vld [vmem:[%s11040_s8 + $0x38] sm:$0xff] }
0x2c70   : > { %8024 = vmatmul.mubr.msk.f32.vlgmr.msra.gmra.mrb[54].mxu1 %vm1759_vm1, %v10779_v28 }
0x2c71   : > { %8038 = vmatpush3.msra.mxu1 %v5811_v63  ;;  %8039 = vmatprep.mubr.msk.f32.mxu1 %vm1836_vm2, %v10559_v6 }
0x2c72   : > { %8374 = vmatprep.subr.bf16.mxu1 %v9544_v0 }
0x2c74   : > { %8040 = vmatmul.mubr.msk.f32.vlgmr.msra.gmra.mrb[56].mxu1 %vm1836_vm2, %v10573_v44 }
0x2c75   : > { %8042 = vmatprep.mubr.msk.f32.mxu1 %vm1836_vm2, %v10580_v45 }
0x2c78   : > { %8043 = vmatmul.mubr.msk.f32.gmra.mrb[58].mxu1 %vm1836_vm2, %v10586_v46 }
0x2c79   : > { %8061 = vmatprep.mubr.msk.f32.mxu1 %vm9545_vm0, %v9546_v1 }
0x2d43   : > { %v5734_v31 = vpop.f32.mrb[54].mxu1 }
0x2d44   : > { %v8025_v8 = vpop.f32.mrb[55].mxu1  ;;  %v5735_v39 = vadd.f32 %v7231_v38, %v5734_v31  ;;  %v7258_v31 = vld [vmem:[%s11041_s9 + $0x40] sm:$0xff] }
0x2d45   : > { %v7259_v8 = vld [vmem:[%s11041_s9 + $0x48] sm:$0xff] }
0x2d47   : > { %v8041_v29 = vpop.f32.mrb[56].mxu1 }
0x2d48   : > { %v5900_v30 = vmul.f32 %v10610_v56, %v8041_v29  ;;  %v5880_v6 = vpop.f32.mrb[57].mxu1  ;;  %v7260_v29 = vld [vmem:[%s11041_s9 + $0x50] sm:$0xff] }
0x2d49   : > { %v5899_v35 = vmul.f32 %v10614_v59, %v5880_v6  ;;  %v7261_v6 = vld [vmem:[%s11041_s9 + $0x58] sm:$0xff] }
0x2d4b   : > { %v8375_v36 = vpack.c.bf16 %v5900_v30, %v5899_v35  ;;  %v8044_v32 = vpop.f32.mrb[58].mxu1  ;;  %v8407_v30 = vpack.c.bf16 %v7259_v8, %v7258_v31  ;;  %v8410_v35 = vpack.c.bf16 %v7261_v6, %v7260_v29  ;;  %v7273_v8 = vld [vmem:[#allocation34] ss:$0 sm:$0xff]  ;;  %v7274_v6 = vld [vmem:[#allocation36] ss:$0 sm:$0xff] }
0x2d4c   : > { %v5902_v33 = vmul.f32 %v10618_v2, %v8044_v32  ;;  %v5890_v34 = vpop.f32.mrb[59].mxu1  ;;  %v7263_v32 = vld [vmem:[%s11041_s9 + $0x68] sm:$0xff] }
0x2d4d   : > { %8377 = vmatpush3.bf16.xpose.msk.msra.mxu1 %vm10246_vm3, %v8375_v36  ;;  %v5901_v60 = vmul.f32 %v10624_v10, %v5890_v34  ;;  %v7262_v36 = vld [vmem:[%s11041_s9 + $0x60] sm:$0xff] }
0x2d4e   : > { %8378 = vmatprep.subr.bf16.mxu1 %v9544_v0 }
0x2d4f   : > { %v8379_v37 = vpack.c.bf16 %v5902_v33, %v5901_v60  ;;  %v8413_v33 = vpack.c.bf16 %v7263_v32, %v7262_v36 }
0x2d55   : > { %8381 = vmatpush3.bf16.xpose.msk.msra.mxu1 %vm10246_vm3, %v8379_v37 }
0x2d56   : > { %8394 = vmatprep.subr.bf16.mxu1 %v9544_v0 }
0x2d5c   : > { %8062 = vmatmul.mubr.msk.f32.vlgmr.msra.gmra.mrb[60].mxu1 %vm1759_vm1, %v5735_v39  ;;  %v7252_v39 = vld [vmem:[#allocation24 + $0x1] ss:$0 sm:$0xff] }
0x2d5d   : > { %8094 = vmatprep.mubr.msk.f32.mxu1 %vm9545_vm0, %v9546_v1 }
0x2e2f   : > { %v6077_v62 = vpop.f32.mrb[60].mxu1 }
0x2e30   : > { %v6081_v9 = vmul.f32 0.35355338, %v6077_v62  ;;  %v8063_v40 = vpop.f32.mrb[61].mxu1 }
0x2e32   : > { %v6082_v42 = vsel %vm4070_vm12, %v6081_v9, -inf }
0x2e33   : > { %6083 = vmax.xlane.f32.xlu0 %v6082_v42 }
0x2e49   : > { %5904 = vrot.lane.b32.xlu0 %v5811_v63, %s11031_s3  ;;  %s1711_s3 = scalar_lea.vmem %s9788_s17, %s11042_s1 }
0x2ec0   : > { %v6084_v47 = vpop.xlane.xlu0 %6083 }
0x2ec1   : > { %v6085_v26 = vsub.f32 %v6081_v9, %v6084_v47  ;;  %v7253_v9 = vld [vmem:[#allocation25 + $0x1] ss:$0 sm:$0xff]  ;;  %v7264_v47 = vld [vmem:[%s11041_s9 + $0x70] sm:$0xff] }
0x2ec3   : > { %v6086_v49 = vmul.f32 1.442695, %v6085_v26  ;;  %v7265_v26 = vld [vmem:[%s11041_s9 + $0x78] sm:$0xff] }
0x2ec4   : > { %v5905_v50 = vpop.permute.xlu0 %5904 }
0x2ec5   : > { %8755 = vpow2.f32 %v6086_v49  ;;  %8045 = vmatprep.subr.mxu0 %v5905_v50  ;;  %v8416_v49 = vpack.c.bf16 %v7265_v26, %v7264_v47 }
0x2ec6   : > { %8046 = vmatpush3.msra.mxu0 %v5905_v50  ;;  %v7266_v50 = vld [vmem:[#allocation27 + $0x1] ss:$0 sm:$0xff] }
0x2ec7   : > { %8048 = vmatmul.mubr.msk.f32.vlgmr.msra.gmra.mrb[52].mxu0 %vm1836_vm2, %v10573_v44  ;;  %8382 = vmatprep.subr.bf16.mxu0 %v9544_v0 }
0x2ec8   : > { %8384 = vmatpush3.bf16.msra.mxu0 %v10268_v41  ;;  %8050 = vmatprep.mubr.msk.f32.mxu0 %vm1836_vm2, %v10580_v45  ;;  %v7227_v41 = vld [vmem:[%s11039_s7 + $0x20] sm:$0xff]  ;;  %v7228_v45 = vld [vmem:[%s11039_s7 + $0x28] sm:$0xff] }
0x2ec9   : > { %8385 = vmatprep.subr.bf16.mxu0 %v9544_v0  ;;  %v8395_v53 = vpack.c.bf16 %v7228_v45, %v7227_v41 }
0x2ecb   : > { %8051 = vmatmul.mubr.msk.f32.gmra.mrb[54].mxu0 %vm1836_vm2, %v10586_v46  ;;  %8396 = vmatpush3.bf16.msra.mxu1 %v8395_v53  ;;  %v8398_v46 = vpack.c.bf16 %v7230_v54, %v7229_v51  ;;  %v7268_v53 = vld [vmem:[#allocation28 + $0x1] ss:$0 sm:$0xff] }
0x2ecc   : > { %8387 = vmatpush3.bf16.msra.mxu0 %v10272_v43  ;;  %8072 = vmatprep.mubr.msk.f32.mxu0 %vm9545_vm0, %v9546_v1 }
0x2ecd   : > { %8388 = vmatprep.subr.bf16.mxu0 %v9544_v0  ;;  %8397 = vmatprep.subr.bf16.mxu1 %v9544_v0 }
0x2ecf   : > { %v8756_v44 = vpop.eup %8755  ;;  %8399 = vmatpush3.bf16.msra.mxu1 %v8398_v46 }
0x2ed0   : > { %8073 = vmatmul.mubr.msk.f32.vlgmr.msra.gmra.mrb[56].mxu0 %vm1759_vm1, %v8756_v44  ;;  %8406 = vmatprep.subr.bf16.mxu1 %v9544_v0 }
0x2ed1   : > { %8083 = vmatprep.mubr.msk.f32.mxu0 %vm9545_vm0, %v9546_v1 }
0x2f9a   : > { %v8049_v43 = vpop.f32.mrb[52].mxu0 }
0x2f9b   : > { %v5993_v55 = vmul.f32 %v10610_v56, %v8049_v43  ;;  %v5973_v4 = vpop.f32.mrb[53].mxu0 }
0x2f9c   : > { %v5992_v17 = vmul.f32 %v10614_v59, %v5973_v4 }
0x2f9e   : > { %v8389_v58 = vpack.c.bf16 %v5993_v55, %v5992_v17  ;;  %v8052_v20 = vpop.f32.mrb[54].mxu0 }
0x2f9f   : > { %v5995_v57 = vmul.f32 %v10618_v2, %v8052_v20  ;;  %v5983_v15 = vpop.f32.mrb[55].mxu0 }
0x2fa0   : > { %v5994_v61 = vmul.f32 %v10624_v10, %v5983_v15  ;;  %8390 = vmatpush3.bf16.msra.mxu0 %v8389_v58  ;;  %v7250_v10 = vld [vmem:[#allocation22 + $0x1] ss:$0 sm:$0xff] }
0x2fa1   : > { %8391 = vmatprep.subr.bf16.mxu0 %v9544_v0 }
0x2fa2   : > { %v8392_v25 = vpack.c.bf16 %v5995_v57, %v5994_v61 }
0x2fa3   : > { %v6157_v5 = vpop.f32.mrb[56].mxu0 }
0x2fa4   : > { %8757 = vrcp.f32 %v6157_v5  ;;  %v8074_v18 = vpop.f32.mrb[57].mxu0  ;;  %8393 = vmatpush3.bf16.msra.mxu0 %v8392_v25 }
0x2fa5   : > { %8400 = vmatprep.subr.bf16.mxu0 %v9544_v0  ;;  %v7270_v18 = vld [vmem:[#allocation30 + $0x1] ss:$0 sm:$0xff] }
0x2fae   : > { %v8758_v56 = vpop.eup %8757 }
0x2faf   : > { %v6162_v16 = vmul.f32 %v8758_v56, %v8756_v44 }
0x2fb1   : > { %8084 = vmatmul.mubr.msk.f32.vlgmr.msra.gmra.mrb[58].mxu0 %vm1759_vm1, %v6162_v16  ;;  %v7271_v16 = vld [vmem:[#allocation31 + $0x1] ss:$0 sm:$0xff] }
0x2fb2   : > { %8105 = vmatprep.mubr.msk.f32.mxu0 %vm9545_vm0, %v9546_v1  ;;  %8402 = vmatpush3.bf16.msra.mxu0 %v8401_v23 }
0x2fb3   : > { %8403 = vmatprep.subr.bf16.mxu0 %v9544_v0 }
0x3084   : > { %v6232_v59 = vpop.f32.mrb[58].mxu0 }
0x3085   : > { %v8085_v2 = vpop.f32.mrb[59].mxu0  ;;  %8095 = vmatmul.mubr.msk.f32.vlgmr.msra.gmra.mrb[62].mxu1 %vm1759_vm1, %v6232_v59 }
0x3086   : > { %8124 = vmatprep.mubr.msk.f32.mxu1 %vm9545_vm0, %v9546_v1  ;;  %8408 = vmatpush3.bf16.msra.mxu1 %v8407_v30 }
0x3087   : > { %8409 = vmatprep.subr.bf16.mxu1 %v9544_v0 }
0x308a   : > { %8411 = vmatpush3.bf16.msra.mxu1 %v8410_v35 }
0x308b   : > { %8412 = vmatprep.subr.bf16.mxu1 %v9544_v0 }
0x308e   : > { %8414 = vmatpush3.bf16.msra.mxu1 %v8413_v33 }
0x308f   : > { %8415 = vmatprep.subr.bf16.mxu1 %v9544_v0 }
0x3092   : > { %8417 = vmatpush3.bf16.msra.mxu1 %v8416_v49 }
0x3158   : > { %v6311_v63 = vpop.f32.mrb[62].mxu1 }
0x3159   : > { %v6312_v3 = vadd.f32 %v7250_v10, %v6311_v63  ;;  %v8096_v7 = vpop.f32.mrb[63].mxu1 }
0x315b   : > { %v6315_v11 = vadd.f32 %v6312_v3, %v10779_v28  ;;  %v8404_v28 = vpack.c.bf16 %v7257_v52, %v7256_v24 }
0x315d   : > { %v6320_v12 = vsel %vm4070_vm12, %v6315_v11, 0.0  ;;  %8405 = vmatpush3.bf16.msra.mxu0 %v8404_v28  ;;  %v7272_v28 = vld [vmem:[#allocation33] ss:$0 sm:$0xff] }
0x315e   : > { %6321 = vadd.xlane.f32.xlu0 %v6320_v12  ;;  %8418 = vmatprep.subr.bf16.mxu0 %v9544_v0 }
0x31eb   : > { %v6322_v13 = vpop.xlane.xlu0 %6321 }
0x31ec   : > { %v6323_v14 = vmul.f32 0.03125, %v6322_v13  ;;  %v6585_v13 = vld [vmem:[%s9778_s27] sm:$0xff] }
0x31ee   : > { %v6324_v19 = vsub.f32 %v6315_v11, %v6323_v14  ;;  %v6586_v14 = vld [vmem:[%s9778_s27 + $0x8] sm:$0xff] }
0x31f0   : > { %v6325_v27 = vmul.f32 %v6324_v19, %v6324_v19 }
0x31f2   : > { %v6326_v21 = vsel %vm4070_vm12, %v6325_v27, 0.0  ;;  %v6587_v27 = vld [vmem:[%s9778_s27 + $0x10] sm:$0xff] }
0x31f3   : > { %6327 = vadd.xlane.f32.xlu1 %v6326_v21  ;;  %v6588_v21 = vld [vmem:[%s9778_s27 + $0x18] sm:$0xff] }
0x31f4   : > { %v8422_v48 = vpack.c.bf16 %v6588_v21, %v6587_v27 }
0x3280   : > { %v6328_v34 = vpop.xlane.xlu1 %6327 }
0x3281   : > { %v6329_v60 = vmul.f32 0.03125, %v6328_v34 }
0x3283   : > { %v6330_v37 = vadd.f32 1e-05, %v6329_v60 }
0x3285   : > { %8759 = vrsqrt.f32 %v6330_v37 }
0x328f   : > { %v8760_v38 = vpop.eup %8759 }
0x3290   : > { %v6332_v62 = vmul.f32 %v8760_v38, %v6324_v19  ;;  %v8419_v19 = vpack.c.bf16 %v6586_v14, %v6585_v13 }
0x3292   : > { %v6339_v40 = vmul.f32 %v7252_v39, %v6332_v62 }
0x3294   : > { %v6346_v42 = vadd.f32 %v7253_v9, %v6339_v40 }
0x3296   : > { %8106 = vmatmul.mubr.msk.f32.vlgmr.msra.gmra.mrb[60].mxu0 %vm1759_vm1, %v6346_v42 }
0x3297   : > { %8135 = vmatprep.mubr.msk.f32.mxu0 %vm9545_vm0, %v9546_v1  ;;  %8420 = vmatpush3.bf16.msra.mxu0 %v8419_v19 }
0x3298   : > { %8421 = vmatprep.subr.bf16.mxu0 %v9544_v0 }
0x329b   : > { %8423 = vmatpush3.bf16.msra.mxu0 %v8422_v48 }
0x3369   : > { %v6440_v44 = vpop.f32.mrb[60].mxu0 }
0x336a   : > { %v6441_v41 = vadd.f32 %v7266_v50, %v6440_v44  ;;  %v8107_v45 = vpop.f32.mrb[61].mxu0 }
0x336c   : > { %v6444_v51 = vmax.f32 %v6441_v41, 0.0 }
0x336e   : > { %8125 = vmatmul.mubr.msk.f32.vlgmr.msra.gmra.mrb[64].mxu1 %vm2479_vm4, %v6444_v51 }
0x3441   : > { %v6520_v54 = vpop.f32.mrb[64].mxu1 }
0x3442   : > { %v6521_v46 = vadd.f32 %v7268_v53, %v6520_v54  ;;  %v8126_v43 = vpop.f32.mrb[65].mxu1 }
0x3444   : > { %v6524_v55 = vadd.f32 %v6521_v46, %v6346_v42 }
0x3446   : > { %v6529_v4 = vsel %vm4070_vm12, %v6524_v55, 0.0 }
0x3447   : > { %6530 = vadd.xlane.f32.xlu1 %v6529_v4 }
0x34d4   : > { %v6531_v1 = vpop.xlane.xlu1 %6530 }
0x34d5   : > { %v6532_v17 = vmul.f32 0.03125, %v6531_v1 }
0x34d7   : > { %v6533_v58 = vsub.f32 %v6524_v55, %v6532_v17 }
0x34d9   : > { %v6534_v20 = vmul.f32 %v6533_v58, %v6533_v58 }
0x34db   : > { %v6535_v57 = vsel %vm4070_vm12, %v6534_v20, 0.0 }
0x34dc   : > { %6536 = vadd.xlane.f32.xlu1 %v6535_v57 }
0x3569   : > { %v6537_v15 = vpop.xlane.xlu1 %6536 }
0x356a   : > { %v6538_v61 = vmul.f32 0.03125, %v6537_v15 }
0x356c   : > { %v6539_v25 = vadd.f32 1e-05, %v6538_v61 }
0x356e   : > { %8761 = vrsqrt.f32 %v6539_v25 }
0x3578   : > { %v8762_v5 = vpop.eup %8761 }
0x3579   : > { %v6541_v56 = vmul.f32 %v8762_v5, %v6533_v58 }
0x357b   : > { %v6548_v59 = vmul.f32 %v7270_v18, %v6541_v56 }
0x357d   : > { %v6555_v2 = vadd.f32 %v7271_v16, %v6548_v59 }
0x357f   : > { %v6558_v10 = vsel %vm4070_vm12, %v6555_v2, 0.0 }
0x3580   : > { %6559 = vadd.xlane.f32.xlu1 %v6558_v10 }
0x360d   : > { %v6560_v63 = vpop.xlane.xlu1 %6559 }
0x360e   : > { %v6561_v3 = vmul.f32 0.03125, %v6560_v63 }
0x3610   : > { %v6562_v7 = vsub.f32 %v6555_v2, %v6561_v3 }
0x3612   : > { %v6563_v11 = vmul.f32 %v6562_v7, %v6562_v7 }
0x3614   : > { %v6564_v12 = vsel %vm4070_vm12, %v6563_v11, 0.0 }
0x3615   : > { %6565 = vadd.xlane.f32.xlu1 %v6564_v12 }
0x36a2   : > { %v6566_v22 = vpop.xlane.xlu1 %6565 }
0x36a3   : > { %v6567_v23 = vmul.f32 0.03125, %v6566_v22 }
0x36a5   : > { %v6568_v24 = vadd.f32 1e-05, %v6567_v23 }
0x36a7   : > { %8763 = vrsqrt.f32 %v6568_v24 }
0x36b1   : > { %v8764_v52 = vpop.eup %8763 }
0x36b2   : > { %v6570_v31 = vmul.f32 %v8764_v52, %v6562_v7 }
0x36b4   : > { %v6577_v29 = vmul.f32 %v7272_v28, %v6570_v31 }
0x36b6   : > { %v6584_v30 = vadd.f32 %v7273_v8, %v6577_v29 }
0x36b8   : > { %8136 = vmatmul.mubr.msk.f32.vlgmr.msra.gmra.mrb[62].mxu0 %vm1759_vm1, %v6584_v30 }
0x378b   : > { %v6665_v0 = vpop.f32.mrb[62].mxu0 }
0x378c   : > { %v6666_v35 = vadd.f32 %v7274_v6, %v6665_v0  ;;  %v8137_v36 = vpop.f32.mrb[63].mxu0 }
0x378e   : > { %6669 = vst [vmem:[%s1711_s3] sm:$0x7f] %v6666_v35 }
0x378f PF: > { %s115_s15 = sadd.s32 1, %s9471_s15  }
0x3790   : > { %p112_p1 = scmp.ge.s32.totalorder %s115_s15, 4  }
0x3792   :  { %114 = sbr.rel (!%p112_p1) target bundleno = 97 (0x61), region = 408 }
0x3799   :  { %6689 = vsyncpa [#allocation3], 1 }
0x379a   :  { %6691 = vsyncpa [#allocation3 + $0x1], 1 }
0x379b   :  { %6692 = vsyncpa [#allocation5], 1 }
0x379c   :  { %6693 = vsyncpa [#allocation8], 1 }
0x379d   :  { %6694 = vsyncpa [#allocation11], 1 }
0x379e   :  { %6695 = vsyncpa [#allocation14], 1 }
0x379f   :  { %6696 = vsyncpa [#allocation17], 1 }
0x37a0   :  { %6697 = vsyncpa [#allocation20], 1 }
0x37a1   :  { %6698 = vsyncpa [#allocation23], 1 }
0x37a2   :  { %6699 = vsyncpa [#allocation26], 1 }
0x37a3   :  { %6700 = vsyncpa [#allocation29], 1 }
0x37a4   :  { %6701 = vsyncpa [#allocation32], 1 }
0x37a5   :  { %6702 = vsyncpa [#allocation35], 1 }

</bundles_post_ra>
